<compile_context>
chip_gen: v7x
topology: tpu7x:2x2x1
jax: 0.10.0
libtpu: 0.0.40
codegen_flags: <defaults>
</compile_context>

<pallas_src>
import functools

import jax
import jax.numpy as jnp
from jax import lax
from jax.experimental import pallas as pl
from jax.experimental.pallas import tpu as pltpu


# ------------------------------ fused kernel -------------------------------

def _fused_cnn_kernel(x_ref, w1_ref, b1_ref, w2_ref, b2_ref, wfc_ref, bfc_ref,
                      o_ref, h1_ref, q1_ref, h2_ref):
    """Whole SimpleCNN2Layer forward for one batch sample (grid over N).

    x_ref   : [1, H, W, Cin]           (NHWC slice of the input)
    w1_ref  : [4, Cin, C1]             conv1 taps in (dh*2+dw) order
    w2_ref  : [4, C1, C2]              conv2 taps in (dh*2+dw) order
    wfc_ref : [Hq2, Wq2, C2, out_pad]  fc weights permuted to (h, w, c, out)
    o_ref   : [1, 1, out_pad]          lane-dense logits (padded to 128)
    scratch : h1 [Ho1,Wo1,C1], q1 [Hq1,Wq1,C1], h2 [Ho2,Wo2,C2]  (VMEM)
    """
    f32 = jnp.float32
    _, H, W, Cin = x_ref.shape
    Ho1, Wo1, C1 = h1_ref.shape
    Hq1, Wq1, _ = q1_ref.shape
    Ho2, Wo2, C2 = h2_ref.shape
    Hq2, Wq2, _, out_pad = wfc_ref.shape

    def shift_mats(wo, wi):
        # S_dw[wo, v] = 1 iff v == wo + dw - 1  (pad=1 tap along W)
        r = lax.broadcasted_iota(jnp.int32, (wo, wi), 0)
        c = lax.broadcasted_iota(jnp.int32, (wo, wi), 1)
        return (c == r - 1).astype(f32), (c == r).astype(f32)

    def pool_mats(wq, wo):
        # even / odd column selectors for the 2x2 maxpool along W
        r = lax.broadcasted_iota(jnp.int32, (wq, wo), 0)
        c = lax.broadcasted_iota(jnp.int32, (wq, wo), 1)
        return (c == 2 * r).astype(f32), (c == 2 * r + 1).astype(f32)

    def conv2x2_relu(row_fn, w_ref, b_ref, s0, s1, dst_ref, ho_count):
        # out[ho, wo, co] = relu(b + sum_{dh,dw,ci} xpad[ho+dh, wo+dw, ci] * w)
        b = b_ref[...]
        for ho in range(ho_count):
            top = row_fn(ho - 1)   # padded row ho     (dh = 0)
            bot = row_fn(ho)       # padded row ho + 1 (dh = 1)
            acc = jnp.dot(jnp.dot(s0, top), w_ref[0],
                          preferred_element_type=f32)
            acc = acc + jnp.dot(jnp.dot(s1, top), w_ref[1],
                                preferred_element_type=f32)
            acc = acc + jnp.dot(jnp.dot(s0, bot), w_ref[2],
                                preferred_element_type=f32)
            acc = acc + jnp.dot(jnp.dot(s1, bot), w_ref[3],
                                preferred_element_type=f32)
            dst_ref[ho] = jnp.maximum(acc + b, 0.0)

    # ---- conv1 (k=2, pad=1) + ReLU ----------------------------------------
    s0a, s1a = shift_mats(Wo1, W)
    z1 = jnp.zeros((W, Cin), f32)
    conv2x2_relu(lambda i: x_ref[0, i] if 0 <= i < H else z1,
                 w1_ref, b1_ref, s0a, s1a, h1_ref, Ho1)

    # ---- maxpool1 (2x2 / stride 2) -----------------------------------------
    pe1, po1 = pool_mats(Wq1, Wo1)
    for q in range(Hq1):
        m = jnp.maximum(h1_ref[2 * q], h1_ref[2 * q + 1])
        q1_ref[q] = jnp.maximum(jnp.dot(pe1, m, preferred_element_type=f32),
                                jnp.dot(po1, m, preferred_element_type=f32))

    # ---- conv2 (k=2, pad=1) + ReLU ----------------------------------------
    s0b, s1b = shift_mats(Wo2, Wq1)
    z2 = jnp.zeros((Wq1, C1), f32)
    conv2x2_relu(lambda i: q1_ref[i] if 0 <= i < Hq1 else z2,
                 w2_ref, b2_ref, s0b, s1b, h2_ref, Ho2)

    # ---- maxpool2 fused with fc (flatten order baked into wfc) -------------
    pe2, po2 = pool_mats(Wq2, Wo2)
    acc = bfc_ref[...]                                   # [1, out_pad]
    for q in range(Hq2):
        m = jnp.maximum(h2_ref[2 * q], h2_ref[2 * q + 1])
        pooled = jnp.maximum(jnp.dot(pe2, m, preferred_element_type=f32),
                             jnp.dot(po2, m, preferred_element_type=f32))
        for w in range(Wq2):
            sel = (lax.broadcasted_iota(jnp.int32, (1, Wq2), 1) == w).astype(f32)
            row = jnp.dot(sel, pooled, preferred_element_type=f32)  # [1, C2]
            acc = acc + jnp.dot(row, wfc_ref[q, w],
                                preferred_element_type=f32)
    o_ref[0] = acc


# --------------------- one-time parameter repacking ------------------------

def prepare_params(params):
    """Repack PyTorch-layout weights into kernel-friendly layouts (done once)."""
    conv1_w = params["conv1_w"]                 # [C1, Cin, 2, 2]
    conv2_w = params["conv2_w"]                 # [C2, C1, 2, 2]
    fc_w, fc_b = params["fc_w"], params["fc_b"]  # [out, C2*Hq2*Wq2], [out]
    C1, Cin = conv1_w.shape[0], conv1_w.shape[1]
    C2 = conv2_w.shape[0]
    out_dim, fc_in = fc_w.shape
    side = int(round((fc_in // C2) ** 0.5))     # Hq2 == Wq2
    out_pad = ((out_dim + 127) // 128) * 128    # lane-dense output width

    w1 = jnp.transpose(conv1_w, (2, 3, 1, 0)).reshape(4, Cin, C1)
    w2 = jnp.transpose(conv2_w, (2, 3, 1, 0)).reshape(4, C1, C2)
    b1 = params["conv1_b"].reshape(1, C1)
    b2 = params["conv2_b"].reshape(1, C2)
    # torch flatten order is (c, h, w); permute columns once to (h, w, c, out)
    wfc = jnp.transpose(fc_w.reshape(out_dim, C2, side, side), (2, 3, 1, 0))
    wfc = jnp.pad(wfc, ((0, 0), (0, 0), (0, 0), (0, out_pad - out_dim)))
    bfc = jnp.pad(fc_b, (0, out_pad - out_dim)).reshape(1, out_pad)
    return {"w1": w1, "b1": b1, "w2": w2, "b2": b2, "wfc": wfc, "bfc": bfc}


# ------------------------------- forward -----------------------------------

def simple_cnn2layer_forward(x_nchw, prep, *, output_dim):
    x = jnp.transpose(x_nchw, (0, 2, 3, 1)).astype(jnp.float32)   # NCHW -> NHWC
    N, H, W, Cin = x.shape
    assert H == W and H % 4 == 1, "input_dim must be in {1, 5, 9, 13, ...}"
    Ho1, Wo1 = H + 1, W + 1
    Hq1, Wq1 = Ho1 // 2, Wo1 // 2
    Ho2, Wo2 = Hq1 + 1, Wq1 + 1
    Hq2, Wq2 = Ho2 // 2, Wo2 // 2
    C1 = prep["w1"].shape[2]
    C2 = prep["w2"].shape[2]
    out_pad = prep["wfc"].shape[-1]

    grid_spec = pltpu.PrefetchScalarGridSpec(
        num_scalar_prefetch=0,
        grid=(N,),
        in_specs=[
            pl.BlockSpec((1, H, W, Cin), lambda n: (n, 0, 0, 0)),
            pl.BlockSpec((4, Cin, C1), lambda n: (0, 0, 0)),
            pl.BlockSpec((1, C1), lambda n: (0, 0)),
            pl.BlockSpec((4, C1, C2), lambda n: (0, 0, 0)),
            pl.BlockSpec((1, C2), lambda n: (0, 0)),
            pl.BlockSpec((Hq2, Wq2, C2, out_pad), lambda n: (0, 0, 0, 0)),
            pl.BlockSpec((1, out_pad), lambda n: (0, 0)),
        ],
        out_specs=pl.BlockSpec((1, 1, out_pad), lambda n: (n, 0, 0)),
        scratch_shapes=[
            pltpu.VMEM((Ho1, Wo1, C1), jnp.float32),   # conv1 + relu
            pltpu.VMEM((Hq1, Wq1, C1), jnp.float32),   # pool1
            pltpu.VMEM((Ho2, Wo2, C2), jnp.float32),   # conv2 + relu
        ],
    )
    out = pl.pallas_call(
        _fused_cnn_kernel,
        out_shape=jax.ShapeDtypeStruct((N, 1, out_pad), jnp.float32),
        grid_spec=grid_spec,
        compiler_params=pltpu.CompilerParams(
            dimension_semantics=("parallel",)),   # 2 TCs on v7x split the batch
    )(x, prep["w1"], prep["b1"], prep["w2"], prep["b2"],
      prep["wfc"], prep["bfc"])
    return out[:, 0, :output_dim]


# --------------------- module geometry / parameter init --------------------

def _outdim(indim, padding, dilation, kernel_size, stride):
    x = indim + 2 * padding - dilation * (kernel_size - 1) - 1
    return x / stride + 1


def fc_dim(indim):
    a = _outdim(indim, 1, 1, 2, 1)
    b = _outdim(a, 0, 1, 2, 2)
    c = _outdim(b, 1, 1, 2, 1)
    d = _outdim(c, 0, 1, 2, 2)
    return int(64 * d ** 2)


def init_params(key, in_channels, output_dim, fc_in):
    ks = jax.random.split(key, 6)
    s = 0.1
    return {
        "conv1_w": s * jax.random.normal(ks[0], (128, in_channels, 2, 2), jnp.float32),
        "conv1_b": s * jax.random.normal(ks[1], (128,), jnp.float32),
        "conv2_w": s * jax.random.normal(ks[2], (64, 128, 2, 2), jnp.float32),
        "conv2_b": s * jax.random.normal(ks[3], (64,), jnp.float32),
        "fc_w":    s * jax.random.normal(ks[4], (output_dim, fc_in), jnp.float32),
        "fc_b":    s * jax.random.normal(ks[5], (output_dim,), jnp.float32),
    }


# ------------------------- pure-JAX reference check ------------------------

def ref_forward(x_nchw, params):
    def conv(x, w, b):
        y = lax.conv_general_dilated(
            x, w, window_strides=(1, 1), padding=((1, 1), (1, 1)),
            dimension_numbers=("NCHW", "OIHW", "NCHW"))
        return y + b[None, :, None, None]

    def pool(x):
        return lax.reduce_window(x, -jnp.inf, lax.max,
                                 (1, 1, 2, 2), (1, 1, 2, 2), "VALID")

    h = pool(jax.nn.relu(conv(x_nchw, params["conv1_w"], params["conv1_b"])))
    h = pool(jax.nn.relu(conv(h, params["conv2_w"], params["conv2_b"])))
    flat = h.reshape(h.shape[0], -1)
    return flat @ params["fc_w"].T + params["fc_b"]


if __name__ == "__main__":
    # input_dim must be in {1, 5, 9, 13, ...}; pick 9 (small, valid).
    batch, in_channels, input_dim, output_dim = 2, 3, 9, 10
    key = jax.random.PRNGKey(0)
    kx, kp = jax.random.split(key)
    x = jax.random.normal(kx, (batch, in_channels, input_dim, input_dim), jnp.float32)
    params = init_params(kp, in_channels, output_dim, fc_dim(input_dim))
    prep = prepare_params(params)   # one-time weight repack (host/prep time)

    fwd = jax.jit(functools.partial(simple_cnn2layer_forward, output_dim=output_dim))
    out = jax.block_until_ready(fwd(x, prep))
    ref = jax.block_until_ready(ref_forward(x, params))

    assert out.shape == (batch, output_dim), out.shape
    assert jnp.allclose(out, ref, rtol=1e-3, atol=1e-3), float(jnp.max(jnp.abs(out - ref)))
    print("KERNEL_OK")
</pallas_src>

<mosaic_0001>
module attributes {stable_mosaic.version = 11 : i64} {
  func.func @_fused_cnn_kernel(%arg0: i32, %arg1: memref<1x9x9x3xf32, #tpu.memory_space<vmem>>, %arg2: memref<4x3x128xf32, #tpu.memory_space<vmem>>, %arg3: memref<1x128xf32, #tpu.memory_space<vmem>>, %arg4: memref<4x128x64xf32, #tpu.memory_space<vmem>>, %arg5: memref<1x64xf32, #tpu.memory_space<vmem>>, %arg6: memref<3x3x64x128xf32, #tpu.memory_space<vmem>>, %arg7: memref<1x128xf32, #tpu.memory_space<vmem>>, %arg8: memref<1x1x128xf32, #tpu.memory_space<vmem>>, %arg9: memref<10x10x128xf32, #tpu.memory_space<vmem>>, %arg10: memref<5x5x128xf32, #tpu.memory_space<vmem>>, %arg11: memref<6x6x64xf32, #tpu.memory_space<vmem>>) attributes {dimension_semantics = [#tpu.dimension_semantics<parallel>], iteration_bounds = array<i64: 2>, scalar_prefetch = 0 : i64, scratch_operands = 3 : i64, tpu.core_type = #tpu.core_type<tc>, window_params = [{transform_indices = @transform_0, window_bounds = array<i64: 1, 9, 9, 3>}, {pipeline_mode = #tpu.pipeline_mode<synchronous>, transform_indices = @transform_1, window_bounds = array<i64: 4, 3, 128>}, {pipeline_mode = #tpu.pipeline_mode<synchronous>, transform_indices = @transform_2, window_bounds = array<i64: 1, 128>}, {pipeline_mode = #tpu.pipeline_mode<synchronous>, transform_indices = @transform_3, window_bounds = array<i64: 4, 128, 64>}, {pipeline_mode = #tpu.pipeline_mode<synchronous>, transform_indices = @transform_4, window_bounds = array<i64: 1, 64>}, {pipeline_mode = #tpu.pipeline_mode<synchronous>, transform_indices = @transform_5, window_bounds = array<i64: 3, 3, 64, 128>}, {pipeline_mode = #tpu.pipeline_mode<synchronous>, transform_indices = @transform_6, window_bounds = array<i64: 1, 128>}, {transform_indices = @transform_7, window_bounds = array<i64: 1, 1, 128>}]} {
    %0 = tpu.iota {dimensions = array<i32: 0>} : vector<10x9xi32>
    %1 = tpu.iota {dimensions = array<i32: 1>} : vector<10x9xi32>
    %c1_i32 = arith.constant 1 : i32
    %2 = vector.broadcast %c1_i32 : i32 to vector<10x9xi32>
    %3 = arith.subi %0, %2 : vector<10x9xi32>
    %4 = arith.cmpi eq, %1, %3 : vector<10x9xi32>
    %5 = arith.extui %4 : vector<10x9xi1> to vector<10x9xi32>
    %6 = arith.sitofp %5 : vector<10x9xi32> to vector<10x9xf32>
    %7 = arith.cmpi eq, %1, %0 : vector<10x9xi32>
    %8 = arith.extui %7 : vector<10x9xi1> to vector<10x9xi32>
    %9 = arith.sitofp %8 : vector<10x9xi32> to vector<10x9xf32>
    %cst = arith.constant 0.000000e+00 : f32
    %10 = vector.broadcast %cst : f32 to vector<9x3xf32>
    %c0 = arith.constant 0 : index
    %c0_0 = arith.constant 0 : index
    %11 = vector.load %arg3[%c0, %c0_0] : memref<1x128xf32, #tpu.memory_space<vmem>>, vector<1x128xf32>
    %c0_1 = arith.constant 0 : index
    %c0_2 = arith.constant 0 : index
    %c0_3 = arith.constant 0 : index
    %c0_4 = arith.constant 0 : index
    %12 = vector.load %arg1[%c0_1, %c0_2, %c0_3, %c0_4] : memref<1x9x9x3xf32, #tpu.memory_space<vmem>>, vector<1x1x9x3xf32>
    %13 = vector.shape_cast %12 : vector<1x1x9x3xf32> to vector<9x3xf32>
    %cst_5 = arith.constant dense<0.000000e+00> : vector<10x3xf32>
    %14 = tpu.matmul %6, %10, %cst_5 {dimension_numbers = #tpu.dot_dimension_numbers<[1], [0], [0], [1], [0, 0, 1, 1], [], []>} : vector<10x9xf32>, vector<9x3xf32>, vector<10x3xf32> -> vector<10x3xf32>
    %c0_6 = arith.constant 0 : index
    %c0_7 = arith.constant 0 : index
    %c0_8 = arith.constant 0 : index
    %15 = vector.load %arg2[%c0_6, %c0_7, %c0_8] : memref<4x3x128xf32, #tpu.memory_space<vmem>>, vector<1x3x128xf32>
    %16 = vector.shape_cast %15 : vector<1x3x128xf32> to vector<3x128xf32>
    %cst_9 = arith.constant dense<0.000000e+00> : vector<10x128xf32>
    %17 = tpu.matmul %14, %16, %cst_9 {dimension_numbers = #tpu.dot_dimension_numbers<[1], [0], [0], [1], [0, 0, 1, 1], [], []>} : vector<10x3xf32>, vector<3x128xf32>, vector<10x128xf32> -> vector<10x128xf32>
    %cst_10 = arith.constant dense<0.000000e+00> : vector<10x3xf32>
    %18 = tpu.matmul %9, %10, %cst_10 {dimension_numbers = #tpu.dot_dimension_numbers<[1], [0], [0], [1], [0, 0, 1, 1], [], []>} : vector<10x9xf32>, vector<9x3xf32>, vector<10x3xf32> -> vector<10x3xf32>
    %c1 = arith.constant 1 : index
    %c0_11 = arith.constant 0 : index
    %c0_12 = arith.constant 0 : index
    %19 = vector.load %arg2[%c1, %c0_11, %c0_12] : memref<4x3x128xf32, #tpu.memory_space<vmem>>, vector<1x3x128xf32>
    %20 = vector.shape_cast %19 : vector<1x3x128xf32> to vector<3x128xf32>
    %cst_13 = arith.constant dense<0.000000e+00> : vector<10x128xf32>
    %21 = tpu.matmul %18, %20, %cst_13 {dimension_numbers = #tpu.dot_dimension_numbers<[1], [0], [0], [1], [0, 0, 1, 1], [], []>} : vector<10x3xf32>, vector<3x128xf32>, vector<10x128xf32> -> vector<10x128xf32>
    %22 = arith.addf %17, %21 : vector<10x128xf32>
    %cst_14 = arith.constant dense<0.000000e+00> : vector<10x3xf32>
    %23 = tpu.matmul %6, %13, %cst_14 {dimension_numbers = #tpu.dot_dimension_numbers<[1], [0], [0], [1], [0, 0, 1, 1], [], []>} : vector<10x9xf32>, vector<9x3xf32>, vector<10x3xf32> -> vector<10x3xf32>
    %c2 = arith.constant 2 : index
    %c0_15 = arith.constant 0 : index
    %c0_16 = arith.constant 0 : index
    %24 = vector.load %arg2[%c2, %c0_15, %c0_16] : memref<4x3x128xf32, #tpu.memory_space<vmem>>, vector<1x3x128xf32>
    %25 = vector.shape_cast %24 : vector<1x3x128xf32> to vector<3x128xf32>
    %cst_17 = arith.constant dense<0.000000e+00> : vector<10x128xf32>
    %26 = tpu.matmul %23, %25, %cst_17 {dimension_numbers = #tpu.dot_dimension_numbers<[1], [0], [0], [1], [0, 0, 1, 1], [], []>} : vector<10x3xf32>, vector<3x128xf32>, vector<10x128xf32> -> vector<10x128xf32>
    %27 = arith.addf %22, %26 : vector<10x128xf32>
    %cst_18 = arith.constant dense<0.000000e+00> : vector<10x3xf32>
    %28 = tpu.matmul %9, %13, %cst_18 {dimension_numbers = #tpu.dot_dimension_numbers<[1], [0], [0], [1], [0, 0, 1, 1], [], []>} : vector<10x9xf32>, vector<9x3xf32>, vector<10x3xf32> -> vector<10x3xf32>
    %c3 = arith.constant 3 : index
    %c0_19 = arith.constant 0 : index
    %c0_20 = arith.constant 0 : index
    %29 = vector.load %arg2[%c3, %c0_19, %c0_20] : memref<4x3x128xf32, #tpu.memory_space<vmem>>, vector<1x3x128xf32>
    %30 = vector.shape_cast %29 : vector<1x3x128xf32> to vector<3x128xf32>
    %cst_21 = arith.constant dense<0.000000e+00> : vector<10x128xf32>
    %31 = tpu.matmul %28, %30, %cst_21 {dimension_numbers = #tpu.dot_dimension_numbers<[1], [0], [0], [1], [0, 0, 1, 1], [], []>} : vector<10x3xf32>, vector<3x128xf32>, vector<10x128xf32> -> vector<10x128xf32>
    %32 = arith.addf %27, %31 : vector<10x128xf32>
    %33 = vector.broadcast %11 : vector<1x128xf32> to vector<10x128xf32>
    %34 = arith.addf %32, %33 : vector<10x128xf32>
    %cst_22 = arith.constant 0.000000e+00 : f32
    %35 = vector.broadcast %cst_22 : f32 to vector<10x128xf32>
    %36 = arith.maximumf %34, %35 : vector<10x128xf32>
    %c0_23 = arith.constant 0 : index
    %c0_24 = arith.constant 0 : index
    %c0_25 = arith.constant 0 : index
    %37 = vector.load %arg9[%c0_23, %c0_24, %c0_25] : memref<10x10x128xf32, #tpu.memory_space<vmem>>, vector<1x10x128xf32>
    %38 = vector.shape_cast %37 : vector<1x10x128xf32> to vector<10x128xf32>
    %39 = vector.shape_cast %36 : vector<10x128xf32> to vector<1x10x128xf32>
    tpu.vector_store %arg9[%c0_23, %c0_24, %c0_25], %39 {strides = array<i32>} : memref<10x10x128xf32, #tpu.memory_space<vmem>>, vector<1x10x128xf32>,
    %c0_26 = arith.constant 0 : index
    %c0_27 = arith.constant 0 : index
    %c0_28 = arith.constant 0 : index
    %c0_29 = arith.constant 0 : index
    %40 = vector.load %arg1[%c0_26, %c0_27, %c0_28, %c0_29] : memref<1x9x9x3xf32, #tpu.memory_space<vmem>>, vector<1x1x9x3xf32>
    %41 = vector.shape_cast %40 : vector<1x1x9x3xf32> to vector<9x3xf32>
    %c0_30 = arith.constant 0 : index
    %c1_31 = arith.constant 1 : index
    %c0_32 = arith.constant 0 : index
    %c0_33 = arith.constant 0 : index
    %42 = vector.load %arg1[%c0_30, %c1_31, %c0_32, %c0_33] : memref<1x9x9x3xf32, #tpu.memory_space<vmem>>, vector<1x1x9x3xf32>
    %43 = vector.shape_cast %42 : vector<1x1x9x3xf32> to vector<9x3xf32>
    %cst_34 = arith.constant dense<0.000000e+00> : vector<10x3xf32>
    %44 = tpu.matmul %6, %41, %cst_34 {dimension_numbers = #tpu.dot_dimension_numbers<[1], [0], [0], [1], [0, 0, 1, 1], [], []>} : vector<10x9xf32>, vector<9x3xf32>, vector<10x3xf32> -> vector<10x3xf32>
    %c0_35 = arith.constant 0 : index
    %c0_36 = arith.constant 0 : index
    %c0_37 = arith.constant 0 : index
    %45 = vector.load %arg2[%c0_35, %c0_36, %c0_37] : memref<4x3x128xf32, #tpu.memory_space<vmem>>, vector<1x3x128xf32>
    %46 = vector.shape_cast %45 : vector<1x3x128xf32> to vector<3x128xf32>
    %cst_38 = arith.constant dense<0.000000e+00> : vector<10x128xf32>
    %47 = tpu.matmul %44, %46, %cst_38 {dimension_numbers = #tpu.dot_dimension_numbers<[1], [0], [0], [1], [0, 0, 1, 1], [], []>} : vector<10x3xf32>, vector<3x128xf32>, vector<10x128xf32> -> vector<10x128xf32>
    %cst_39 = arith.constant dense<0.000000e+00> : vector<10x3xf32>
    %48 = tpu.matmul %9, %41, %cst_39 {dimension_numbers = #tpu.dot_dimension_numbers<[1], [0], [0], [1], [0, 0, 1, 1], [], []>} : vector<10x9xf32>, vector<9x3xf32>, vector<10x3xf32> -> vector<10x3xf32>
    %c1_40 = arith.constant 1 : index
    %c0_41 = arith.constant 0 : index
    %c0_42 = arith.constant 0 : index
    %49 = vector.load %arg2[%c1_40, %c0_41, %c0_42] : memref<4x3x128xf32, #tpu.memory_space<vmem>>, vector<1x3x128xf32>
    %50 = vector.shape_cast %49 : vector<1x3x128xf32> to vector<3x128xf32>
    %cst_43 = arith.constant dense<0.000000e+00> : vector<10x128xf32>
    %51 = tpu.matmul %48, %50, %cst_43 {dimension_numbers = #tpu.dot_dimension_numbers<[1], [0], [0], [1], [0, 0, 1, 1], [], []>} : vector<10x3xf32>, vector<3x128xf32>, vector<10x128xf32> -> vector<10x128xf32>
    %52 = arith.addf %47, %51 : vector<10x128xf32>
    %cst_44 = arith.constant dense<0.000000e+00> : vector<10x3xf32>
    %53 = tpu.matmul %6, %43, %cst_44 {dimension_numbers = #tpu.dot_dimension_numbers<[1], [0], [0], [1], [0, 0, 1, 1], [], []>} : vector<10x9xf32>, vector<9x3xf32>, vector<10x3xf32> -> vector<10x3xf32>
    %c2_45 = arith.constant 2 : index
    %c0_46 = arith.constant 0 : index
    %c0_47 = arith.constant 0 : index
    %54 = vector.load %arg2[%c2_45, %c0_46, %c0_47] : memref<4x3x128xf32, #tpu.memory_space<vmem>>, vector<1x3x128xf32>
    %55 = vector.shape_cast %54 : vector<1x3x128xf32> to vector<3x128xf32>
    %cst_48 = arith.constant dense<0.000000e+00> : vector<10x128xf32>
    %56 = tpu.matmul %53, %55, %cst_48 {dimension_numbers = #tpu.dot_dimension_numbers<[1], [0], [0], [1], [0, 0, 1, 1], [], []>} : vector<10x3xf32>, vector<3x128xf32>, vector<10x128xf32> -> vector<10x128xf32>
    %57 = arith.addf %52, %56 : vector<10x128xf32>
    %cst_49 = arith.constant dense<0.000000e+00> : vector<10x3xf32>
    %58 = tpu.matmul %9, %43, %cst_49 {dimension_numbers = #tpu.dot_dimension_numbers<[1], [0], [0], [1], [0, 0, 1, 1], [], []>} : vector<10x9xf32>, vector<9x3xf32>, vector<10x3xf32> -> vector<10x3xf32>
    %c3_50 = arith.constant 3 : index
    %c0_51 = arith.constant 0 : index
    %c0_52 = arith.constant 0 : index
    %59 = vector.load %arg2[%c3_50, %c0_51, %c0_52] : memref<4x3x128xf32, #tpu.memory_space<vmem>>, vector<1x3x128xf32>
    %60 = vector.shape_cast %59 : vector<1x3x128xf32> to vector<3x128xf32>
    %cst_53 = arith.constant dense<0.000000e+00> : vector<10x128xf32>
    %61 = tpu.matmul %58, %60, %cst_53 {dimension_numbers = #tpu.dot_dimension_numbers<[1], [0], [0], [1], [0, 0, 1, 1], [], []>} : vector<10x3xf32>, vector<3x128xf32>, vector<10x128xf32> -> vector<10x128xf32>
    %62 = arith.addf %57, %61 : vector<10x128xf32>
    %63 = vector.broadcast %11 : vector<1x128xf32> to vector<10x128xf32>
    %64 = arith.addf %62, %63 : vector<10x128xf32>
    %cst_54 = arith.constant 0.000000e+00 : f32
    %65 = vector.broadcast %cst_54 : f32 to vector<10x128xf32>
    %66 = arith.maximumf %64, %65 : vector<10x128xf32>
    %c1_55 = arith.constant 1 : index
    %c0_56 = arith.constant 0 : index
    %c0_57 = arith.constant 0 : index
    %67 = vector.load %arg9[%c1_55, %c0_56, %c0_57] : memref<10x10x128xf32, #tpu.memory_space<vmem>>, vector<1x10x128xf32>
    %68 = vector.shape_cast %67 : vector<1x10x128xf32> to vector<10x128xf32>
    %69 = vector.shape_cast %66 : vector<10x128xf32> to vector<1x10x128xf32>
    tpu.vector_store %arg9[%c1_55, %c0_56, %c0_57], %69 {strides = array<i32>} : memref<10x10x128xf32, #tpu.memory_space<vmem>>, vector<1x10x128xf32>,
    %c0_58 = arith.constant 0 : index
    %c1_59 = arith.constant 1 : index
    %c0_60 = arith.constant 0 : index
    %c0_61 = arith.constant 0 : index
    %70 = vector.load %arg1[%c0_58, %c1_59, %c0_60, %c0_61] : memref<1x9x9x3xf32, #tpu.memory_space<vmem>>, vector<1x1x9x3xf32>
    %71 = vector.shape_cast %70 : vector<1x1x9x3xf32> to vector<9x3xf32>
    %c0_62 = arith.constant 0 : index
    %c2_63 = arith.constant 2 : index
    %c0_64 = arith.constant 0 : index
    %c0_65 = arith.constant 0 : index
    %72 = vector.load %arg1[%c0_62, %c2_63, %c0_64, %c0_65] : memref<1x9x9x3xf32, #tpu.memory_space<vmem>>, vector<1x1x9x3xf32>
    %73 = vector.shape_cast %72 : vector<1x1x9x3xf32> to vector<9x3xf32>
    %cst_66 = arith.constant dense<0.000000e+00> : vector<10x3xf32>
    %74 = tpu.matmul %6, %71, %cst_66 {dimension_numbers = #tpu.dot_dimension_numbers<[1], [0], [0], [1], [0, 0, 1, 1], [], []>} : vector<10x9xf32>, vector<9x3xf32>, vector<10x3xf32> -> vector<10x3xf32>
    %c0_67 = arith.constant 0 : index
    %c0_68 = arith.constant 0 : index
    %c0_69 = arith.constant 0 : index
    %75 = vector.load %arg2[%c0_67, %c0_68, %c0_69] : memref<4x3x128xf32, #tpu.memory_space<vmem>>, vector<1x3x128xf32>
    %76 = vector.shape_cast %75 : vector<1x3x128xf32> to vector<3x128xf32>
    %cst_70 = arith.constant dense<0.000000e+00> : vector<10x128xf32>
    %77 = tpu.matmul %74, %76, %cst_70 {dimension_numbers = #tpu.dot_dimension_numbers<[1], [0], [0], [1], [0, 0, 1, 1], [], []>} : vector<10x3xf32>, vector<3x128xf32>, vector<10x128xf32> -> vector<10x128xf32>
    %cst_71 = arith.constant dense<0.000000e+00> : vector<10x3xf32>
    %78 = tpu.matmul %9, %71, %cst_71 {dimension_numbers = #tpu.dot_dimension_numbers<[1], [0], [0], [1], [0, 0, 1, 1], [], []>} : vector<10x9xf32>, vector<9x3xf32>, vector<10x3xf32> -> vector<10x3xf32>
    %c1_72 = arith.constant 1 : index
    %c0_73 = arith.constant 0 : index
    %c0_74 = arith.constant 0 : index
    %79 = vector.load %arg2[%c1_72, %c0_73, %c0_74] : memref<4x3x128xf32, #tpu.memory_space<vmem>>, vector<1x3x128xf32>
    %80 = vector.shape_cast %79 : vector<1x3x128xf32> to vector<3x128xf32>
    %cst_75 = arith.constant dense<0.000000e+00> : vector<10x128xf32>
    %81 = tpu.matmul %78, %80, %cst_75 {dimension_numbers = #tpu.dot_dimension_numbers<[1], [0], [0], [1], [0, 0, 1, 1], [], []>} : vector<10x3xf32>, vector<3x128xf32>, vector<10x128xf32> -> vector<10x128xf32>
    %82 = arith.addf %77, %81 : vector<10x128xf32>
    %cst_76 = arith.constant dense<0.000000e+00> : vector<10x3xf32>
    %83 = tpu.matmul %6, %73, %cst_76 {dimension_numbers = #tpu.dot_dimension_numbers<[1], [0], [0], [1], [0, 0, 1, 1], [], []>} : vector<10x9xf32>, vector<9x3xf32>, vector<10x3xf32> -> vector<10x3xf32>
    %c2_77 = arith.constant 2 : index
    %c0_78 = arith.constant 0 : index
    %c0_79 = arith.constant 0 : index
    %84 = vector.load %arg2[%c2_77, %c0_78, %c0_79] : memref<4x3x128xf32, #tpu.memory_space<vmem>>, vector<1x3x128xf32>
    %85 = vector.shape_cast %84 : vector<1x3x128xf32> to vector<3x128xf32>
    %cst_80 = arith.constant dense<0.000000e+00> : vector<10x128xf32>
    %86 = tpu.matmul %83, %85, %cst_80 {dimension_numbers = #tpu.dot_dimension_numbers<[1], [0], [0], [1], [0, 0, 1, 1], [], []>} : vector<10x3xf32>, vector<3x128xf32>, vector<10x128xf32> -> vector<10x128xf32>
    %87 = arith.addf %82, %86 : vector<10x128xf32>
    %cst_81 = arith.constant dense<0.000000e+00> : vector<10x3xf32>
    %88 = tpu.matmul %9, %73, %cst_81 {dimension_numbers = #tpu.dot_dimension_numbers<[1], [0], [0], [1], [0, 0, 1, 1], [], []>} : vector<10x9xf32>, vector<9x3xf32>, vector<10x3xf32> -> vector<10x3xf32>
    %c3_82 = arith.constant 3 : index
    %c0_83 = arith.constant 0 : index
    %c0_84 = arith.constant 0 : index
    %89 = vector.load %arg2[%c3_82, %c0_83, %c0_84] : memref<4x3x128xf32, #tpu.memory_space<vmem>>, vector<1x3x128xf32>
    %90 = vector.shape_cast %89 : vector<1x3x128xf32> to vector<3x128xf32>
    %cst_85 = arith.constant dense<0.000000e+00> : vector<10x128xf32>
    %91 = tpu.matmul %88, %90, %cst_85 {dimension_numbers = #tpu.dot_dimension_numbers<[1], [0], [0], [1], [0, 0, 1, 1], [], []>} : vector<10x3xf32>, vector<3x128xf32>, vector<10x128xf32> -> vector<10x128xf32>
    %92 = arith.addf %87, %91 : vector<10x128xf32>
    %93 = vector.broadcast %11 : vector<1x128xf32> to vector<10x128xf32>
    %94 = arith.addf %92, %93 : vector<10x128xf32>
    %cst_86 = arith.constant 0.000000e+00 : f32
    %95 = vector.broadcast %cst_86 : f32 to vector<10x128xf32>
    %96 = arith.maximumf %94, %95 : vector<10x128xf32>
    %c2_87 = arith.constant 2 : index
    %c0_88 = arith.constant 0 : index
    %c0_89 = arith.constant 0 : index
    %97 = vector.load %arg9[%c2_87, %c0_88, %c0_89] : memref<10x10x128xf32, #tpu.memory_space<vmem>>, vector<1x10x128xf32>
    %98 = vector.shape_cast %97 : vector<1x10x128xf32> to vector<10x128xf32>
    %99 = vector.shape_cast %96 : vector<10x128xf32> to vector<1x10x128xf32>
    tpu.vector_store %arg9[%c2_87, %c0_88, %c0_89], %99 {strides = array<i32>} : memref<10x10x128xf32, #tpu.memory_space<vmem>>, vector<1x10x128xf32>,
    %c0_90 = arith.constant 0 : index
    %c2_91 = arith.constant 2 : index
    %c0_92 = arith.constant 0 : index
    %c0_93 = arith.constant 0 : index
    %100 = vector.load %arg1[%c0_90, %c2_91, %c0_92, %c0_93] : memref<1x9x9x3xf32, #tpu.memory_space<vmem>>, vector<1x1x9x3xf32>
    %101 = vector.shape_cast %100 : vector<1x1x9x3xf32> to vector<9x3xf32>
    %c0_94 = arith.constant 0 : index
    %c3_95 = arith.constant 3 : index
    %c0_96 = arith.constant 0 : index
    %c0_97 = arith.constant 0 : index
    %102 = vector.load %arg1[%c0_94, %c3_95, %c0_96, %c0_97] : memref<1x9x9x3xf32, #tpu.memory_space<vmem>>, vector<1x1x9x3xf32>
    %103 = vector.shape_cast %102 : vector<1x1x9x3xf32> to vector<9x3xf32>
    %cst_98 = arith.constant dense<0.000000e+00> : vector<10x3xf32>
    %104 = tpu.matmul %6, %101, %cst_98 {dimension_numbers = #tpu.dot_dimension_numbers<[1], [0], [0], [1], [0, 0, 1, 1], [], []>} : vector<10x9xf32>, vector<9x3xf32>, vector<10x3xf32> -> vector<10x3xf32>
    %c0_99 = arith.constant 0 : index
    %c0_100 = arith.constant 0 : index
    %c0_101 = arith.constant 0 : index
    %105 = vector.load %arg2[%c0_99, %c0_100, %c0_101] : memref<4x3x128xf32, #tpu.memory_space<vmem>>, vector<1x3x128xf32>
    %106 = vector.shape_cast %105 : vector<1x3x128xf32> to vector<3x128xf32>
    %cst_102 = arith.constant dense<0.000000e+00> : vector<10x128xf32>
    %107 = tpu.matmul %104, %106, %cst_102 {dimension_numbers = #tpu.dot_dimension_numbers<[1], [0], [0], [1], [0, 0, 1, 1], [], []>} : vector<10x3xf32>, vector<3x128xf32>, vector<10x128xf32> -> vector<10x128xf32>
    %cst_103 = arith.constant dense<0.000000e+00> : vector<10x3xf32>
    %108 = tpu.matmul %9, %101, %cst_103 {dimension_numbers = #tpu.dot_dimension_numbers<[1], [0], [0], [1], [0, 0, 1, 1], [], []>} : vector<10x9xf32>, vector<9x3xf32>, vector<10x3xf32> -> vector<10x3xf32>
    %c1_104 = arith.constant 1 : index
    %c0_105 = arith.constant 0 : index
    %c0_106 = arith.constant 0 : index
    %109 = vector.load %arg2[%c1_104, %c0_105, %c0_106] : memref<4x3x128xf32, #tpu.memory_space<vmem>>, vector<1x3x128xf32>
    %110 = vector.shape_cast %109 : vector<1x3x128xf32> to vector<3x128xf32>
    %cst_107 = arith.constant dense<0.000000e+00> : vector<10x128xf32>
    %111 = tpu.matmul %108, %110, %cst_107 {dimension_numbers = #tpu.dot_dimension_numbers<[1], [0], [0], [1], [0, 0, 1, 1], [], []>} : vector<10x3xf32>, vector<3x128xf32>, vector<10x128xf32> -> vector<10x128xf32>
    %112 = arith.addf %107, %111 : vector<10x128xf32>
    %cst_108 = arith.constant dense<0.000000e+00> : vector<10x3xf32>
    %113 = tpu.matmul %6, %103, %cst_108 {dimension_numbers = #tpu.dot_dimension_numbers<[1], [0], [0], [1], [0, 0, 1, 1], [], []>} : vector<10x9xf32>, vector<9x3xf32>, vector<10x3xf32> -> vector<10x3xf32>
    %c2_109 = arith.constant 2 : index
    %c0_110 = arith.constant 0 : index
    %c0_111 = arith.constant 0 : index
    %114 = vector.load %arg2[%c2_109, %c0_110, %c0_111] : memref<4x3x128xf32, #tpu.memory_space<vmem>>, vector<1x3x128xf32>
    %115 = vector.shape_cast %114 : vector<1x3x128xf32> to vector<3x128xf32>
    %cst_112 = arith.constant dense<0.000000e+00> : vector<10x128xf32>
    %116 = tpu.matmul %113, %115, %cst_112 {dimension_numbers = #tpu.dot_dimension_numbers<[1], [0], [0], [1], [0, 0, 1, 1], [], []>} : vector<10x3xf32>, vector<3x128xf32>, vector<10x128xf32> -> vector<10x128xf32>
    %117 = arith.addf %112, %116 : vector<10x128xf32>
    %cst_113 = arith.constant dense<0.000000e+00> : vector<10x3xf32>
    %118 = tpu.matmul %9, %103, %cst_113 {dimension_numbers = #tpu.dot_dimension_numbers<[1], [0], [0], [1], [0, 0, 1, 1], [], []>} : vector<10x9xf32>, vector<9x3xf32>, vector<10x3xf32> -> vector<10x3xf32>
    %c3_114 = arith.constant 3 : index
    %c0_115 = arith.constant 0 : index
    %c0_116 = arith.constant 0 : index
    %119 = vector.load %arg2[%c3_114, %c0_115, %c0_116] : memref<4x3x128xf32, #tpu.memory_space<vmem>>, vector<1x3x128xf32>
    %120 = vector.shape_cast %119 : vector<1x3x128xf32> to vector<3x128xf32>
    %cst_117 = arith.constant dense<0.000000e+00> : vector<10x128xf32>
    %121 = tpu.matmul %118, %120, %cst_117 {dimension_numbers = #tpu.dot_dimension_numbers<[1], [0], [0], [1], [0, 0, 1, 1], [], []>} : vector<10x3xf32>, vector<3x128xf32>, vector<10x128xf32> -> vector<10x128xf32>
    %122 = arith.addf %117, %121 : vector<10x128xf32>
    %123 = vector.broadcast %11 : vector<1x128xf32> to vector<10x128xf32>
    %124 = arith.addf %122, %123 : vector<10x128xf32>
    %cst_118 = arith.constant 0.000000e+00 : f32
    %125 = vector.broadcast %cst_118 : f32 to vector<10x128xf32>
    %126 = arith.maximumf %124, %125 : vector<10x128xf32>
    %c3_119 = arith.constant 3 : index
    %c0_120 = arith.constant 0 : index
    %c0_121 = arith.constant 0 : index
    %127 = vector.load %arg9[%c3_119, %c0_120, %c0_121] : memref<10x10x128xf32, #tpu.memory_space<vmem>>, vector<1x10x128xf32>
    %128 = vector.shape_cast %127 : vector<1x10x128xf32> to vector<10x128xf32>
    %129 = vector.shape_cast %126 : vector<10x128xf32> to vector<1x10x128xf32>
    tpu.vector_store %arg9[%c3_119, %c0_120, %c0_121], %129 {strides = array<i32>} : memref<10x10x128xf32, #tpu.memory_space<vmem>>, vector<1x10x128xf32>,
    %c0_122 = arith.constant 0 : index
    %c3_123 = arith.constant 3 : index
    %c0_124 = arith.constant 0 : index
    %c0_125 = arith.constant 0 : index
    %130 = vector.load %arg1[%c0_122, %c3_123, %c0_124, %c0_125] : memref<1x9x9x3xf32, #tpu.memory_space<vmem>>, vector<1x1x9x3xf32>
    %131 = vector.shape_cast %130 : vector<1x1x9x3xf32> to vector<9x3xf32>
    %c0_126 = arith.constant 0 : index
    %c4 = arith.constant 4 : index
    %c0_127 = arith.constant 0 : index
    %c0_128 = arith.constant 0 : index
    %132 = vector.load %arg1[%c0_126, %c4, %c0_127, %c0_128] : memref<1x9x9x3xf32, #tpu.memory_space<vmem>>, vector<1x1x9x3xf32>
    %133 = vector.shape_cast %132 : vector<1x1x9x3xf32> to vector<9x3xf32>
    %cst_129 = arith.constant dense<0.000000e+00> : vector<10x3xf32>
    %134 = tpu.matmul %6, %131, %cst_129 {dimension_numbers = #tpu.dot_dimension_numbers<[1], [0], [0], [1], [0, 0, 1, 1], [], []>} : vector<10x9xf32>, vector<9x3xf32>, vector<10x3xf32> -> vector<10x3xf32>
    %c0_130 = arith.constant 0 : index
    %c0_131 = arith.constant 0 : index
    %c0_132 = arith.constant 0 : index
    %135 = vector.load %arg2[%c0_130, %c0_131, %c0_132] : memref<4x3x128xf32, #tpu.memory_space<vmem>>, vector<1x3x128xf32>
    %136 = vector.shape_cast %135 : vector<1x3x128xf32> to vector<3x128xf32>
    %cst_133 = arith.constant dense<0.000000e+00> : vector<10x128xf32>
    %137 = tpu.matmul %134, %136, %cst_133 {dimension_numbers = #tpu.dot_dimension_numbers<[1], [0], [0], [1], [0, 0, 1, 1], [], []>} : vector<10x3xf32>, vector<3x128xf32>, vector<10x128xf32> -> vector<10x128xf32>
    %cst_134 = arith.constant dense<0.000000e+00> : vector<10x3xf32>
    %138 = tpu.matmul %9, %131, %cst_134 {dimension_numbers = #tpu.dot_dimension_numbers<[1], [0], [0], [1], [0, 0, 1, 1], [], []>} : vector<10x9xf32>, vector<9x3xf32>, vector<10x3xf32> -> vector<10x3xf32>
    %c1_135 = arith.constant 1 : index
    %c0_136 = arith.constant 0 : index
    %c0_137 = arith.constant 0 : index
    %139 = vector.load %arg2[%c1_135, %c0_136, %c0_137] : memref<4x3x128xf32, #tpu.memory_space<vmem>>, vector<1x3x128xf32>
    %140 = vector.shape_cast %139 : vector<1x3x128xf32> to vector<3x128xf32>
    %cst_138 = arith.constant dense<0.000000e+00> : vector<10x128xf32>
    %141 = tpu.matmul %138, %140, %cst_138 {dimension_numbers = #tpu.dot_dimension_numbers<[1], [0], [0], [1], [0, 0, 1, 1], [], []>} : vector<10x3xf32>, vector<3x128xf32>, vector<10x128xf32> -> vector<10x128xf32>
    %142 = arith.addf %137, %141 : vector<10x128xf32>
    %cst_139 = arith.constant dense<0.000000e+00> : vector<10x3xf32>
    %143 = tpu.matmul %6, %133, %cst_139 {dimension_numbers = #tpu.dot_dimension_numbers<[1], [0], [0], [1], [0, 0, 1, 1], [], []>} : vector<10x9xf32>, vector<9x3xf32>, vector<10x3xf32> -> vector<10x3xf32>
    %c2_140 = arith.constant 2 : index
    %c0_141 = arith.constant 0 : index
    %c0_142 = arith.constant 0 : index
    %144 = vector.load %arg2[%c2_140, %c0_141, %c0_142] : memref<4x3x128xf32, #tpu.memory_space<vmem>>, vector<1x3x128xf32>
    %145 = vector.shape_cast %144 : vector<1x3x128xf32> to vector<3x128xf32>
    %cst_143 = arith.constant dense<0.000000e+00> : vector<10x128xf32>
    %146 = tpu.matmul %143, %145, %cst_143 {dimension_numbers = #tpu.dot_dimension_numbers<[1], [0], [0], [1], [0, 0, 1, 1], [], []>} : vector<10x3xf32>, vector<3x128xf32>, vector<10x128xf32> -> vector<10x128xf32>
    %147 = arith.addf %142, %146 : vector<10x128xf32>
    %cst_144 = arith.constant dense<0.000000e+00> : vector<10x3xf32>
    %148 = tpu.matmul %9, %133, %cst_144 {dimension_numbers = #tpu.dot_dimension_numbers<[1], [0], [0], [1], [0, 0, 1, 1], [], []>} : vector<10x9xf32>, vector<9x3xf32>, vector<10x3xf32> -> vector<10x3xf32>
    %c3_145 = arith.constant 3 : index
    %c0_146 = arith.constant 0 : index
    %c0_147 = arith.constant 0 : index
    %149 = vector.load %arg2[%c3_145, %c0_146, %c0_147] : memref<4x3x128xf32, #tpu.memory_space<vmem>>, vector<1x3x128xf32>
    %150 = vector.shape_cast %149 : vector<1x3x128xf32> to vector<3x128xf32>
    %cst_148 = arith.constant dense<0.000000e+00> : vector<10x128xf32>
    %151 = tpu.matmul %148, %150, %cst_148 {dimension_numbers = #tpu.dot_dimension_numbers<[1], [0], [0], [1], [0, 0, 1, 1], [], []>} : vector<10x3xf32>, vector<3x128xf32>, vector<10x128xf32> -> vector<10x128xf32>
    %152 = arith.addf %147, %151 : vector<10x128xf32>
    %153 = vector.broadcast %11 : vector<1x128xf32> to vector<10x128xf32>
    %154 = arith.addf %152, %153 : vector<10x128xf32>
    %cst_149 = arith.constant 0.000000e+00 : f32
    %155 = vector.broadcast %cst_149 : f32 to vector<10x128xf32>
    %156 = arith.maximumf %154, %155 : vector<10x128xf32>
    %c4_150 = arith.constant 4 : index
    %c0_151 = arith.constant 0 : index
    %c0_152 = arith.constant 0 : index
    %157 = vector.load %arg9[%c4_150, %c0_151, %c0_152] : memref<10x10x128xf32, #tpu.memory_space<vmem>>, vector<1x10x128xf32>
    %158 = vector.shape_cast %157 : vector<1x10x128xf32> to vector<10x128xf32>
    %159 = vector.shape_cast %156 : vector<10x128xf32> to vector<1x10x128xf32>
    tpu.vector_store %arg9[%c4_150, %c0_151, %c0_152], %159 {strides = array<i32>} : memref<10x10x128xf32, #tpu.memory_space<vmem>>, vector<1x10x128xf32>,
    %c0_153 = arith.constant 0 : index
    %c4_154 = arith.constant 4 : index
    %c0_155 = arith.constant 0 : index
    %c0_156 = arith.constant 0 : index
    %160 = vector.load %arg1[%c0_153, %c4_154, %c0_155, %c0_156] : memref<1x9x9x3xf32, #tpu.memory_space<vmem>>, vector<1x1x9x3xf32>
    %161 = vector.shape_cast %160 : vector<1x1x9x3xf32> to vector<9x3xf32>
    %c0_157 = arith.constant 0 : index
    %c5 = arith.constant 5 : index
    %c0_158 = arith.constant 0 : index
    %c0_159 = arith.constant 0 : index
    %162 = vector.load %arg1[%c0_157, %c5, %c0_158, %c0_159] : memref<1x9x9x3xf32, #tpu.memory_space<vmem>>, vector<1x1x9x3xf32>
    %163 = vector.shape_cast %162 : vector<1x1x9x3xf32> to vector<9x3xf32>
    %cst_160 = arith.constant dense<0.000000e+00> : vector<10x3xf32>
    %164 = tpu.matmul %6, %161, %cst_160 {dimension_numbers = #tpu.dot_dimension_numbers<[1], [0], [0], [1], [0, 0, 1, 1], [], []>} : vector<10x9xf32>, vector<9x3xf32>, vector<10x3xf32> -> vector<10x3xf32>
    %c0_161 = arith.constant 0 : index
    %c0_162 = arith.constant 0 : index
    %c0_163 = arith.constant 0 : index
    %165 = vector.load %arg2[%c0_161, %c0_162, %c0_163] : memref<4x3x128xf32, #tpu.memory_space<vmem>>, vector<1x3x128xf32>
    %166 = vector.shape_cast %165 : vector<1x3x128xf32> to vector<3x128xf32>
    %cst_164 = arith.constant dense<0.000000e+00> : vector<10x128xf32>
    %167 = tpu.matmul %164, %166, %cst_164 {dimension_numbers = #tpu.dot_dimension_numbers<[1], [0], [0], [1], [0, 0, 1, 1], [], []>} : vector<10x3xf32>, vector<3x128xf32>, vector<10x128xf32> -> vector<10x128xf32>
    %cst_165 = arith.constant dense<0.000000e+00> : vector<10x3xf32>
    %168 = tpu.matmul %9, %161, %cst_165 {dimension_numbers = #tpu.dot_dimension_numbers<[1], [0], [0], [1], [0, 0, 1, 1], [], []>} : vector<10x9xf32>, vector<9x3xf32>, vector<10x3xf32> -> vector<10x3xf32>
    %c1_166 = arith.constant 1 : index
    %c0_167 = arith.constant 0 : index
    %c0_168 = arith.constant 0 : index
    %169 = vector.load %arg2[%c1_166, %c0_167, %c0_168] : memref<4x3x128xf32, #tpu.memory_space<vmem>>, vector<1x3x128xf32>
    %170 = vector.shape_cast %169 : vector<1x3x128xf32> to vector<3x128xf32>
    %cst_169 = arith.constant dense<0.000000e+00> : vector<10x128xf32>
    %171 = tpu.matmul %168, %170, %cst_169 {dimension_numbers = #tpu.dot_dimension_numbers<[1], [0], [0], [1], [0, 0, 1, 1], [], []>} : vector<10x3xf32>, vector<3x128xf32>, vector<10x128xf32> -> vector<10x128xf32>
    %172 = arith.addf %167, %171 : vector<10x128xf32>
    %cst_170 = arith.constant dense<0.000000e+00> : vector<10x3xf32>
    %173 = tpu.matmul %6, %163, %cst_170 {dimension_numbers = #tpu.dot_dimension_numbers<[1], [0], [0], [1], [0, 0, 1, 1], [], []>} : vector<10x9xf32>, vector<9x3xf32>, vector<10x3xf32> -> vector<10x3xf32>
    %c2_171 = arith.constant 2 : index
    %c0_172 = arith.constant 0 : index
    %c0_173 = arith.constant 0 : index
    %174 = vector.load %arg2[%c2_171, %c0_172, %c0_173] : memref<4x3x128xf32, #tpu.memory_space<vmem>>, vector<1x3x128xf32>
    %175 = vector.shape_cast %174 : vector<1x3x128xf32> to vector<3x128xf32>
    %cst_174 = arith.constant dense<0.000000e+00> : vector<10x128xf32>
    %176 = tpu.matmul %173, %175, %cst_174 {dimension_numbers = #tpu.dot_dimension_numbers<[1], [0], [0], [1], [0, 0, 1, 1], [], []>} : vector<10x3xf32>, vector<3x128xf32>, vector<10x128xf32> -> vector<10x128xf32>
    %177 = arith.addf %172, %176 : vector<10x128xf32>
    %cst_175 = arith.constant dense<0.000000e+00> : vector<10x3xf32>
    %178 = tpu.matmul %9, %163, %cst_175 {dimension_numbers = #tpu.dot_dimension_numbers<[1], [0], [0], [1], [0, 0, 1, 1], [], []>} : vector<10x9xf32>, vector<9x3xf32>, vector<10x3xf32> -> vector<10x3xf32>
    %c3_176 = arith.constant 3 : index
    %c0_177 = arith.constant 0 : index
    %c0_178 = arith.constant 0 : index
    %179 = vector.load %arg2[%c3_176, %c0_177, %c0_178] : memref<4x3x128xf32, #tpu.memory_space<vmem>>, vector<1x3x128xf32>
    %180 = vector.shape_cast %179 : vector<1x3x128xf32> to vector<3x128xf32>
    %cst_179 = arith.constant dense<0.000000e+00> : vector<10x128xf32>
    %181 = tpu.matmul %178, %180, %cst_179 {dimension_numbers = #tpu.dot_dimension_numbers<[1], [0], [0], [1], [0, 0, 1, 1], [], []>} : vector<10x3xf32>, vector<3x128xf32>, vector<10x128xf32> -> vector<10x128xf32>
    %182 = arith.addf %177, %181 : vector<10x128xf32>
    %183 = vector.broadcast %11 : vector<1x128xf32> to vector<10x128xf32>
    %184 = arith.addf %182, %183 : vector<10x128xf32>
    %cst_180 = arith.constant 0.000000e+00 : f32
    %185 = vector.broadcast %cst_180 : f32 to vector<10x128xf32>
    %186 = arith.maximumf %184, %185 : vector<10x128xf32>
    %c5_181 = arith.constant 5 : index
    %c0_182 = arith.constant 0 : index
    %c0_183 = arith.constant 0 : index
    %187 = vector.load %arg9[%c5_181, %c0_182, %c0_183] : memref<10x10x128xf32, #tpu.memory_space<vmem>>, vector<1x10x128xf32>
    %188 = vector.shape_cast %187 : vector<1x10x128xf32> to vector<10x128xf32>
    %189 = vector.shape_cast %186 : vector<10x128xf32> to vector<1x10x128xf32>
    tpu.vector_store %arg9[%c5_181, %c0_182, %c0_183], %189 {strides = array<i32>} : memref<10x10x128xf32, #tpu.memory_space<vmem>>, vector<1x10x128xf32>,
    %c0_184 = arith.constant 0 : index
    %c5_185 = arith.constant 5 : index
    %c0_186 = arith.constant 0 : index
    %c0_187 = arith.constant 0 : index
    %190 = vector.load %arg1[%c0_184, %c5_185, %c0_186, %c0_187] : memref<1x9x9x3xf32, #tpu.memory_space<vmem>>, vector<1x1x9x3xf32>
    %191 = vector.shape_cast %190 : vector<1x1x9x3xf32> to vector<9x3xf32>
    %c0_188 = arith.constant 0 : index
    %c6 = arith.constant 6 : index
    %c0_189 = arith.constant 0 : index
    %c0_190 = arith.constant 0 : index
    %192 = vector.load %arg1[%c0_188, %c6, %c0_189, %c0_190] : memref<1x9x9x3xf32, #tpu.memory_space<vmem>>, vector<1x1x9x3xf32>
    %193 = vector.shape_cast %192 : vector<1x1x9x3xf32> to vector<9x3xf32>
    %cst_191 = arith.constant dense<0.000000e+00> : vector<10x3xf32>
    %194 = tpu.matmul %6, %191, %cst_191 {dimension_numbers = #tpu.dot_dimension_numbers<[1], [0], [0], [1], [0, 0, 1, 1], [], []>} : vector<10x9xf32>, vector<9x3xf32>, vector<10x3xf32> -> vector<10x3xf32>
    %c0_192 = arith.constant 0 : index
    %c0_193 = arith.constant 0 : index
    %c0_194 = arith.constant 0 : index
    %195 = vector.load %arg2[%c0_192, %c0_193, %c0_194] : memref<4x3x128xf32, #tpu.memory_space<vmem>>, vector<1x3x128xf32>
    %196 = vector.shape_cast %195 : vector<1x3x128xf32> to vector<3x128xf32>
    %cst_195 = arith.constant dense<0.000000e+00> : vector<10x128xf32>
    %197 = tpu.matmul %194, %196, %cst_195 {dimension_numbers = #tpu.dot_dimension_numbers<[1], [0], [0], [1], [0, 0, 1, 1], [], []>} : vector<10x3xf32>, vector<3x128xf32>, vector<10x128xf32> -> vector<10x128xf32>
    %cst_196 = arith.constant dense<0.000000e+00> : vector<10x3xf32>
    %198 = tpu.matmul %9, %191, %cst_196 {dimension_numbers = #tpu.dot_dimension_numbers<[1], [0], [0], [1], [0, 0, 1, 1], [], []>} : vector<10x9xf32>, vector<9x3xf32>, vector<10x3xf32> -> vector<10x3xf32>
    %c1_197 = arith.constant 1 : index
    %c0_198 = arith.constant 0 : index
    %c0_199 = arith.constant 0 : index
    %199 = vector.load %arg2[%c1_197, %c0_198, %c0_199] : memref<4x3x128xf32, #tpu.memory_space<vmem>>, vector<1x3x128xf32>
    %200 = vector.shape_cast %199 : vector<1x3x128xf32> to vector<3x128xf32>
    %cst_200 = arith.constant dense<0.000000e+00> : vector<10x128xf32>
    %201 = tpu.matmul %198, %200, %cst_200 {dimension_numbers = #tpu.dot_dimension_numbers<[1], [0], [0], [1], [0, 0, 1, 1], [], []>} : vector<10x3xf32>, vector<3x128xf32>, vector<10x128xf32> -> vector<10x128xf32>
    %202 = arith.addf %197, %201 : vector<10x128xf32>
    %cst_201 = arith.constant dense<0.000000e+00> : vector<10x3xf32>
    %203 = tpu.matmul %6, %193, %cst_201 {dimension_numbers = #tpu.dot_dimension_numbers<[1], [0], [0], [1], [0, 0, 1, 1], [], []>} : vector<10x9xf32>, vector<9x3xf32>, vector<10x3xf32> -> vector<10x3xf32>
    %c2_202 = arith.constant 2 : index
    %c0_203 = arith.constant 0 : index
    %c0_204 = arith.constant 0 : index
    %204 = vector.load %arg2[%c2_202, %c0_203, %c0_204] : memref<4x3x128xf32, #tpu.memory_space<vmem>>, vector<1x3x128xf32>
    %205 = vector.shape_cast %204 : vector<1x3x128xf32> to vector<3x128xf32>
    %cst_205 = arith.constant dense<0.000000e+00> : vector<10x128xf32>
    %206 = tpu.matmul %203, %205, %cst_205 {dimension_numbers = #tpu.dot_dimension_numbers<[1], [0], [0], [1], [0, 0, 1, 1], [], []>} : vector<10x3xf32>, vector<3x128xf32>, vector<10x128xf32> -> vector<10x128xf32>
    %207 = arith.addf %202, %206 : vector<10x128xf32>
    %cst_206 = arith.constant dense<0.000000e+00> : vector<10x3xf32>
    %208 = tpu.matmul %9, %193, %cst_206 {dimension_numbers = #tpu.dot_dimension_numbers<[1], [0], [0], [1], [0, 0, 1, 1], [], []>} : vector<10x9xf32>, vector<9x3xf32>, vector<10x3xf32> -> vector<10x3xf32>
    %c3_207 = arith.constant 3 : index
    %c0_208 = arith.constant 0 : index
    %c0_209 = arith.constant 0 : index
    %209 = vector.load %arg2[%c3_207, %c0_208, %c0_209] : memref<4x3x128xf32, #tpu.memory_space<vmem>>, vector<1x3x128xf32>
    %210 = vector.shape_cast %209 : vector<1x3x128xf32> to vector<3x128xf32>
    %cst_210 = arith.constant dense<0.000000e+00> : vector<10x128xf32>
    %211 = tpu.matmul %208, %210, %cst_210 {dimension_numbers = #tpu.dot_dimension_numbers<[1], [0], [0], [1], [0, 0, 1, 1], [], []>} : vector<10x3xf32>, vector<3x128xf32>, vector<10x128xf32> -> vector<10x128xf32>
    %212 = arith.addf %207, %211 : vector<10x128xf32>
    %213 = vector.broadcast %11 : vector<1x128xf32> to vector<10x128xf32>
    %214 = arith.addf %212, %213 : vector<10x128xf32>
    %cst_211 = arith.constant 0.000000e+00 : f32
    %215 = vector.broadcast %cst_211 : f32 to vector<10x128xf32>
    %216 = arith.maximumf %214, %215 : vector<10x128xf32>
    %c6_212 = arith.constant 6 : index
    %c0_213 = arith.constant 0 : index
    %c0_214 = arith.constant 0 : index
    %217 = vector.load %arg9[%c6_212, %c0_213, %c0_214] : memref<10x10x128xf32, #tpu.memory_space<vmem>>, vector<1x10x128xf32>
    %218 = vector.shape_cast %217 : vector<1x10x128xf32> to vector<10x128xf32>
    %219 = vector.shape_cast %216 : vector<10x128xf32> to vector<1x10x128xf32>
    tpu.vector_store %arg9[%c6_212, %c0_213, %c0_214], %219 {strides = array<i32>} : memref<10x10x128xf32, #tpu.memory_space<vmem>>, vector<1x10x128xf32>,
    %c0_215 = arith.constant 0 : index
    %c6_216 = arith.constant 6 : index
    %c0_217 = arith.constant 0 : index
    %c0_218 = arith.constant 0 : index
    %220 = vector.load %arg1[%c0_215, %c6_216, %c0_217, %c0_218] : memref<1x9x9x3xf32, #tpu.memory_space<vmem>>, vector<1x1x9x3xf32>
    %221 = vector.shape_cast %220 : vector<1x1x9x3xf32> to vector<9x3xf32>
    %c0_219 = arith.constant 0 : index
    %c7 = arith.constant 7 : index
    %c0_220 = arith.constant 0 : index
    %c0_221 = arith.constant 0 : index
    %222 = vector.load %arg1[%c0_219, %c7, %c0_220, %c0_221] : memref<1x9x9x3xf32, #tpu.memory_space<vmem>>, vector<1x1x9x3xf32>
    %223 = vector.shape_cast %222 : vector<1x1x9x3xf32> to vector<9x3xf32>
    %cst_222 = arith.constant dense<0.000000e+00> : vector<10x3xf32>
    %224 = tpu.matmul %6, %221, %cst_222 {dimension_numbers = #tpu.dot_dimension_numbers<[1], [0], [0], [1], [0, 0, 1, 1], [], []>} : vector<10x9xf32>, vector<9x3xf32>, vector<10x3xf32> -> vector<10x3xf32>
    %c0_223 = arith.constant 0 : index
    %c0_224 = arith.constant 0 : index
    %c0_225 = arith.constant 0 : index
    %225 = vector.load %arg2[%c0_223, %c0_224, %c0_225] : memref<4x3x128xf32, #tpu.memory_space<vmem>>, vector<1x3x128xf32>
    %226 = vector.shape_cast %225 : vector<1x3x128xf32> to vector<3x128xf32>
    %cst_226 = arith.constant dense<0.000000e+00> : vector<10x128xf32>
    %227 = tpu.matmul %224, %226, %cst_226 {dimension_numbers = #tpu.dot_dimension_numbers<[1], [0], [0], [1], [0, 0, 1, 1], [], []>} : vector<10x3xf32>, vector<3x128xf32>, vector<10x128xf32> -> vector<10x128xf32>
    %cst_227 = arith.constant dense<0.000000e+00> : vector<10x3xf32>
    %228 = tpu.matmul %9, %221, %cst_227 {dimension_numbers = #tpu.dot_dimension_numbers<[1], [0], [0], [1], [0, 0, 1, 1], [], []>} : vector<10x9xf32>, vector<9x3xf32>, vector<10x3xf32> -> vector<10x3xf32>
    %c1_228 = arith.constant 1 : index
    %c0_229 = arith.constant 0 : index
    %c0_230 = arith.constant 0 : index
    %229 = vector.load %arg2[%c1_228, %c0_229, %c0_230] : memref<4x3x128xf32, #tpu.memory_space<vmem>>, vector<1x3x128xf32>
    %230 = vector.shape_cast %229 : vector<1x3x128xf32> to vector<3x128xf32>
    %cst_231 = arith.constant dense<0.000000e+00> : vector<10x128xf32>
    %231 = tpu.matmul %228, %230, %cst_231 {dimension_numbers = #tpu.dot_dimension_numbers<[1], [0], [0], [1], [0, 0, 1, 1], [], []>} : vector<10x3xf32>, vector<3x128xf32>, vector<10x128xf32> -> vector<10x128xf32>
    %232 = arith.addf %227, %231 : vector<10x128xf32>
    %cst_232 = arith.constant dense<0.000000e+00> : vector<10x3xf32>
    %233 = tpu.matmul %6, %223, %cst_232 {dimension_numbers = #tpu.dot_dimension_numbers<[1], [0], [0], [1], [0, 0, 1, 1], [], []>} : vector<10x9xf32>, vector<9x3xf32>, vector<10x3xf32> -> vector<10x3xf32>
    %c2_233 = arith.constant 2 : index
    %c0_234 = arith.constant 0 : index
    %c0_235 = arith.constant 0 : index
    %234 = vector.load %arg2[%c2_233, %c0_234, %c0_235] : memref<4x3x128xf32, #tpu.memory_space<vmem>>, vector<1x3x128xf32>
    %235 = vector.shape_cast %234 : vector<1x3x128xf32> to vector<3x128xf32>
    %cst_236 = arith.constant dense<0.000000e+00> : vector<10x128xf32>
    %236 = tpu.matmul %233, %235, %cst_236 {dimension_numbers = #tpu.dot_dimension_numbers<[1], [0], [0], [1], [0, 0, 1, 1], [], []>} : vector<10x3xf32>, vector<3x128xf32>, vector<10x128xf32> -> vector<10x128xf32>
    %237 = arith.addf %232, %236 : vector<10x128xf32>
    %cst_237 = arith.constant dense<0.000000e+00> : vector<10x3xf32>
    %238 = tpu.matmul %9, %223, %cst_237 {dimension_numbers = #tpu.dot_dimension_numbers<[1], [0], [0], [1], [0, 0, 1, 1], [], []>} : vector<10x9xf32>, vector<9x3xf32>, vector<10x3xf32> -> vector<10x3xf32>
    %c3_238 = arith.constant 3 : index
    %c0_239 = arith.constant 0 : index
    %c0_240 = arith.constant 0 : index
    %239 = vector.load %arg2[%c3_238, %c0_239, %c0_240] : memref<4x3x128xf32, #tpu.memory_space<vmem>>, vector<1x3x128xf32>
    %240 = vector.shape_cast %239 : vector<1x3x128xf32> to vector<3x128xf32>
    %cst_241 = arith.constant dense<0.000000e+00> : vector<10x128xf32>
    %241 = tpu.matmul %238, %240, %cst_241 {dimension_numbers = #tpu.dot_dimension_numbers<[1], [0], [0], [1], [0, 0, 1, 1], [], []>} : vector<10x3xf32>, vector<3x128xf32>, vector<10x128xf32> -> vector<10x128xf32>
    %242 = arith.addf %237, %241 : vector<10x128xf32>
    %243 = vector.broadcast %11 : vector<1x128xf32> to vector<10x128xf32>
    %244 = arith.addf %242, %243 : vector<10x128xf32>
    %cst_242 = arith.constant 0.000000e+00 : f32
    %245 = vector.broadcast %cst_242 : f32 to vector<10x128xf32>
    %246 = arith.maximumf %244, %245 : vector<10x128xf32>
    %c7_243 = arith.constant 7 : index
    %c0_244 = arith.constant 0 : index
    %c0_245 = arith.constant 0 : index
    %247 = vector.load %arg9[%c7_243, %c0_244, %c0_245] : memref<10x10x128xf32, #tpu.memory_space<vmem>>, vector<1x10x128xf32>
    %248 = vector.shape_cast %247 : vector<1x10x128xf32> to vector<10x128xf32>
    %249 = vector.shape_cast %246 : vector<10x128xf32> to vector<1x10x128xf32>
    tpu.vector_store %arg9[%c7_243, %c0_244, %c0_245], %249 {strides = array<i32>} : memref<10x10x128xf32, #tpu.memory_space<vmem>>, vector<1x10x128xf32>,
    %c0_246 = arith.constant 0 : index
    %c7_247 = arith.constant 7 : index
    %c0_248 = arith.constant 0 : index
    %c0_249 = arith.constant 0 : index
    %250 = vector.load %arg1[%c0_246, %c7_247, %c0_248, %c0_249] : memref<1x9x9x3xf32, #tpu.memory_space<vmem>>, vector<1x1x9x3xf32>
    %251 = vector.shape_cast %250 : vector<1x1x9x3xf32> to vector<9x3xf32>
    %c0_250 = arith.constant 0 : index
    %c8 = arith.constant 8 : index
    %c0_251 = arith.constant 0 : index
    %c0_252 = arith.constant 0 : index
    %252 = vector.load %arg1[%c0_250, %c8, %c0_251, %c0_252] : memref<1x9x9x3xf32, #tpu.memory_space<vmem>>, vector<1x1x9x3xf32>
    %253 = vector.shape_cast %252 : vector<1x1x9x3xf32> to vector<9x3xf32>
    %cst_253 = arith.constant dense<0.000000e+00> : vector<10x3xf32>
    %254 = tpu.matmul %6, %251, %cst_253 {dimension_numbers = #tpu.dot_dimension_numbers<[1], [0], [0], [1], [0, 0, 1, 1], [], []>} : vector<10x9xf32>, vector<9x3xf32>, vector<10x3xf32> -> vector<10x3xf32>
    %c0_254 = arith.constant 0 : index
    %c0_255 = arith.constant 0 : index
    %c0_256 = arith.constant 0 : index
    %255 = vector.load %arg2[%c0_254, %c0_255, %c0_256] : memref<4x3x128xf32, #tpu.memory_space<vmem>>, vector<1x3x128xf32>
    %256 = vector.shape_cast %255 : vector<1x3x128xf32> to vector<3x128xf32>
    %cst_257 = arith.constant dense<0.000000e+00> : vector<10x128xf32>
    %257 = tpu.matmul %254, %256, %cst_257 {dimension_numbers = #tpu.dot_dimension_numbers<[1], [0], [0], [1], [0, 0, 1, 1], [], []>} : vector<10x3xf32>, vector<3x128xf32>, vector<10x128xf32> -> vector<10x128xf32>
    %cst_258 = arith.constant dense<0.000000e+00> : vector<10x3xf32>
    %258 = tpu.matmul %9, %251, %cst_258 {dimension_numbers = #tpu.dot_dimension_numbers<[1], [0], [0], [1], [0, 0, 1, 1], [], []>} : vector<10x9xf32>, vector<9x3xf32>, vector<10x3xf32> -> vector<10x3xf32>
    %c1_259 = arith.constant 1 : index
    %c0_260 = arith.constant 0 : index
    %c0_261 = arith.constant 0 : index
    %259 = vector.load %arg2[%c1_259, %c0_260, %c0_261] : memref<4x3x128xf32, #tpu.memory_space<vmem>>, vector<1x3x128xf32>
    %260 = vector.shape_cast %259 : vector<1x3x128xf32> to vector<3x128xf32>
    %cst_262 = arith.constant dense<0.000000e+00> : vector<10x128xf32>
    %261 = tpu.matmul %258, %260, %cst_262 {dimension_numbers = #tpu.dot_dimension_numbers<[1], [0], [0], [1], [0, 0, 1, 1], [], []>} : vector<10x3xf32>, vector<3x128xf32>, vector<10x128xf32> -> vector<10x128xf32>
    %262 = arith.addf %257, %261 : vector<10x128xf32>
    %cst_263 = arith.constant dense<0.000000e+00> : vector<10x3xf32>
    %263 = tpu.matmul %6, %253, %cst_263 {dimension_numbers = #tpu.dot_dimension_numbers<[1], [0], [0], [1], [0, 0, 1, 1], [], []>} : vector<10x9xf32>, vector<9x3xf32>, vector<10x3xf32> -> vector<10x3xf32>
    %c2_264 = arith.constant 2 : index
    %c0_265 = arith.constant 0 : index
    %c0_266 = arith.constant 0 : index
    %264 = vector.load %arg2[%c2_264, %c0_265, %c0_266] : memref<4x3x128xf32, #tpu.memory_space<vmem>>, vector<1x3x128xf32>
    %265 = vector.shape_cast %264 : vector<1x3x128xf32> to vector<3x128xf32>
    %cst_267 = arith.constant dense<0.000000e+00> : vector<10x128xf32>
    %266 = tpu.matmul %263, %265, %cst_267 {dimension_numbers = #tpu.dot_dimension_numbers<[1], [0], [0], [1], [0, 0, 1, 1], [], []>} : vector<10x3xf32>, vector<3x128xf32>, vector<10x128xf32> -> vector<10x128xf32>
    %267 = arith.addf %262, %266 : vector<10x128xf32>
    %cst_268 = arith.constant dense<0.000000e+00> : vector<10x3xf32>
    %268 = tpu.matmul %9, %253, %cst_268 {dimension_numbers = #tpu.dot_dimension_numbers<[1], [0], [0], [1], [0, 0, 1, 1], [], []>} : vector<10x9xf32>, vector<9x3xf32>, vector<10x3xf32> -> vector<10x3xf32>
    %c3_269 = arith.constant 3 : index
    %c0_270 = arith.constant 0 : index
    %c0_271 = arith.constant 0 : index
    %269 = vector.load %arg2[%c3_269, %c0_270, %c0_271] : memref<4x3x128xf32, #tpu.memory_space<vmem>>, vector<1x3x128xf32>
    %270 = vector.shape_cast %269 : vector<1x3x128xf32> to vector<3x128xf32>
    %cst_272 = arith.constant dense<0.000000e+00> : vector<10x128xf32>
    %271 = tpu.matmul %268, %270, %cst_272 {dimension_numbers = #tpu.dot_dimension_numbers<[1], [0], [0], [1], [0, 0, 1, 1], [], []>} : vector<10x3xf32>, vector<3x128xf32>, vector<10x128xf32> -> vector<10x128xf32>
    %272 = arith.addf %267, %271 : vector<10x128xf32>
    %273 = vector.broadcast %11 : vector<1x128xf32> to vector<10x128xf32>
    %274 = arith.addf %272, %273 : vector<10x128xf32>
    %cst_273 = arith.constant 0.000000e+00 : f32
    %275 = vector.broadcast %cst_273 : f32 to vector<10x128xf32>
    %276 = arith.maximumf %274, %275 : vector<10x128xf32>
    %c8_274 = arith.constant 8 : index
    %c0_275 = arith.constant 0 : index
    %c0_276 = arith.constant 0 : index
    %277 = vector.load %arg9[%c8_274, %c0_275, %c0_276] : memref<10x10x128xf32, #tpu.memory_space<vmem>>, vector<1x10x128xf32>
    %278 = vector.shape_cast %277 : vector<1x10x128xf32> to vector<10x128xf32>
    %279 = vector.shape_cast %276 : vector<10x128xf32> to vector<1x10x128xf32>
    tpu.vector_store %arg9[%c8_274, %c0_275, %c0_276], %279 {strides = array<i32>} : memref<10x10x128xf32, #tpu.memory_space<vmem>>, vector<1x10x128xf32>,
    %c0_277 = arith.constant 0 : index
    %c8_278 = arith.constant 8 : index
    %c0_279 = arith.constant 0 : index
    %c0_280 = arith.constant 0 : index
    %280 = vector.load %arg1[%c0_277, %c8_278, %c0_279, %c0_280] : memref<1x9x9x3xf32, #tpu.memory_space<vmem>>, vector<1x1x9x3xf32>
    %281 = vector.shape_cast %280 : vector<1x1x9x3xf32> to vector<9x3xf32>
    %cst_281 = arith.constant dense<0.000000e+00> : vector<10x3xf32>
    %282 = tpu.matmul %6, %281, %cst_281 {dimension_numbers = #tpu.dot_dimension_numbers<[1], [0], [0], [1], [0, 0, 1, 1], [], []>} : vector<10x9xf32>, vector<9x3xf32>, vector<10x3xf32> -> vector<10x3xf32>
    %c0_282 = arith.constant 0 : index
    %c0_283 = arith.constant 0 : index
    %c0_284 = arith.constant 0 : index
    %283 = vector.load %arg2[%c0_282, %c0_283, %c0_284] : memref<4x3x128xf32, #tpu.memory_space<vmem>>, vector<1x3x128xf32>
    %284 = vector.shape_cast %283 : vector<1x3x128xf32> to vector<3x128xf32>
    %cst_285 = arith.constant dense<0.000000e+00> : vector<10x128xf32>
    %285 = tpu.matmul %282, %284, %cst_285 {dimension_numbers = #tpu.dot_dimension_numbers<[1], [0], [0], [1], [0, 0, 1, 1], [], []>} : vector<10x3xf32>, vector<3x128xf32>, vector<10x128xf32> -> vector<10x128xf32>
    %cst_286 = arith.constant dense<0.000000e+00> : vector<10x3xf32>
    %286 = tpu.matmul %9, %281, %cst_286 {dimension_numbers = #tpu.dot_dimension_numbers<[1], [0], [0], [1], [0, 0, 1, 1], [], []>} : vector<10x9xf32>, vector<9x3xf32>, vector<10x3xf32> -> vector<10x3xf32>
    %c1_287 = arith.constant 1 : index
    %c0_288 = arith.constant 0 : index
    %c0_289 = arith.constant 0 : index
    %287 = vector.load %arg2[%c1_287, %c0_288, %c0_289] : memref<4x3x128xf32, #tpu.memory_space<vmem>>, vector<1x3x128xf32>
    %288 = vector.shape_cast %287 : vector<1x3x128xf32> to vector<3x128xf32>
    %cst_290 = arith.constant dense<0.000000e+00> : vector<10x128xf32>
    %289 = tpu.matmul %286, %288, %cst_290 {dimension_numbers = #tpu.dot_dimension_numbers<[1], [0], [0], [1], [0, 0, 1, 1], [], []>} : vector<10x3xf32>, vector<3x128xf32>, vector<10x128xf32> -> vector<10x128xf32>
    %290 = arith.addf %285, %289 : vector<10x128xf32>
    %cst_291 = arith.constant dense<0.000000e+00> : vector<10x3xf32>
    %291 = tpu.matmul %6, %10, %cst_291 {dimension_numbers = #tpu.dot_dimension_numbers<[1], [0], [0], [1], [0, 0, 1, 1], [], []>} : vector<10x9xf32>, vector<9x3xf32>, vector<10x3xf32> -> vector<10x3xf32>
    %c2_292 = arith.constant 2 : index
    %c0_293 = arith.constant 0 : index
    %c0_294 = arith.constant 0 : index
    %292 = vector.load %arg2[%c2_292, %c0_293, %c0_294] : memref<4x3x128xf32, #tpu.memory_space<vmem>>, vector<1x3x128xf32>
    %293 = vector.shape_cast %292 : vector<1x3x128xf32> to vector<3x128xf32>
    %cst_295 = arith.constant dense<0.000000e+00> : vector<10x128xf32>
    %294 = tpu.matmul %291, %293, %cst_295 {dimension_numbers = #tpu.dot_dimension_numbers<[1], [0], [0], [1], [0, 0, 1, 1], [], []>} : vector<10x3xf32>, vector<3x128xf32>, vector<10x128xf32> -> vector<10x128xf32>
    %295 = arith.addf %290, %294 : vector<10x128xf32>
    %cst_296 = arith.constant dense<0.000000e+00> : vector<10x3xf32>
    %296 = tpu.matmul %9, %10, %cst_296 {dimension_numbers = #tpu.dot_dimension_numbers<[1], [0], [0], [1], [0, 0, 1, 1], [], []>} : vector<10x9xf32>, vector<9x3xf32>, vector<10x3xf32> -> vector<10x3xf32>
    %c3_297 = arith.constant 3 : index
    %c0_298 = arith.constant 0 : index
    %c0_299 = arith.constant 0 : index
    %297 = vector.load %arg2[%c3_297, %c0_298, %c0_299] : memref<4x3x128xf32, #tpu.memory_space<vmem>>, vector<1x3x128xf32>
    %298 = vector.shape_cast %297 : vector<1x3x128xf32> to vector<3x128xf32>
    %cst_300 = arith.constant dense<0.000000e+00> : vector<10x128xf32>
    %299 = tpu.matmul %296, %298, %cst_300 {dimension_numbers = #tpu.dot_dimension_numbers<[1], [0], [0], [1], [0, 0, 1, 1], [], []>} : vector<10x3xf32>, vector<3x128xf32>, vector<10x128xf32> -> vector<10x128xf32>
    %300 = arith.addf %295, %299 : vector<10x128xf32>
    %301 = vector.broadcast %11 : vector<1x128xf32> to vector<10x128xf32>
    %302 = arith.addf %300, %301 : vector<10x128xf32>
    %cst_301 = arith.constant 0.000000e+00 : f32
    %303 = vector.broadcast %cst_301 : f32 to vector<10x128xf32>
    %304 = arith.maximumf %302, %303 : vector<10x128xf32>
    %c9 = arith.constant 9 : index
    %c0_302 = arith.constant 0 : index
    %c0_303 = arith.constant 0 : index
    %305 = vector.load %arg9[%c9, %c0_302, %c0_303] : memref<10x10x128xf32, #tpu.memory_space<vmem>>, vector<1x10x128xf32>
    %306 = vector.shape_cast %305 : vector<1x10x128xf32> to vector<10x128xf32>
    %307 = vector.shape_cast %304 : vector<10x128xf32> to vector<1x10x128xf32>
    tpu.vector_store %arg9[%c9, %c0_302, %c0_303], %307 {strides = array<i32>} : memref<10x10x128xf32, #tpu.memory_space<vmem>>, vector<1x10x128xf32>,
    %308 = tpu.iota {dimensions = array<i32: 0>} : vector<5x10xi32>
    %309 = tpu.iota {dimensions = array<i32: 1>} : vector<5x10xi32>
    %c2_i32 = arith.constant 2 : i32
    %310 = vector.broadcast %c2_i32 : i32 to vector<5x10xi32>
    %311 = arith.muli %310, %308 : vector<5x10xi32>
    %312 = arith.cmpi eq, %309, %311 : vector<5x10xi32>
    %313 = arith.extui %312 : vector<5x10xi1> to vector<5x10xi32>
    %314 = arith.sitofp %313 : vector<5x10xi32> to vector<5x10xf32>
    %c2_i32_304 = arith.constant 2 : i32
    %315 = vector.broadcast %c2_i32_304 : i32 to vector<5x10xi32>
    %316 = arith.muli %315, %308 : vector<5x10xi32>
    %c1_i32_305 = arith.constant 1 : i32
    %317 = vector.broadcast %c1_i32_305 : i32 to vector<5x10xi32>
    %318 = arith.addi %316, %317 : vector<5x10xi32>
    %319 = arith.cmpi eq, %309, %318 : vector<5x10xi32>
    %320 = arith.extui %319 : vector<5x10xi1> to vector<5x10xi32>
    %321 = arith.sitofp %320 : vector<5x10xi32> to vector<5x10xf32>
    %c0_306 = arith.constant 0 : index
    %c0_307 = arith.constant 0 : index
    %c0_308 = arith.constant 0 : index
    %322 = vector.load %arg9[%c0_306, %c0_307, %c0_308] : memref<10x10x128xf32, #tpu.memory_space<vmem>>, vector<1x10x128xf32>
    %323 = vector.shape_cast %322 : vector<1x10x128xf32> to vector<10x128xf32>
    %c1_309 = arith.constant 1 : index
    %c0_310 = arith.constant 0 : index
    %c0_311 = arith.constant 0 : index
    %324 = vector.load %arg9[%c1_309, %c0_310, %c0_311] : memref<10x10x128xf32, #tpu.memory_space<vmem>>, vector<1x10x128xf32>
    %325 = vector.shape_cast %324 : vector<1x10x128xf32> to vector<10x128xf32>
    %326 = arith.maximumf %323, %325 : vector<10x128xf32>
    %cst_312 = arith.constant dense<0.000000e+00> : vector<5x128xf32>
    %327 = tpu.matmul %314, %326, %cst_312 {dimension_numbers = #tpu.dot_dimension_numbers<[1], [0], [0], [1], [0, 0, 1, 1], [], []>} : vector<5x10xf32>, vector<10x128xf32>, vector<5x128xf32> -> vector<5x128xf32>
    %cst_313 = arith.constant dense<0.000000e+00> : vector<5x128xf32>
    %328 = tpu.matmul %321, %326, %cst_313 {dimension_numbers = #tpu.dot_dimension_numbers<[1], [0], [0], [1], [0, 0, 1, 1], [], []>} : vector<5x10xf32>, vector<10x128xf32>, vector<5x128xf32> -> vector<5x128xf32>
    %329 = arith.maximumf %327, %328 : vector<5x128xf32>
    %c0_314 = arith.constant 0 : index
    %c0_315 = arith.constant 0 : index
    %c0_316 = arith.constant 0 : index
    %330 = vector.load %arg10[%c0_314, %c0_315, %c0_316] : memref<5x5x128xf32, #tpu.memory_space<vmem>>, vector<1x5x128xf32>
    %331 = vector.shape_cast %330 : vector<1x5x128xf32> to vector<5x128xf32>
    %332 = vector.shape_cast %329 : vector<5x128xf32> to vector<1x5x128xf32>
    tpu.vector_store %arg10[%c0_314, %c0_315, %c0_316], %332 {strides = array<i32>} : memref<5x5x128xf32, #tpu.memory_space<vmem>>, vector<1x5x128xf32>,
    %c2_317 = arith.constant 2 : index
    %c0_318 = arith.constant 0 : index
    %c0_319 = arith.constant 0 : index
    %333 = vector.load %arg9[%c2_317, %c0_318, %c0_319] : memref<10x10x128xf32, #tpu.memory_space<vmem>>, vector<1x10x128xf32>
    %334 = vector.shape_cast %333 : vector<1x10x128xf32> to vector<10x128xf32>
    %c3_320 = arith.constant 3 : index
    %c0_321 = arith.constant 0 : index
    %c0_322 = arith.constant 0 : index
    %335 = vector.load %arg9[%c3_320, %c0_321, %c0_322] : memref<10x10x128xf32, #tpu.memory_space<vmem>>, vector<1x10x128xf32>
    %336 = vector.shape_cast %335 : vector<1x10x128xf32> to vector<10x128xf32>
    %337 = arith.maximumf %334, %336 : vector<10x128xf32>
    %cst_323 = arith.constant dense<0.000000e+00> : vector<5x128xf32>
    %338 = tpu.matmul %314, %337, %cst_323 {dimension_numbers = #tpu.dot_dimension_numbers<[1], [0], [0], [1], [0, 0, 1, 1], [], []>} : vector<5x10xf32>, vector<10x128xf32>, vector<5x128xf32> -> vector<5x128xf32>
    %cst_324 = arith.constant dense<0.000000e+00> : vector<5x128xf32>
    %339 = tpu.matmul %321, %337, %cst_324 {dimension_numbers = #tpu.dot_dimension_numbers<[1], [0], [0], [1], [0, 0, 1, 1], [], []>} : vector<5x10xf32>, vector<10x128xf32>, vector<5x128xf32> -> vector<5x128xf32>
    %340 = arith.maximumf %338, %339 : vector<5x128xf32>
    %c1_325 = arith.constant 1 : index
    %c0_326 = arith.constant 0 : index
    %c0_327 = arith.constant 0 : index
    %341 = vector.load %arg10[%c1_325, %c0_326, %c0_327] : memref<5x5x128xf32, #tpu.memory_space<vmem>>, vector<1x5x128xf32>
    %342 = vector.shape_cast %341 : vector<1x5x128xf32> to vector<5x128xf32>
    %343 = vector.shape_cast %340 : vector<5x128xf32> to vector<1x5x128xf32>
    tpu.vector_store %arg10[%c1_325, %c0_326, %c0_327], %343 {strides = array<i32>} : memref<5x5x128xf32, #tpu.memory_space<vmem>>, vector<1x5x128xf32>,
    %c4_328 = arith.constant 4 : index
    %c0_329 = arith.constant 0 : index
    %c0_330 = arith.constant 0 : index
    %344 = vector.load %arg9[%c4_328, %c0_329, %c0_330] : memref<10x10x128xf32, #tpu.memory_space<vmem>>, vector<1x10x128xf32>
    %345 = vector.shape_cast %344 : vector<1x10x128xf32> to vector<10x128xf32>
    %c5_331 = arith.constant 5 : index
    %c0_332 = arith.constant 0 : index
    %c0_333 = arith.constant 0 : index
    %346 = vector.load %arg9[%c5_331, %c0_332, %c0_333] : memref<10x10x128xf32, #tpu.memory_space<vmem>>, vector<1x10x128xf32>
    %347 = vector.shape_cast %346 : vector<1x10x128xf32> to vector<10x128xf32>
    %348 = arith.maximumf %345, %347 : vector<10x128xf32>
    %cst_334 = arith.constant dense<0.000000e+00> : vector<5x128xf32>
    %349 = tpu.matmul %314, %348, %cst_334 {dimension_numbers = #tpu.dot_dimension_numbers<[1], [0], [0], [1], [0, 0, 1, 1], [], []>} : vector<5x10xf32>, vector<10x128xf32>, vector<5x128xf32> -> vector<5x128xf32>
    %cst_335 = arith.constant dense<0.000000e+00> : vector<5x128xf32>
    %350 = tpu.matmul %321, %348, %cst_335 {dimension_numbers = #tpu.dot_dimension_numbers<[1], [0], [0], [1], [0, 0, 1, 1], [], []>} : vector<5x10xf32>, vector<10x128xf32>, vector<5x128xf32> -> vector<5x128xf32>
    %351 = arith.maximumf %349, %350 : vector<5x128xf32>
    %c2_336 = arith.constant 2 : index
    %c0_337 = arith.constant 0 : index
    %c0_338 = arith.constant 0 : index
    %352 = vector.load %arg10[%c2_336, %c0_337, %c0_338] : memref<5x5x128xf32, #tpu.memory_space<vmem>>, vector<1x5x128xf32>
    %353 = vector.shape_cast %352 : vector<1x5x128xf32> to vector<5x128xf32>
    %354 = vector.shape_cast %351 : vector<5x128xf32> to vector<1x5x128xf32>
    tpu.vector_store %arg10[%c2_336, %c0_337, %c0_338], %354 {strides = array<i32>} : memref<5x5x128xf32, #tpu.memory_space<vmem>>, vector<1x5x128xf32>,
    %c6_339 = arith.constant 6 : index
    %c0_340 = arith.constant 0 : index
    %c0_341 = arith.constant 0 : index
    %355 = vector.load %arg9[%c6_339, %c0_340, %c0_341] : memref<10x10x128xf32, #tpu.memory_space<vmem>>, vector<1x10x128xf32>
    %356 = vector.shape_cast %355 : vector<1x10x128xf32> to vector<10x128xf32>
    %c7_342 = arith.constant 7 : index
    %c0_343 = arith.constant 0 : index
    %c0_344 = arith.constant 0 : index
    %357 = vector.load %arg9[%c7_342, %c0_343, %c0_344] : memref<10x10x128xf32, #tpu.memory_space<vmem>>, vector<1x10x128xf32>
    %358 = vector.shape_cast %357 : vector<1x10x128xf32> to vector<10x128xf32>
    %359 = arith.maximumf %356, %358 : vector<10x128xf32>
    %cst_345 = arith.constant dense<0.000000e+00> : vector<5x128xf32>
    %360 = tpu.matmul %314, %359, %cst_345 {dimension_numbers = #tpu.dot_dimension_numbers<[1], [0], [0], [1], [0, 0, 1, 1], [], []>} : vector<5x10xf32>, vector<10x128xf32>, vector<5x128xf32> -> vector<5x128xf32>
    %cst_346 = arith.constant dense<0.000000e+00> : vector<5x128xf32>
    %361 = tpu.matmul %321, %359, %cst_346 {dimension_numbers = #tpu.dot_dimension_numbers<[1], [0], [0], [1], [0, 0, 1, 1], [], []>} : vector<5x10xf32>, vector<10x128xf32>, vector<5x128xf32> -> vector<5x128xf32>
    %362 = arith.maximumf %360, %361 : vector<5x128xf32>
    %c3_347 = arith.constant 3 : index
    %c0_348 = arith.constant 0 : index
    %c0_349 = arith.constant 0 : index
    %363 = vector.load %arg10[%c3_347, %c0_348, %c0_349] : memref<5x5x128xf32, #tpu.memory_space<vmem>>, vector<1x5x128xf32>
    %364 = vector.shape_cast %363 : vector<1x5x128xf32> to vector<5x128xf32>
    %365 = vector.shape_cast %362 : vector<5x128xf32> to vector<1x5x128xf32>
    tpu.vector_store %arg10[%c3_347, %c0_348, %c0_349], %365 {strides = array<i32>} : memref<5x5x128xf32, #tpu.memory_space<vmem>>, vector<1x5x128xf32>,
    %c8_350 = arith.constant 8 : index
    %c0_351 = arith.constant 0 : index
    %c0_352 = arith.constant 0 : index
    %366 = vector.load %arg9[%c8_350, %c0_351, %c0_352] : memref<10x10x128xf32, #tpu.memory_space<vmem>>, vector<1x10x128xf32>
    %367 = vector.shape_cast %366 : vector<1x10x128xf32> to vector<10x128xf32>
    %c9_353 = arith.constant 9 : index
    %c0_354 = arith.constant 0 : index
    %c0_355 = arith.constant 0 : index
    %368 = vector.load %arg9[%c9_353, %c0_354, %c0_355] : memref<10x10x128xf32, #tpu.memory_space<vmem>>, vector<1x10x128xf32>
    %369 = vector.shape_cast %368 : vector<1x10x128xf32> to vector<10x128xf32>
    %370 = arith.maximumf %367, %369 : vector<10x128xf32>
    %cst_356 = arith.constant dense<0.000000e+00> : vector<5x128xf32>
    %371 = tpu.matmul %314, %370, %cst_356 {dimension_numbers = #tpu.dot_dimension_numbers<[1], [0], [0], [1], [0, 0, 1, 1], [], []>} : vector<5x10xf32>, vector<10x128xf32>, vector<5x128xf32> -> vector<5x128xf32>
    %cst_357 = arith.constant dense<0.000000e+00> : vector<5x128xf32>
    %372 = tpu.matmul %321, %370, %cst_357 {dimension_numbers = #tpu.dot_dimension_numbers<[1], [0], [0], [1], [0, 0, 1, 1], [], []>} : vector<5x10xf32>, vector<10x128xf32>, vector<5x128xf32> -> vector<5x128xf32>
    %373 = arith.maximumf %371, %372 : vector<5x128xf32>
    %c4_358 = arith.constant 4 : index
    %c0_359 = arith.constant 0 : index
    %c0_360 = arith.constant 0 : index
    %374 = vector.load %arg10[%c4_358, %c0_359, %c0_360] : memref<5x5x128xf32, #tpu.memory_space<vmem>>, vector<1x5x128xf32>
    %375 = vector.shape_cast %374 : vector<1x5x128xf32> to vector<5x128xf32>
    %376 = vector.shape_cast %373 : vector<5x128xf32> to vector<1x5x128xf32>
    tpu.vector_store %arg10[%c4_358, %c0_359, %c0_360], %376 {strides = array<i32>} : memref<5x5x128xf32, #tpu.memory_space<vmem>>, vector<1x5x128xf32>,
    %377 = tpu.iota {dimensions = array<i32: 0>} : vector<6x5xi32>
    %378 = tpu.iota {dimensions = array<i32: 1>} : vector<6x5xi32>
    %c1_i32_361 = arith.constant 1 : i32
    %379 = vector.broadcast %c1_i32_361 : i32 to vector<6x5xi32>
    %380 = arith.subi %377, %379 : vector<6x5xi32>
    %381 = arith.cmpi eq, %378, %380 : vector<6x5xi32>
    %382 = arith.extui %381 : vector<6x5xi1> to vector<6x5xi32>
    %383 = arith.sitofp %382 : vector<6x5xi32> to vector<6x5xf32>
    %384 = arith.cmpi eq, %378, %377 : vector<6x5xi32>
    %385 = arith.extui %384 : vector<6x5xi1> to vector<6x5xi32>
    %386 = arith.sitofp %385 : vector<6x5xi32> to vector<6x5xf32>
    %cst_362 = arith.constant 0.000000e+00 : f32
    %387 = vector.broadcast %cst_362 : f32 to vector<5x128xf32>
    %c0_363 = arith.constant 0 : index
    %c0_364 = arith.constant 0 : index
    %388 = vector.load %arg5[%c0_363, %c0_364] : memref<1x64xf32, #tpu.memory_space<vmem>>, vector<1x64xf32>
    %c0_365 = arith.constant 0 : index
    %c0_366 = arith.constant 0 : index
    %c0_367 = arith.constant 0 : index
    %389 = vector.load %arg10[%c0_365, %c0_366, %c0_367] : memref<5x5x128xf32, #tpu.memory_space<vmem>>, vector<1x5x128xf32>
    %390 = vector.shape_cast %389 : vector<1x5x128xf32> to vector<5x128xf32>
    %cst_368 = arith.constant dense<0.000000e+00> : vector<6x128xf32>
    %391 = tpu.matmul %383, %387, %cst_368 {dimension_numbers = #tpu.dot_dimension_numbers<[1], [0], [0], [1], [0, 0, 1, 1], [], []>} : vector<6x5xf32>, vector<5x128xf32>, vector<6x128xf32> -> vector<6x128xf32>
    %c0_369 = arith.constant 0 : index
    %c0_370 = arith.constant 0 : index
    %c0_371 = arith.constant 0 : index
    %392 = vector.load %arg4[%c0_369, %c0_370, %c0_371] : memref<4x128x64xf32, #tpu.memory_space<vmem>>, vector<1x128x64xf32>
    %393 = vector.shape_cast %392 : vector<1x128x64xf32> to vector<128x64xf32>
    %cst_372 = arith.constant dense<0.000000e+00> : vector<6x64xf32>
    %394 = tpu.matmul %391, %393, %cst_372 {dimension_numbers = #tpu.dot_dimension_numbers<[1], [0], [0], [1], [0, 0, 1, 1], [], []>} : vector<6x128xf32>, vector<128x64xf32>, vector<6x64xf32> -> vector<6x64xf32>
    %cst_373 = arith.constant dense<0.000000e+00> : vector<6x128xf32>
    %395 = tpu.matmul %386, %387, %cst_373 {dimension_numbers = #tpu.dot_dimension_numbers<[1], [0], [0], [1], [0, 0, 1, 1], [], []>} : vector<6x5xf32>, vector<5x128xf32>, vector<6x128xf32> -> vector<6x128xf32>
    %c1_374 = arith.constant 1 : index
    %c0_375 = arith.constant 0 : index
    %c0_376 = arith.constant 0 : index
    %396 = vector.load %arg4[%c1_374, %c0_375, %c0_376] : memref<4x128x64xf32, #tpu.memory_space<vmem>>, vector<1x128x64xf32>
    %397 = vector.shape_cast %396 : vector<1x128x64xf32> to vector<128x64xf32>
    %cst_377 = arith.constant dense<0.000000e+00> : vector<6x64xf32>
    %398 = tpu.matmul %395, %397, %cst_377 {dimension_numbers = #tpu.dot_dimension_numbers<[1], [0], [0], [1], [0, 0, 1, 1], [], []>} : vector<6x128xf32>, vector<128x64xf32>, vector<6x64xf32> -> vector<6x64xf32>
    %399 = arith.addf %394, %398 : vector<6x64xf32>
    %cst_378 = arith.constant dense<0.000000e+00> : vector<6x128xf32>
    %400 = tpu.matmul %383, %390, %cst_378 {dimension_numbers = #tpu.dot_dimension_numbers<[1], [0], [0], [1], [0, 0, 1, 1], [], []>} : vector<6x5xf32>, vector<5x128xf32>, vector<6x128xf32> -> vector<6x128xf32>
    %c2_379 = arith.constant 2 : index
    %c0_380 = arith.constant 0 : index
    %c0_381 = arith.constant 0 : index
    %401 = vector.load %arg4[%c2_379, %c0_380, %c0_381] : memref<4x128x64xf32, #tpu.memory_space<vmem>>, vector<1x128x64xf32>
    %402 = vector.shape_cast %401 : vector<1x128x64xf32> to vector<128x64xf32>
    %cst_382 = arith.constant dense<0.000000e+00> : vector<6x64xf32>
    %403 = tpu.matmul %400, %402, %cst_382 {dimension_numbers = #tpu.dot_dimension_numbers<[1], [0], [0], [1], [0, 0, 1, 1], [], []>} : vector<6x128xf32>, vector<128x64xf32>, vector<6x64xf32> -> vector<6x64xf32>
    %404 = arith.addf %399, %403 : vector<6x64xf32>
    %cst_383 = arith.constant dense<0.000000e+00> : vector<6x128xf32>
    %405 = tpu.matmul %386, %390, %cst_383 {dimension_numbers = #tpu.dot_dimension_numbers<[1], [0], [0], [1], [0, 0, 1, 1], [], []>} : vector<6x5xf32>, vector<5x128xf32>, vector<6x128xf32> -> vector<6x128xf32>
    %c3_384 = arith.constant 3 : index
    %c0_385 = arith.constant 0 : index
    %c0_386 = arith.constant 0 : index
    %406 = vector.load %arg4[%c3_384, %c0_385, %c0_386] : memref<4x128x64xf32, #tpu.memory_space<vmem>>, vector<1x128x64xf32>
    %407 = vector.shape_cast %406 : vector<1x128x64xf32> to vector<128x64xf32>
    %cst_387 = arith.constant dense<0.000000e+00> : vector<6x64xf32>
    %408 = tpu.matmul %405, %407, %cst_387 {dimension_numbers = #tpu.dot_dimension_numbers<[1], [0], [0], [1], [0, 0, 1, 1], [], []>} : vector<6x128xf32>, vector<128x64xf32>, vector<6x64xf32> -> vector<6x64xf32>
    %409 = arith.addf %404, %408 : vector<6x64xf32>
    %410 = vector.broadcast %388 : vector<1x64xf32> to vector<6x64xf32>
    %411 = arith.addf %409, %410 : vector<6x64xf32>
    %cst_388 = arith.constant 0.000000e+00 : f32
    %412 = vector.broadcast %cst_388 : f32 to vector<6x64xf32>
    %413 = arith.maximumf %411, %412 : vector<6x64xf32>
    %c0_389 = arith.constant 0 : index
    %c0_390 = arith.constant 0 : index
    %c0_391 = arith.constant 0 : index
    %414 = vector.load %arg11[%c0_389, %c0_390, %c0_391] : memref<6x6x64xf32, #tpu.memory_space<vmem>>, vector<1x6x64xf32>
    %415 = vector.shape_cast %414 : vector<1x6x64xf32> to vector<6x64xf32>
    %416 = vector.shape_cast %413 : vector<6x64xf32> to vector<1x6x64xf32>
    tpu.vector_store %arg11[%c0_389, %c0_390, %c0_391], %416 {strides = array<i32>} : memref<6x6x64xf32, #tpu.memory_space<vmem>>, vector<1x6x64xf32>,
    %c0_392 = arith.constant 0 : index
    %c0_393 = arith.constant 0 : index
    %c0_394 = arith.constant 0 : index
    %417 = vector.load %arg10[%c0_392, %c0_393, %c0_394] : memref<5x5x128xf32, #tpu.memory_space<vmem>>, vector<1x5x128xf32>
    %418 = vector.shape_cast %417 : vector<1x5x128xf32> to vector<5x128xf32>
    %c1_395 = arith.constant 1 : index
    %c0_396 = arith.constant 0 : index
    %c0_397 = arith.constant 0 : index
    %419 = vector.load %arg10[%c1_395, %c0_396, %c0_397] : memref<5x5x128xf32, #tpu.memory_space<vmem>>, vector<1x5x128xf32>
    %420 = vector.shape_cast %419 : vector<1x5x128xf32> to vector<5x128xf32>
    %cst_398 = arith.constant dense<0.000000e+00> : vector<6x128xf32>
    %421 = tpu.matmul %383, %418, %cst_398 {dimension_numbers = #tpu.dot_dimension_numbers<[1], [0], [0], [1], [0, 0, 1, 1], [], []>} : vector<6x5xf32>, vector<5x128xf32>, vector<6x128xf32> -> vector<6x128xf32>
    %c0_399 = arith.constant 0 : index
    %c0_400 = arith.constant 0 : index
    %c0_401 = arith.constant 0 : index
    %422 = vector.load %arg4[%c0_399, %c0_400, %c0_401] : memref<4x128x64xf32, #tpu.memory_space<vmem>>, vector<1x128x64xf32>
    %423 = vector.shape_cast %422 : vector<1x128x64xf32> to vector<128x64xf32>
    %cst_402 = arith.constant dense<0.000000e+00> : vector<6x64xf32>
    %424 = tpu.matmul %421, %423, %cst_402 {dimension_numbers = #tpu.dot_dimension_numbers<[1], [0], [0], [1], [0, 0, 1, 1], [], []>} : vector<6x128xf32>, vector<128x64xf32>, vector<6x64xf32> -> vector<6x64xf32>
    %cst_403 = arith.constant dense<0.000000e+00> : vector<6x128xf32>
    %425 = tpu.matmul %386, %418, %cst_403 {dimension_numbers = #tpu.dot_dimension_numbers<[1], [0], [0], [1], [0, 0, 1, 1], [], []>} : vector<6x5xf32>, vector<5x128xf32>, vector<6x128xf32> -> vector<6x128xf32>
    %c1_404 = arith.constant 1 : index
    %c0_405 = arith.constant 0 : index
    %c0_406 = arith.constant 0 : index
    %426 = vector.load %arg4[%c1_404, %c0_405, %c0_406] : memref<4x128x64xf32, #tpu.memory_space<vmem>>, vector<1x128x64xf32>
    %427 = vector.shape_cast %426 : vector<1x128x64xf32> to vector<128x64xf32>
    %cst_407 = arith.constant dense<0.000000e+00> : vector<6x64xf32>
    %428 = tpu.matmul %425, %427, %cst_407 {dimension_numbers = #tpu.dot_dimension_numbers<[1], [0], [0], [1], [0, 0, 1, 1], [], []>} : vector<6x128xf32>, vector<128x64xf32>, vector<6x64xf32> -> vector<6x64xf32>
    %429 = arith.addf %424, %428 : vector<6x64xf32>
    %cst_408 = arith.constant dense<0.000000e+00> : vector<6x128xf32>
    %430 = tpu.matmul %383, %420, %cst_408 {dimension_numbers = #tpu.dot_dimension_numbers<[1], [0], [0], [1], [0, 0, 1, 1], [], []>} : vector<6x5xf32>, vector<5x128xf32>, vector<6x128xf32> -> vector<6x128xf32>
    %c2_409 = arith.constant 2 : index
    %c0_410 = arith.constant 0 : index
    %c0_411 = arith.constant 0 : index
    %431 = vector.load %arg4[%c2_409, %c0_410, %c0_411] : memref<4x128x64xf32, #tpu.memory_space<vmem>>, vector<1x128x64xf32>
    %432 = vector.shape_cast %431 : vector<1x128x64xf32> to vector<128x64xf32>
    %cst_412 = arith.constant dense<0.000000e+00> : vector<6x64xf32>
    %433 = tpu.matmul %430, %432, %cst_412 {dimension_numbers = #tpu.dot_dimension_numbers<[1], [0], [0], [1], [0, 0, 1, 1], [], []>} : vector<6x128xf32>, vector<128x64xf32>, vector<6x64xf32> -> vector<6x64xf32>
    %434 = arith.addf %429, %433 : vector<6x64xf32>
    %cst_413 = arith.constant dense<0.000000e+00> : vector<6x128xf32>
    %435 = tpu.matmul %386, %420, %cst_413 {dimension_numbers = #tpu.dot_dimension_numbers<[1], [0], [0], [1], [0, 0, 1, 1], [], []>} : vector<6x5xf32>, vector<5x128xf32>, vector<6x128xf32> -> vector<6x128xf32>
    %c3_414 = arith.constant 3 : index
    %c0_415 = arith.constant 0 : index
    %c0_416 = arith.constant 0 : index
    %436 = vector.load %arg4[%c3_414, %c0_415, %c0_416] : memref<4x128x64xf32, #tpu.memory_space<vmem>>, vector<1x128x64xf32>
    %437 = vector.shape_cast %436 : vector<1x128x64xf32> to vector<128x64xf32>
    %cst_417 = arith.constant dense<0.000000e+00> : vector<6x64xf32>
    %438 = tpu.matmul %435, %437, %cst_417 {dimension_numbers = #tpu.dot_dimension_numbers<[1], [0], [0], [1], [0, 0, 1, 1], [], []>} : vector<6x128xf32>, vector<128x64xf32>, vector<6x64xf32> -> vector<6x64xf32>
    %439 = arith.addf %434, %438 : vector<6x64xf32>
    %440 = vector.broadcast %388 : vector<1x64xf32> to vector<6x64xf32>
    %441 = arith.addf %439, %440 : vector<6x64xf32>
    %cst_418 = arith.constant 0.000000e+00 : f32
    %442 = vector.broadcast %cst_418 : f32 to vector<6x64xf32>
    %443 = arith.maximumf %441, %442 : vector<6x64xf32>
    %c1_419 = arith.constant 1 : index
    %c0_420 = arith.constant 0 : index
    %c0_421 = arith.constant 0 : index
    %444 = vector.load %arg11[%c1_419, %c0_420, %c0_421] : memref<6x6x64xf32, #tpu.memory_space<vmem>>, vector<1x6x64xf32>
    %445 = vector.shape_cast %444 : vector<1x6x64xf32> to vector<6x64xf32>
    %446 = vector.shape_cast %443 : vector<6x64xf32> to vector<1x6x64xf32>
    tpu.vector_store %arg11[%c1_419, %c0_420, %c0_421], %446 {strides = array<i32>} : memref<6x6x64xf32, #tpu.memory_space<vmem>>, vector<1x6x64xf32>,
    %c1_422 = arith.constant 1 : index
    %c0_423 = arith.constant 0 : index
    %c0_424 = arith.constant 0 : index
    %447 = vector.load %arg10[%c1_422, %c0_423, %c0_424] : memref<5x5x128xf32, #tpu.memory_space<vmem>>, vector<1x5x128xf32>
    %448 = vector.shape_cast %447 : vector<1x5x128xf32> to vector<5x128xf32>
    %c2_425 = arith.constant 2 : index
    %c0_426 = arith.constant 0 : index
    %c0_427 = arith.constant 0 : index
    %449 = vector.load %arg10[%c2_425, %c0_426, %c0_427] : memref<5x5x128xf32, #tpu.memory_space<vmem>>, vector<1x5x128xf32>
    %450 = vector.shape_cast %449 : vector<1x5x128xf32> to vector<5x128xf32>
    %cst_428 = arith.constant dense<0.000000e+00> : vector<6x128xf32>
    %451 = tpu.matmul %383, %448, %cst_428 {dimension_numbers = #tpu.dot_dimension_numbers<[1], [0], [0], [1], [0, 0, 1, 1], [], []>} : vector<6x5xf32>, vector<5x128xf32>, vector<6x128xf32> -> vector<6x128xf32>
    %c0_429 = arith.constant 0 : index
    %c0_430 = arith.constant 0 : index
    %c0_431 = arith.constant 0 : index
    %452 = vector.load %arg4[%c0_429, %c0_430, %c0_431] : memref<4x128x64xf32, #tpu.memory_space<vmem>>, vector<1x128x64xf32>
    %453 = vector.shape_cast %452 : vector<1x128x64xf32> to vector<128x64xf32>
    %cst_432 = arith.constant dense<0.000000e+00> : vector<6x64xf32>
    %454 = tpu.matmul %451, %453, %cst_432 {dimension_numbers = #tpu.dot_dimension_numbers<[1], [0], [0], [1], [0, 0, 1, 1], [], []>} : vector<6x128xf32>, vector<128x64xf32>, vector<6x64xf32> -> vector<6x64xf32>
    %cst_433 = arith.constant dense<0.000000e+00> : vector<6x128xf32>
    %455 = tpu.matmul %386, %448, %cst_433 {dimension_numbers = #tpu.dot_dimension_numbers<[1], [0], [0], [1], [0, 0, 1, 1], [], []>} : vector<6x5xf32>, vector<5x128xf32>, vector<6x128xf32> -> vector<6x128xf32>
    %c1_434 = arith.constant 1 : index
    %c0_435 = arith.constant 0 : index
    %c0_436 = arith.constant 0 : index
    %456 = vector.load %arg4[%c1_434, %c0_435, %c0_436] : memref<4x128x64xf32, #tpu.memory_space<vmem>>, vector<1x128x64xf32>
    %457 = vector.shape_cast %456 : vector<1x128x64xf32> to vector<128x64xf32>
    %cst_437 = arith.constant dense<0.000000e+00> : vector<6x64xf32>
    %458 = tpu.matmul %455, %457, %cst_437 {dimension_numbers = #tpu.dot_dimension_numbers<[1], [0], [0], [1], [0, 0, 1, 1], [], []>} : vector<6x128xf32>, vector<128x64xf32>, vector<6x64xf32> -> vector<6x64xf32>
    %459 = arith.addf %454, %458 : vector<6x64xf32>
    %cst_438 = arith.constant dense<0.000000e+00> : vector<6x128xf32>
    %460 = tpu.matmul %383, %450, %cst_438 {dimension_numbers = #tpu.dot_dimension_numbers<[1], [0], [0], [1], [0, 0, 1, 1], [], []>} : vector<6x5xf32>, vector<5x128xf32>, vector<6x128xf32> -> vector<6x128xf32>
    %c2_439 = arith.constant 2 : index
    %c0_440 = arith.constant 0 : index
    %c0_441 = arith.constant 0 : index
    %461 = vector.load %arg4[%c2_439, %c0_440, %c0_441] : memref<4x128x64xf32, #tpu.memory_space<vmem>>, vector<1x128x64xf32>
    %462 = vector.shape_cast %461 : vector<1x128x64xf32> to vector<128x64xf32>
    %cst_442 = arith.constant dense<0.000000e+00> : vector<6x64xf32>
    %463 = tpu.matmul %460, %462, %cst_442 {dimension_numbers = #tpu.dot_dimension_numbers<[1], [0], [0], [1], [0, 0, 1, 1], [], []>} : vector<6x128xf32>, vector<128x64xf32>, vector<6x64xf32> -> vector<6x64xf32>
    %464 = arith.addf %459, %463 : vector<6x64xf32>
    %cst_443 = arith.constant dense<0.000000e+00> : vector<6x128xf32>
    %465 = tpu.matmul %386, %450, %cst_443 {dimension_numbers = #tpu.dot_dimension_numbers<[1], [0], [0], [1], [0, 0, 1, 1], [], []>} : vector<6x5xf32>, vector<5x128xf32>, vector<6x128xf32> -> vector<6x128xf32>
    %c3_444 = arith.constant 3 : index
    %c0_445 = arith.constant 0 : index
    %c0_446 = arith.constant 0 : index
    %466 = vector.load %arg4[%c3_444, %c0_445, %c0_446] : memref<4x128x64xf32, #tpu.memory_space<vmem>>, vector<1x128x64xf32>
    %467 = vector.shape_cast %466 : vector<1x128x64xf32> to vector<128x64xf32>
    %cst_447 = arith.constant dense<0.000000e+00> : vector<6x64xf32>
    %468 = tpu.matmul %465, %467, %cst_447 {dimension_numbers = #tpu.dot_dimension_numbers<[1], [0], [0], [1], [0, 0, 1, 1], [], []>} : vector<6x128xf32>, vector<128x64xf32>, vector<6x64xf32> -> vector<6x64xf32>
    %469 = arith.addf %464, %468 : vector<6x64xf32>
    %470 = vector.broadcast %388 : vector<1x64xf32> to vector<6x64xf32>
    %471 = arith.addf %469, %470 : vector<6x64xf32>
    %cst_448 = arith.constant 0.000000e+00 : f32
    %472 = vector.broadcast %cst_448 : f32 to vector<6x64xf32>
    %473 = arith.maximumf %471, %472 : vector<6x64xf32>
    %c2_449 = arith.constant 2 : index
    %c0_450 = arith.constant 0 : index
    %c0_451 = arith.constant 0 : index
    %474 = vector.load %arg11[%c2_449, %c0_450, %c0_451] : memref<6x6x64xf32, #tpu.memory_space<vmem>>, vector<1x6x64xf32>
    %475 = vector.shape_cast %474 : vector<1x6x64xf32> to vector<6x64xf32>
    %476 = vector.shape_cast %473 : vector<6x64xf32> to vector<1x6x64xf32>
    tpu.vector_store %arg11[%c2_449, %c0_450, %c0_451], %476 {strides = array<i32>} : memref<6x6x64xf32, #tpu.memory_space<vmem>>, vector<1x6x64xf32>,
    %c2_452 = arith.constant 2 : index
    %c0_453 = arith.constant 0 : index
    %c0_454 = arith.constant 0 : index
    %477 = vector.load %arg10[%c2_452, %c0_453, %c0_454] : memref<5x5x128xf32, #tpu.memory_space<vmem>>, vector<1x5x128xf32>
    %478 = vector.shape_cast %477 : vector<1x5x128xf32> to vector<5x128xf32>
    %c3_455 = arith.constant 3 : index
    %c0_456 = arith.constant 0 : index
    %c0_457 = arith.constant 0 : index
    %479 = vector.load %arg10[%c3_455, %c0_456, %c0_457] : memref<5x5x128xf32, #tpu.memory_space<vmem>>, vector<1x5x128xf32>
    %480 = vector.shape_cast %479 : vector<1x5x128xf32> to vector<5x128xf32>
    %cst_458 = arith.constant dense<0.000000e+00> : vector<6x128xf32>
    %481 = tpu.matmul %383, %478, %cst_458 {dimension_numbers = #tpu.dot_dimension_numbers<[1], [0], [0], [1], [0, 0, 1, 1], [], []>} : vector<6x5xf32>, vector<5x128xf32>, vector<6x128xf32> -> vector<6x128xf32>
    %c0_459 = arith.constant 0 : index
    %c0_460 = arith.constant 0 : index
    %c0_461 = arith.constant 0 : index
    %482 = vector.load %arg4[%c0_459, %c0_460, %c0_461] : memref<4x128x64xf32, #tpu.memory_space<vmem>>, vector<1x128x64xf32>
    %483 = vector.shape_cast %482 : vector<1x128x64xf32> to vector<128x64xf32>
    %cst_462 = arith.constant dense<0.000000e+00> : vector<6x64xf32>
    %484 = tpu.matmul %481, %483, %cst_462 {dimension_numbers = #tpu.dot_dimension_numbers<[1], [0], [0], [1], [0, 0, 1, 1], [], []>} : vector<6x128xf32>, vector<128x64xf32>, vector<6x64xf32> -> vector<6x64xf32>
    %cst_463 = arith.constant dense<0.000000e+00> : vector<6x128xf32>
    %485 = tpu.matmul %386, %478, %cst_463 {dimension_numbers = #tpu.dot_dimension_numbers<[1], [0], [0], [1], [0, 0, 1, 1], [], []>} : vector<6x5xf32>, vector<5x128xf32>, vector<6x128xf32> -> vector<6x128xf32>
    %c1_464 = arith.constant 1 : index
    %c0_465 = arith.constant 0 : index
    %c0_466 = arith.constant 0 : index
    %486 = vector.load %arg4[%c1_464, %c0_465, %c0_466] : memref<4x128x64xf32, #tpu.memory_space<vmem>>, vector<1x128x64xf32>
    %487 = vector.shape_cast %486 : vector<1x128x64xf32> to vector<128x64xf32>
    %cst_467 = arith.constant dense<0.000000e+00> : vector<6x64xf32>
    %488 = tpu.matmul %485, %487, %cst_467 {dimension_numbers = #tpu.dot_dimension_numbers<[1], [0], [0], [1], [0, 0, 1, 1], [], []>} : vector<6x128xf32>, vector<128x64xf32>, vector<6x64xf32> -> vector<6x64xf32>
    %489 = arith.addf %484, %488 : vector<6x64xf32>
    %cst_468 = arith.constant dense<0.000000e+00> : vector<6x128xf32>
    %490 = tpu.matmul %383, %480, %cst_468 {dimension_numbers = #tpu.dot_dimension_numbers<[1], [0], [0], [1], [0, 0, 1, 1], [], []>} : vector<6x5xf32>, vector<5x128xf32>, vector<6x128xf32> -> vector<6x128xf32>
    %c2_469 = arith.constant 2 : index
    %c0_470 = arith.constant 0 : index
    %c0_471 = arith.constant 0 : index
    %491 = vector.load %arg4[%c2_469, %c0_470, %c0_471] : memref<4x128x64xf32, #tpu.memory_space<vmem>>, vector<1x128x64xf32>
    %492 = vector.shape_cast %491 : vector<1x128x64xf32> to vector<128x64xf32>
    %cst_472 = arith.constant dense<0.000000e+00> : vector<6x64xf32>
    %493 = tpu.matmul %490, %492, %cst_472 {dimension_numbers = #tpu.dot_dimension_numbers<[1], [0], [0], [1], [0, 0, 1, 1], [], []>} : vector<6x128xf32>, vector<128x64xf32>, vector<6x64xf32> -> vector<6x64xf32>
    %494 = arith.addf %489, %493 : vector<6x64xf32>
    %cst_473 = arith.constant dense<0.000000e+00> : vector<6x128xf32>
    %495 = tpu.matmul %386, %480, %cst_473 {dimension_numbers = #tpu.dot_dimension_numbers<[1], [0], [0], [1], [0, 0, 1, 1], [], []>} : vector<6x5xf32>, vector<5x128xf32>, vector<6x128xf32> -> vector<6x128xf32>
    %c3_474 = arith.constant 3 : index
    %c0_475 = arith.constant 0 : index
    %c0_476 = arith.constant 0 : index
    %496 = vector.load %arg4[%c3_474, %c0_475, %c0_476] : memref<4x128x64xf32, #tpu.memory_space<vmem>>, vector<1x128x64xf32>
    %497 = vector.shape_cast %496 : vector<1x128x64xf32> to vector<128x64xf32>
    %cst_477 = arith.constant dense<0.000000e+00> : vector<6x64xf32>
    %498 = tpu.matmul %495, %497, %cst_477 {dimension_numbers = #tpu.dot_dimension_numbers<[1], [0], [0], [1], [0, 0, 1, 1], [], []>} : vector<6x128xf32>, vector<128x64xf32>, vector<6x64xf32> -> vector<6x64xf32>
    %499 = arith.addf %494, %498 : vector<6x64xf32>
    %500 = vector.broadcast %388 : vector<1x64xf32> to vector<6x64xf32>
    %501 = arith.addf %499, %500 : vector<6x64xf32>
    %cst_478 = arith.constant 0.000000e+00 : f32
    %502 = vector.broadcast %cst_478 : f32 to vector<6x64xf32>
    %503 = arith.maximumf %501, %502 : vector<6x64xf32>
    %c3_479 = arith.constant 3 : index
    %c0_480 = arith.constant 0 : index
    %c0_481 = arith.constant 0 : index
    %504 = vector.load %arg11[%c3_479, %c0_480, %c0_481] : memref<6x6x64xf32, #tpu.memory_space<vmem>>, vector<1x6x64xf32>
    %505 = vector.shape_cast %504 : vector<1x6x64xf32> to vector<6x64xf32>
    %506 = vector.shape_cast %503 : vector<6x64xf32> to vector<1x6x64xf32>
    tpu.vector_store %arg11[%c3_479, %c0_480, %c0_481], %506 {strides = array<i32>} : memref<6x6x64xf32, #tpu.memory_space<vmem>>, vector<1x6x64xf32>,
    %c3_482 = arith.constant 3 : index
    %c0_483 = arith.constant 0 : index
    %c0_484 = arith.constant 0 : index
    %507 = vector.load %arg10[%c3_482, %c0_483, %c0_484] : memref<5x5x128xf32, #tpu.memory_space<vmem>>, vector<1x5x128xf32>
    %508 = vector.shape_cast %507 : vector<1x5x128xf32> to vector<5x128xf32>
    %c4_485 = arith.constant 4 : index
    %c0_486 = arith.constant 0 : index
    %c0_487 = arith.constant 0 : index
    %509 = vector.load %arg10[%c4_485, %c0_486, %c0_487] : memref<5x5x128xf32, #tpu.memory_space<vmem>>, vector<1x5x128xf32>
    %510 = vector.shape_cast %509 : vector<1x5x128xf32> to vector<5x128xf32>
    %cst_488 = arith.constant dense<0.000000e+00> : vector<6x128xf32>
    %511 = tpu.matmul %383, %508, %cst_488 {dimension_numbers = #tpu.dot_dimension_numbers<[1], [0], [0], [1], [0, 0, 1, 1], [], []>} : vector<6x5xf32>, vector<5x128xf32>, vector<6x128xf32> -> vector<6x128xf32>
    %c0_489 = arith.constant 0 : index
    %c0_490 = arith.constant 0 : index
    %c0_491 = arith.constant 0 : index
    %512 = vector.load %arg4[%c0_489, %c0_490, %c0_491] : memref<4x128x64xf32, #tpu.memory_space<vmem>>, vector<1x128x64xf32>
    %513 = vector.shape_cast %512 : vector<1x128x64xf32> to vector<128x64xf32>
    %cst_492 = arith.constant dense<0.000000e+00> : vector<6x64xf32>
    %514 = tpu.matmul %511, %513, %cst_492 {dimension_numbers = #tpu.dot_dimension_numbers<[1], [0], [0], [1], [0, 0, 1, 1], [], []>} : vector<6x128xf32>, vector<128x64xf32>, vector<6x64xf32> -> vector<6x64xf32>
    %cst_493 = arith.constant dense<0.000000e+00> : vector<6x128xf32>
    %515 = tpu.matmul %386, %508, %cst_493 {dimension_numbers = #tpu.dot_dimension_numbers<[1], [0], [0], [1], [0, 0, 1, 1], [], []>} : vector<6x5xf32>, vector<5x128xf32>, vector<6x128xf32> -> vector<6x128xf32>
    %c1_494 = arith.constant 1 : index
    %c0_495 = arith.constant 0 : index
    %c0_496 = arith.constant 0 : index
    %516 = vector.load %arg4[%c1_494, %c0_495, %c0_496] : memref<4x128x64xf32, #tpu.memory_space<vmem>>, vector<1x128x64xf32>
    %517 = vector.shape_cast %516 : vector<1x128x64xf32> to vector<128x64xf32>
    %cst_497 = arith.constant dense<0.000000e+00> : vector<6x64xf32>
    %518 = tpu.matmul %515, %517, %cst_497 {dimension_numbers = #tpu.dot_dimension_numbers<[1], [0], [0], [1], [0, 0, 1, 1], [], []>} : vector<6x128xf32>, vector<128x64xf32>, vector<6x64xf32> -> vector<6x64xf32>
    %519 = arith.addf %514, %518 : vector<6x64xf32>
    %cst_498 = arith.constant dense<0.000000e+00> : vector<6x128xf32>
    %520 = tpu.matmul %383, %510, %cst_498 {dimension_numbers = #tpu.dot_dimension_numbers<[1], [0], [0], [1], [0, 0, 1, 1], [], []>} : vector<6x5xf32>, vector<5x128xf32>, vector<6x128xf32> -> vector<6x128xf32>
    %c2_499 = arith.constant 2 : index
    %c0_500 = arith.constant 0 : index
    %c0_501 = arith.constant 0 : index
    %521 = vector.load %arg4[%c2_499, %c0_500, %c0_501] : memref<4x128x64xf32, #tpu.memory_space<vmem>>, vector<1x128x64xf32>
    %522 = vector.shape_cast %521 : vector<1x128x64xf32> to vector<128x64xf32>
    %cst_502 = arith.constant dense<0.000000e+00> : vector<6x64xf32>
    %523 = tpu.matmul %520, %522, %cst_502 {dimension_numbers = #tpu.dot_dimension_numbers<[1], [0], [0], [1], [0, 0, 1, 1], [], []>} : vector<6x128xf32>, vector<128x64xf32>, vector<6x64xf32> -> vector<6x64xf32>
    %524 = arith.addf %519, %523 : vector<6x64xf32>
    %cst_503 = arith.constant dense<0.000000e+00> : vector<6x128xf32>
    %525 = tpu.matmul %386, %510, %cst_503 {dimension_numbers = #tpu.dot_dimension_numbers<[1], [0], [0], [1], [0, 0, 1, 1], [], []>} : vector<6x5xf32>, vector<5x128xf32>, vector<6x128xf32> -> vector<6x128xf32>
    %c3_504 = arith.constant 3 : index
    %c0_505 = arith.constant 0 : index
    %c0_506 = arith.constant 0 : index
    %526 = vector.load %arg4[%c3_504, %c0_505, %c0_506] : memref<4x128x64xf32, #tpu.memory_space<vmem>>, vector<1x128x64xf32>
    %527 = vector.shape_cast %526 : vector<1x128x64xf32> to vector<128x64xf32>
    %cst_507 = arith.constant dense<0.000000e+00> : vector<6x64xf32>
    %528 = tpu.matmul %525, %527, %cst_507 {dimension_numbers = #tpu.dot_dimension_numbers<[1], [0], [0], [1], [0, 0, 1, 1], [], []>} : vector<6x128xf32>, vector<128x64xf32>, vector<6x64xf32> -> vector<6x64xf32>
    %529 = arith.addf %524, %528 : vector<6x64xf32>
    %530 = vector.broadcast %388 : vector<1x64xf32> to vector<6x64xf32>
    %531 = arith.addf %529, %530 : vector<6x64xf32>
    %cst_508 = arith.constant 0.000000e+00 : f32
    %532 = vector.broadcast %cst_508 : f32 to vector<6x64xf32>
    %533 = arith.maximumf %531, %532 : vector<6x64xf32>
    %c4_509 = arith.constant 4 : index
    %c0_510 = arith.constant 0 : index
    %c0_511 = arith.constant 0 : index
    %534 = vector.load %arg11[%c4_509, %c0_510, %c0_511] : memref<6x6x64xf32, #tpu.memory_space<vmem>>, vector<1x6x64xf32>
    %535 = vector.shape_cast %534 : vector<1x6x64xf32> to vector<6x64xf32>
    %536 = vector.shape_cast %533 : vector<6x64xf32> to vector<1x6x64xf32>
    tpu.vector_store %arg11[%c4_509, %c0_510, %c0_511], %536 {strides = array<i32>} : memref<6x6x64xf32, #tpu.memory_space<vmem>>, vector<1x6x64xf32>,
    %c4_512 = arith.constant 4 : index
    %c0_513 = arith.constant 0 : index
    %c0_514 = arith.constant 0 : index
    %537 = vector.load %arg10[%c4_512, %c0_513, %c0_514] : memref<5x5x128xf32, #tpu.memory_space<vmem>>, vector<1x5x128xf32>
    %538 = vector.shape_cast %537 : vector<1x5x128xf32> to vector<5x128xf32>
    %cst_515 = arith.constant dense<0.000000e+00> : vector<6x128xf32>
    %539 = tpu.matmul %383, %538, %cst_515 {dimension_numbers = #tpu.dot_dimension_numbers<[1], [0], [0], [1], [0, 0, 1, 1], [], []>} : vector<6x5xf32>, vector<5x128xf32>, vector<6x128xf32> -> vector<6x128xf32>
    %c0_516 = arith.constant 0 : index
    %c0_517 = arith.constant 0 : index
    %c0_518 = arith.constant 0 : index
    %540 = vector.load %arg4[%c0_516, %c0_517, %c0_518] : memref<4x128x64xf32, #tpu.memory_space<vmem>>, vector<1x128x64xf32>
    %541 = vector.shape_cast %540 : vector<1x128x64xf32> to vector<128x64xf32>
    %cst_519 = arith.constant dense<0.000000e+00> : vector<6x64xf32>
    %542 = tpu.matmul %539, %541, %cst_519 {dimension_numbers = #tpu.dot_dimension_numbers<[1], [0], [0], [1], [0, 0, 1, 1], [], []>} : vector<6x128xf32>, vector<128x64xf32>, vector<6x64xf32> -> vector<6x64xf32>
    %cst_520 = arith.constant dense<0.000000e+00> : vector<6x128xf32>
    %543 = tpu.matmul %386, %538, %cst_520 {dimension_numbers = #tpu.dot_dimension_numbers<[1], [0], [0], [1], [0, 0, 1, 1], [], []>} : vector<6x5xf32>, vector<5x128xf32>, vector<6x128xf32> -> vector<6x128xf32>
    %c1_521 = arith.constant 1 : index
    %c0_522 = arith.constant 0 : index
    %c0_523 = arith.constant 0 : index
    %544 = vector.load %arg4[%c1_521, %c0_522, %c0_523] : memref<4x128x64xf32, #tpu.memory_space<vmem>>, vector<1x128x64xf32>
    %545 = vector.shape_cast %544 : vector<1x128x64xf32> to vector<128x64xf32>
    %cst_524 = arith.constant dense<0.000000e+00> : vector<6x64xf32>
    %546 = tpu.matmul %543, %545, %cst_524 {dimension_numbers = #tpu.dot_dimension_numbers<[1], [0], [0], [1], [0, 0, 1, 1], [], []>} : vector<6x128xf32>, vector<128x64xf32>, vector<6x64xf32> -> vector<6x64xf32>
    %547 = arith.addf %542, %546 : vector<6x64xf32>
    %cst_525 = arith.constant dense<0.000000e+00> : vector<6x128xf32>
    %548 = tpu.matmul %383, %387, %cst_525 {dimension_numbers = #tpu.dot_dimension_numbers<[1], [0], [0], [1], [0, 0, 1, 1], [], []>} : vector<6x5xf32>, vector<5x128xf32>, vector<6x128xf32> -> vector<6x128xf32>
    %c2_526 = arith.constant 2 : index
    %c0_527 = arith.constant 0 : index
    %c0_528 = arith.constant 0 : index
    %549 = vector.load %arg4[%c2_526, %c0_527, %c0_528] : memref<4x128x64xf32, #tpu.memory_space<vmem>>, vector<1x128x64xf32>
    %550 = vector.shape_cast %549 : vector<1x128x64xf32> to vector<128x64xf32>
    %cst_529 = arith.constant dense<0.000000e+00> : vector<6x64xf32>
    %551 = tpu.matmul %548, %550, %cst_529 {dimension_numbers = #tpu.dot_dimension_numbers<[1], [0], [0], [1], [0, 0, 1, 1], [], []>} : vector<6x128xf32>, vector<128x64xf32>, vector<6x64xf32> -> vector<6x64xf32>
    %552 = arith.addf %547, %551 : vector<6x64xf32>
    %cst_530 = arith.constant dense<0.000000e+00> : vector<6x128xf32>
    %553 = tpu.matmul %386, %387, %cst_530 {dimension_numbers = #tpu.dot_dimension_numbers<[1], [0], [0], [1], [0, 0, 1, 1], [], []>} : vector<6x5xf32>, vector<5x128xf32>, vector<6x128xf32> -> vector<6x128xf32>
    %c3_531 = arith.constant 3 : index
    %c0_532 = arith.constant 0 : index
    %c0_533 = arith.constant 0 : index
    %554 = vector.load %arg4[%c3_531, %c0_532, %c0_533] : memref<4x128x64xf32, #tpu.memory_space<vmem>>, vector<1x128x64xf32>
    %555 = vector.shape_cast %554 : vector<1x128x64xf32> to vector<128x64xf32>
    %cst_534 = arith.constant dense<0.000000e+00> : vector<6x64xf32>
    %556 = tpu.matmul %553, %555, %cst_534 {dimension_numbers = #tpu.dot_dimension_numbers<[1], [0], [0], [1], [0, 0, 1, 1], [], []>} : vector<6x128xf32>, vector<128x64xf32>, vector<6x64xf32> -> vector<6x64xf32>
    %557 = arith.addf %552, %556 : vector<6x64xf32>
    %558 = vector.broadcast %388 : vector<1x64xf32> to vector<6x64xf32>
    %559 = arith.addf %557, %558 : vector<6x64xf32>
    %cst_535 = arith.constant 0.000000e+00 : f32
    %560 = vector.broadcast %cst_535 : f32 to vector<6x64xf32>
    %561 = arith.maximumf %559, %560 : vector<6x64xf32>
    %c5_536 = arith.constant 5 : index
    %c0_537 = arith.constant 0 : index
    %c0_538 = arith.constant 0 : index
    %562 = vector.load %arg11[%c5_536, %c0_537, %c0_538] : memref<6x6x64xf32, #tpu.memory_space<vmem>>, vector<1x6x64xf32>
    %563 = vector.shape_cast %562 : vector<1x6x64xf32> to vector<6x64xf32>
    %564 = vector.shape_cast %561 : vector<6x64xf32> to vector<1x6x64xf32>
    tpu.vector_store %arg11[%c5_536, %c0_537, %c0_538], %564 {strides = array<i32>} : memref<6x6x64xf32, #tpu.memory_space<vmem>>, vector<1x6x64xf32>,
    %565 = tpu.iota {dimensions = array<i32: 0>} : vector<3x6xi32>
    %566 = tpu.iota {dimensions = array<i32: 1>} : vector<3x6xi32>
    %c2_i32_539 = arith.constant 2 : i32
    %567 = vector.broadcast %c2_i32_539 : i32 to vector<3x6xi32>
    %568 = arith.muli %567, %565 : vector<3x6xi32>
    %569 = arith.cmpi eq, %566, %568 : vector<3x6xi32>
    %570 = arith.extui %569 : vector<3x6xi1> to vector<3x6xi32>
    %571 = arith.sitofp %570 : vector<3x6xi32> to vector<3x6xf32>
    %c2_i32_540 = arith.constant 2 : i32
    %572 = vector.broadcast %c2_i32_540 : i32 to vector<3x6xi32>
    %573 = arith.muli %572, %565 : vector<3x6xi32>
    %c1_i32_541 = arith.constant 1 : i32
    %574 = vector.broadcast %c1_i32_541 : i32 to vector<3x6xi32>
    %575 = arith.addi %573, %574 : vector<3x6xi32>
    %576 = arith.cmpi eq, %566, %575 : vector<3x6xi32>
    %577 = arith.extui %576 : vector<3x6xi1> to vector<3x6xi32>
    %578 = arith.sitofp %577 : vector<3x6xi32> to vector<3x6xf32>
    %c0_542 = arith.constant 0 : index
    %c0_543 = arith.constant 0 : index
    %579 = vector.load %arg7[%c0_542, %c0_543] : memref<1x128xf32, #tpu.memory_space<vmem>>, vector<1x128xf32>
    %c0_544 = arith.constant 0 : index
    %c0_545 = arith.constant 0 : index
    %c0_546 = arith.constant 0 : index
    %580 = vector.load %arg11[%c0_544, %c0_545, %c0_546] : memref<6x6x64xf32, #tpu.memory_space<vmem>>, vector<1x6x64xf32>
    %581 = vector.shape_cast %580 : vector<1x6x64xf32> to vector<6x64xf32>
    %c1_547 = arith.constant 1 : index
    %c0_548 = arith.constant 0 : index
    %c0_549 = arith.constant 0 : index
    %582 = vector.load %arg11[%c1_547, %c0_548, %c0_549] : memref<6x6x64xf32, #tpu.memory_space<vmem>>, vector<1x6x64xf32>
    %583 = vector.shape_cast %582 : vector<1x6x64xf32> to vector<6x64xf32>
    %584 = arith.maximumf %581, %583 : vector<6x64xf32>
    %cst_550 = arith.constant dense<0.000000e+00> : vector<3x64xf32>
    %585 = tpu.matmul %571, %584, %cst_550 {dimension_numbers = #tpu.dot_dimension_numbers<[1], [0], [0], [1], [0, 0, 1, 1], [], []>} : vector<3x6xf32>, vector<6x64xf32>, vector<3x64xf32> -> vector<3x64xf32>
    %cst_551 = arith.constant dense<0.000000e+00> : vector<3x64xf32>
    %586 = tpu.matmul %578, %584, %cst_551 {dimension_numbers = #tpu.dot_dimension_numbers<[1], [0], [0], [1], [0, 0, 1, 1], [], []>} : vector<3x6xf32>, vector<6x64xf32>, vector<3x64xf32> -> vector<3x64xf32>
    %587 = arith.maximumf %585, %586 : vector<3x64xf32>
    %588 = tpu.iota {dimensions = array<i32: 1>} : vector<1x3xi32>
    %c0_i32 = arith.constant 0 : i32
    %589 = vector.broadcast %c0_i32 : i32 to vector<1x3xi32>
    %590 = arith.cmpi eq, %588, %589 : vector<1x3xi32>
    %591 = arith.extui %590 : vector<1x3xi1> to vector<1x3xi32>
    %592 = arith.sitofp %591 : vector<1x3xi32> to vector<1x3xf32>
    %cst_552 = arith.constant dense<0.000000e+00> : vector<1x64xf32>
    %593 = tpu.matmul %592, %587, %cst_552 {dimension_numbers = #tpu.dot_dimension_numbers<[1], [0], [0], [1], [0, 0, 1, 1], [], []>} : vector<1x3xf32>, vector<3x64xf32>, vector<1x64xf32> -> vector<1x64xf32>
    %c0_553 = arith.constant 0 : index
    %c0_554 = arith.constant 0 : index
    %c0_555 = arith.constant 0 : index
    %c0_556 = arith.constant 0 : index
    %594 = vector.load %arg6[%c0_553, %c0_554, %c0_555, %c0_556] : memref<3x3x64x128xf32, #tpu.memory_space<vmem>>, vector<1x1x64x128xf32>
    %595 = vector.shape_cast %594 : vector<1x1x64x128xf32> to vector<64x128xf32>
    %cst_557 = arith.constant dense<0.000000e+00> : vector<1x128xf32>
    %596 = tpu.matmul %593, %595, %cst_557 {dimension_numbers = #tpu.dot_dimension_numbers<[1], [0], [0], [1], [0, 0, 1, 1], [], []>} : vector<1x64xf32>, vector<64x128xf32>, vector<1x128xf32> -> vector<1x128xf32>
    %597 = arith.addf %579, %596 : vector<1x128xf32>
    %598 = tpu.iota {dimensions = array<i32: 1>} : vector<1x3xi32>
    %c1_i32_558 = arith.constant 1 : i32
    %599 = vector.broadcast %c1_i32_558 : i32 to vector<1x3xi32>
    %600 = arith.cmpi eq, %598, %599 : vector<1x3xi32>
    %601 = arith.extui %600 : vector<1x3xi1> to vector<1x3xi32>
    %602 = arith.sitofp %601 : vector<1x3xi32> to vector<1x3xf32>
    %cst_559 = arith.constant dense<0.000000e+00> : vector<1x64xf32>
    %603 = tpu.matmul %602, %587, %cst_559 {dimension_numbers = #tpu.dot_dimension_numbers<[1], [0], [0], [1], [0, 0, 1, 1], [], []>} : vector<1x3xf32>, vector<3x64xf32>, vector<1x64xf32> -> vector<1x64xf32>
    %c0_560 = arith.constant 0 : index
    %c1_561 = arith.constant 1 : index
    %c0_562 = arith.constant 0 : index
    %c0_563 = arith.constant 0 : index
    %604 = vector.load %arg6[%c0_560, %c1_561, %c0_562, %c0_563] : memref<3x3x64x128xf32, #tpu.memory_space<vmem>>, vector<1x1x64x128xf32>
    %605 = vector.shape_cast %604 : vector<1x1x64x128xf32> to vector<64x128xf32>
    %cst_564 = arith.constant dense<0.000000e+00> : vector<1x128xf32>
    %606 = tpu.matmul %603, %605, %cst_564 {dimension_numbers = #tpu.dot_dimension_numbers<[1], [0], [0], [1], [0, 0, 1, 1], [], []>} : vector<1x64xf32>, vector<64x128xf32>, vector<1x128xf32> -> vector<1x128xf32>
    %607 = arith.addf %597, %606 : vector<1x128xf32>
    %608 = tpu.iota {dimensions = array<i32: 1>} : vector<1x3xi32>
    %c2_i32_565 = arith.constant 2 : i32
    %609 = vector.broadcast %c2_i32_565 : i32 to vector<1x3xi32>
    %610 = arith.cmpi eq, %608, %609 : vector<1x3xi32>
    %611 = arith.extui %610 : vector<1x3xi1> to vector<1x3xi32>
    %612 = arith.sitofp %611 : vector<1x3xi32> to vector<1x3xf32>
    %cst_566 = arith.constant dense<0.000000e+00> : vector<1x64xf32>
    %613 = tpu.matmul %612, %587, %cst_566 {dimension_numbers = #tpu.dot_dimension_numbers<[1], [0], [0], [1], [0, 0, 1, 1], [], []>} : vector<1x3xf32>, vector<3x64xf32>, vector<1x64xf32> -> vector<1x64xf32>
    %c0_567 = arith.constant 0 : index
    %c2_568 = arith.constant 2 : index
    %c0_569 = arith.constant 0 : index
    %c0_570 = arith.constant 0 : index
    %614 = vector.load %arg6[%c0_567, %c2_568, %c0_569, %c0_570] : memref<3x3x64x128xf32, #tpu.memory_space<vmem>>, vector<1x1x64x128xf32>
    %615 = vector.shape_cast %614 : vector<1x1x64x128xf32> to vector<64x128xf32>
    %cst_571 = arith.constant dense<0.000000e+00> : vector<1x128xf32>
    %616 = tpu.matmul %613, %615, %cst_571 {dimension_numbers = #tpu.dot_dimension_numbers<[1], [0], [0], [1], [0, 0, 1, 1], [], []>} : vector<1x64xf32>, vector<64x128xf32>, vector<1x128xf32> -> vector<1x128xf32>
    %617 = arith.addf %607, %616 : vector<1x128xf32>
    %c2_572 = arith.constant 2 : index
    %c0_573 = arith.constant 0 : index
    %c0_574 = arith.constant 0 : index
    %618 = vector.load %arg11[%c2_572, %c0_573, %c0_574] : memref<6x6x64xf32, #tpu.memory_space<vmem>>, vector<1x6x64xf32>
    %619 = vector.shape_cast %618 : vector<1x6x64xf32> to vector<6x64xf32>
    %c3_575 = arith.constant 3 : index
    %c0_576 = arith.constant 0 : index
    %c0_577 = arith.constant 0 : index
    %620 = vector.load %arg11[%c3_575, %c0_576, %c0_577] : memref<6x6x64xf32, #tpu.memory_space<vmem>>, vector<1x6x64xf32>
    %621 = vector.shape_cast %620 : vector<1x6x64xf32> to vector<6x64xf32>
    %622 = arith.maximumf %619, %621 : vector<6x64xf32>
    %cst_578 = arith.constant dense<0.000000e+00> : vector<3x64xf32>
    %623 = tpu.matmul %571, %622, %cst_578 {dimension_numbers = #tpu.dot_dimension_numbers<[1], [0], [0], [1], [0, 0, 1, 1], [], []>} : vector<3x6xf32>, vector<6x64xf32>, vector<3x64xf32> -> vector<3x64xf32>
    %cst_579 = arith.constant dense<0.000000e+00> : vector<3x64xf32>
    %624 = tpu.matmul %578, %622, %cst_579 {dimension_numbers = #tpu.dot_dimension_numbers<[1], [0], [0], [1], [0, 0, 1, 1], [], []>} : vector<3x6xf32>, vector<6x64xf32>, vector<3x64xf32> -> vector<3x64xf32>
    %625 = arith.maximumf %623, %624 : vector<3x64xf32>
    %626 = tpu.iota {dimensions = array<i32: 1>} : vector<1x3xi32>
    %c0_i32_580 = arith.constant 0 : i32
    %627 = vector.broadcast %c0_i32_580 : i32 to vector<1x3xi32>
    %628 = arith.cmpi eq, %626, %627 : vector<1x3xi32>
    %629 = arith.extui %628 : vector<1x3xi1> to vector<1x3xi32>
    %630 = arith.sitofp %629 : vector<1x3xi32> to vector<1x3xf32>
    %cst_581 = arith.constant dense<0.000000e+00> : vector<1x64xf32>
    %631 = tpu.matmul %630, %625, %cst_581 {dimension_numbers = #tpu.dot_dimension_numbers<[1], [0], [0], [1], [0, 0, 1, 1], [], []>} : vector<1x3xf32>, vector<3x64xf32>, vector<1x64xf32> -> vector<1x64xf32>
    %c1_582 = arith.constant 1 : index
    %c0_583 = arith.constant 0 : index
    %c0_584 = arith.constant 0 : index
    %c0_585 = arith.constant 0 : index
    %632 = vector.load %arg6[%c1_582, %c0_583, %c0_584, %c0_585] : memref<3x3x64x128xf32, #tpu.memory_space<vmem>>, vector<1x1x64x128xf32>
    %633 = vector.shape_cast %632 : vector<1x1x64x128xf32> to vector<64x128xf32>
    %cst_586 = arith.constant dense<0.000000e+00> : vector<1x128xf32>
    %634 = tpu.matmul %631, %633, %cst_586 {dimension_numbers = #tpu.dot_dimension_numbers<[1], [0], [0], [1], [0, 0, 1, 1], [], []>} : vector<1x64xf32>, vector<64x128xf32>, vector<1x128xf32> -> vector<1x128xf32>
    %635 = arith.addf %617, %634 : vector<1x128xf32>
    %636 = tpu.iota {dimensions = array<i32: 1>} : vector<1x3xi32>
    %c1_i32_587 = arith.constant 1 : i32
    %637 = vector.broadcast %c1_i32_587 : i32 to vector<1x3xi32>
    %638 = arith.cmpi eq, %636, %637 : vector<1x3xi32>
    %639 = arith.extui %638 : vector<1x3xi1> to vector<1x3xi32>
    %640 = arith.sitofp %639 : vector<1x3xi32> to vector<1x3xf32>
    %cst_588 = arith.constant dense<0.000000e+00> : vector<1x64xf32>
    %641 = tpu.matmul %640, %625, %cst_588 {dimension_numbers = #tpu.dot_dimension_numbers<[1], [0], [0], [1], [0, 0, 1, 1], [], []>} : vector<1x3xf32>, vector<3x64xf32>, vector<1x64xf32> -> vector<1x64xf32>
    %c1_589 = arith.constant 1 : index
    %c1_590 = arith.constant 1 : index
    %c0_591 = arith.constant 0 : index
    %c0_592 = arith.constant 0 : index
    %642 = vector.load %arg6[%c1_589, %c1_590, %c0_591, %c0_592] : memref<3x3x64x128xf32, #tpu.memory_space<vmem>>, vector<1x1x64x128xf32>
    %643 = vector.shape_cast %642 : vector<1x1x64x128xf32> to vector<64x128xf32>
    %cst_593 = arith.constant dense<0.000000e+00> : vector<1x128xf32>
    %644 = tpu.matmul %641, %643, %cst_593 {dimension_numbers = #tpu.dot_dimension_numbers<[1], [0], [0], [1], [0, 0, 1, 1], [], []>} : vector<1x64xf32>, vector<64x128xf32>, vector<1x128xf32> -> vector<1x128xf32>
    %645 = arith.addf %635, %644 : vector<1x128xf32>
    %646 = tpu.iota {dimensions = array<i32: 1>} : vector<1x3xi32>
    %c2_i32_594 = arith.constant 2 : i32
    %647 = vector.broadcast %c2_i32_594 : i32 to vector<1x3xi32>
    %648 = arith.cmpi eq, %646, %647 : vector<1x3xi32>
    %649 = arith.extui %648 : vector<1x3xi1> to vector<1x3xi32>
    %650 = arith.sitofp %649 : vector<1x3xi32> to vector<1x3xf32>
    %cst_595 = arith.constant dense<0.000000e+00> : vector<1x64xf32>
    %651 = tpu.matmul %650, %625, %cst_595 {dimension_numbers = #tpu.dot_dimension_numbers<[1], [0], [0], [1], [0, 0, 1, 1], [], []>} : vector<1x3xf32>, vector<3x64xf32>, vector<1x64xf32> -> vector<1x64xf32>
    %c1_596 = arith.constant 1 : index
    %c2_597 = arith.constant 2 : index
    %c0_598 = arith.constant 0 : index
    %c0_599 = arith.constant 0 : index
    %652 = vector.load %arg6[%c1_596, %c2_597, %c0_598, %c0_599] : memref<3x3x64x128xf32, #tpu.memory_space<vmem>>, vector<1x1x64x128xf32>
    %653 = vector.shape_cast %652 : vector<1x1x64x128xf32> to vector<64x128xf32>
    %cst_600 = arith.constant dense<0.000000e+00> : vector<1x128xf32>
    %654 = tpu.matmul %651, %653, %cst_600 {dimension_numbers = #tpu.dot_dimension_numbers<[1], [0], [0], [1], [0, 0, 1, 1], [], []>} : vector<1x64xf32>, vector<64x128xf32>, vector<1x128xf32> -> vector<1x128xf32>
    %655 = arith.addf %645, %654 : vector<1x128xf32>
    %c4_601 = arith.constant 4 : index
    %c0_602 = arith.constant 0 : index
    %c0_603 = arith.constant 0 : index
    %656 = vector.load %arg11[%c4_601, %c0_602, %c0_603] : memref<6x6x64xf32, #tpu.memory_space<vmem>>, vector<1x6x64xf32>
    %657 = vector.shape_cast %656 : vector<1x6x64xf32> to vector<6x64xf32>
    %c5_604 = arith.constant 5 : index
    %c0_605 = arith.constant 0 : index
    %c0_606 = arith.constant 0 : index
    %658 = vector.load %arg11[%c5_604, %c0_605, %c0_606] : memref<6x6x64xf32, #tpu.memory_space<vmem>>, vector<1x6x64xf32>
    %659 = vector.shape_cast %658 : vector<1x6x64xf32> to vector<6x64xf32>
    %660 = arith.maximumf %657, %659 : vector<6x64xf32>
    %cst_607 = arith.constant dense<0.000000e+00> : vector<3x64xf32>
    %661 = tpu.matmul %571, %660, %cst_607 {dimension_numbers = #tpu.dot_dimension_numbers<[1], [0], [0], [1], [0, 0, 1, 1], [], []>} : vector<3x6xf32>, vector<6x64xf32>, vector<3x64xf32> -> vector<3x64xf32>
    %cst_608 = arith.constant dense<0.000000e+00> : vector<3x64xf32>
    %662 = tpu.matmul %578, %660, %cst_608 {dimension_numbers = #tpu.dot_dimension_numbers<[1], [0], [0], [1], [0, 0, 1, 1], [], []>} : vector<3x6xf32>, vector<6x64xf32>, vector<3x64xf32> -> vector<3x64xf32>
    %663 = arith.maximumf %661, %662 : vector<3x64xf32>
    %664 = tpu.iota {dimensions = array<i32: 1>} : vector<1x3xi32>
    %c0_i32_609 = arith.constant 0 : i32
    %665 = vector.broadcast %c0_i32_609 : i32 to vector<1x3xi32>
    %666 = arith.cmpi eq, %664, %665 : vector<1x3xi32>
    %667 = arith.extui %666 : vector<1x3xi1> to vector<1x3xi32>
    %668 = arith.sitofp %667 : vector<1x3xi32> to vector<1x3xf32>
    %cst_610 = arith.constant dense<0.000000e+00> : vector<1x64xf32>
    %669 = tpu.matmul %668, %663, %cst_610 {dimension_numbers = #tpu.dot_dimension_numbers<[1], [0], [0], [1], [0, 0, 1, 1], [], []>} : vector<1x3xf32>, vector<3x64xf32>, vector<1x64xf32> -> vector<1x64xf32>
    %c2_611 = arith.constant 2 : index
    %c0_612 = arith.constant 0 : index
    %c0_613 = arith.constant 0 : index
    %c0_614 = arith.constant 0 : index
    %670 = vector.load %arg6[%c2_611, %c0_612, %c0_613, %c0_614] : memref<3x3x64x128xf32, #tpu.memory_space<vmem>>, vector<1x1x64x128xf32>
    %671 = vector.shape_cast %670 : vector<1x1x64x128xf32> to vector<64x128xf32>
    %cst_615 = arith.constant dense<0.000000e+00> : vector<1x128xf32>
    %672 = tpu.matmul %669, %671, %cst_615 {dimension_numbers = #tpu.dot_dimension_numbers<[1], [0], [0], [1], [0, 0, 1, 1], [], []>} : vector<1x64xf32>, vector<64x128xf32>, vector<1x128xf32> -> vector<1x128xf32>
    %673 = arith.addf %655, %672 : vector<1x128xf32>
    %674 = tpu.iota {dimensions = array<i32: 1>} : vector<1x3xi32>
    %c1_i32_616 = arith.constant 1 : i32
    %675 = vector.broadcast %c1_i32_616 : i32 to vector<1x3xi32>
    %676 = arith.cmpi eq, %674, %675 : vector<1x3xi32>
    %677 = arith.extui %676 : vector<1x3xi1> to vector<1x3xi32>
    %678 = arith.sitofp %677 : vector<1x3xi32> to vector<1x3xf32>
    %cst_617 = arith.constant dense<0.000000e+00> : vector<1x64xf32>
    %679 = tpu.matmul %678, %663, %cst_617 {dimension_numbers = #tpu.dot_dimension_numbers<[1], [0], [0], [1], [0, 0, 1, 1], [], []>} : vector<1x3xf32>, vector<3x64xf32>, vector<1x64xf32> -> vector<1x64xf32>
    %c2_618 = arith.constant 2 : index
    %c1_619 = arith.constant 1 : index
    %c0_620 = arith.constant 0 : index
    %c0_621 = arith.constant 0 : index
    %680 = vector.load %arg6[%c2_618, %c1_619, %c0_620, %c0_621] : memref<3x3x64x128xf32, #tpu.memory_space<vmem>>, vector<1x1x64x128xf32>
    %681 = vector.shape_cast %680 : vector<1x1x64x128xf32> to vector<64x128xf32>
    %cst_622 = arith.constant dense<0.000000e+00> : vector<1x128xf32>
    %682 = tpu.matmul %679, %681, %cst_622 {dimension_numbers = #tpu.dot_dimension_numbers<[1], [0], [0], [1], [0, 0, 1, 1], [], []>} : vector<1x64xf32>, vector<64x128xf32>, vector<1x128xf32> -> vector<1x128xf32>
    %683 = arith.addf %673, %682 : vector<1x128xf32>
    %684 = tpu.iota {dimensions = array<i32: 1>} : vector<1x3xi32>
    %c2_i32_623 = arith.constant 2 : i32
    %685 = vector.broadcast %c2_i32_623 : i32 to vector<1x3xi32>
    %686 = arith.cmpi eq, %684, %685 : vector<1x3xi32>
    %687 = arith.extui %686 : vector<1x3xi1> to vector<1x3xi32>
    %688 = arith.sitofp %687 : vector<1x3xi32> to vector<1x3xf32>
    %cst_624 = arith.constant dense<0.000000e+00> : vector<1x64xf32>
    %689 = tpu.matmul %688, %663, %cst_624 {dimension_numbers = #tpu.dot_dimension_numbers<[1], [0], [0], [1], [0, 0, 1, 1], [], []>} : vector<1x3xf32>, vector<3x64xf32>, vector<1x64xf32> -> vector<1x64xf32>
    %c2_625 = arith.constant 2 : index
    %c2_626 = arith.constant 2 : index
    %c0_627 = arith.constant 0 : index
    %c0_628 = arith.constant 0 : index
    %690 = vector.load %arg6[%c2_625, %c2_626, %c0_627, %c0_628] : memref<3x3x64x128xf32, #tpu.memory_space<vmem>>, vector<1x1x64x128xf32>
    %691 = vector.shape_cast %690 : vector<1x1x64x128xf32> to vector<64x128xf32>
    %cst_629 = arith.constant dense<0.000000e+00> : vector<1x128xf32>
    %692 = tpu.matmul %689, %691, %cst_629 {dimension_numbers = #tpu.dot_dimension_numbers<[1], [0], [0], [1], [0, 0, 1, 1], [], []>} : vector<1x64xf32>, vector<64x128xf32>, vector<1x128xf32> -> vector<1x128xf32>
    %693 = arith.addf %683, %692 : vector<1x128xf32>
    %c0_630 = arith.constant 0 : index
    %c0_631 = arith.constant 0 : index
    %c0_632 = arith.constant 0 : index
    %694 = vector.load %arg8[%c0_630, %c0_631, %c0_632] : memref<1x1x128xf32, #tpu.memory_space<vmem>>, vector<1x1x128xf32>
    %695 = vector.shape_cast %694 : vector<1x1x128xf32> to vector<1x128xf32>
    %696 = vector.shape_cast %693 : vector<1x128xf32> to vector<1x1x128xf32>
    tpu.vector_store %arg8[%c0_630, %c0_631, %c0_632], %696 {strides = array<i32>} : memref<1x1x128xf32, #tpu.memory_space<vmem>>, vector<1x1x128xf32>,
    return
  }
  func.func @transform_0(%arg0: i32) -> (i32, i32, i32, i32) {
    %c0_i32 = arith.constant 0 : i32
    %c0_i32_0 = arith.constant 0 : i32
    %c0_i32_1 = arith.constant 0 : i32
    %c0_i32_2 = arith.constant 0 : i32
    return %arg0, %c0_i32, %c0_i32_0, %c0_i32_1 : i32, i32, i32, i32
  }
  func.func @transform_1(%arg0: i32) -> (i32, i32, i32) {
    %c0_i32 = arith.constant 0 : i32
    %c0_i32_0 = arith.constant 0 : i32
    %c0_i32_1 = arith.constant 0 : i32
    %c0_i32_2 = arith.constant 0 : i32
    return %c0_i32, %c0_i32_0, %c0_i32_1 : i32, i32, i32
  }
  func.func @transform_2(%arg0: i32) -> (i32, i32) {
    %c0_i32 = arith.constant 0 : i32
    %c0_i32_0 = arith.constant 0 : i32
    %c0_i32_1 = arith.constant 0 : i32
    return %c0_i32, %c0_i32_0 : i32, i32
  }
  func.func @transform_3(%arg0: i32) -> (i32, i32, i32) {
    %c0_i32 = arith.constant 0 : i32
    %c0_i32_0 = arith.constant 0 : i32
    %c0_i32_1 = arith.constant 0 : i32
    %c0_i32_2 = arith.constant 0 : i32
    return %c0_i32, %c0_i32_0, %c0_i32_1 : i32, i32, i32
  }
  func.func @transform_4(%arg0: i32) -> (i32, i32) {
    %c0_i32 = arith.constant 0 : i32
    %c0_i32_0 = arith.constant 0 : i32
    %c0_i32_1 = arith.constant 0 : i32
    return %c0_i32, %c0_i32_0 : i32, i32
  }
  func.func @transform_5(%arg0: i32) -> (i32, i32, i32, i32) {
    %c0_i32 = arith.constant 0 : i32
    %c0_i32_0 = arith.constant 0 : i32
    %c0_i32_1 = arith.constant 0 : i32
    %c0_i32_2 = arith.constant 0 : i32
    %c0_i32_3 = arith.constant 0 : i32
    return %c0_i32, %c0_i32_0, %c0_i32_1, %c0_i32_2 : i32, i32, i32, i32
  }
  func.func @transform_6(%arg0: i32) -> (i32, i32) {
    %c0_i32 = arith.constant 0 : i32
    %c0_i32_0 = arith.constant 0 : i32
    %c0_i32_1 = arith.constant 0 : i32
    return %c0_i32, %c0_i32_0 : i32, i32
  }
  func.func @transform_7(%arg0: i32) -> (i32, i32, i32) {
    %c0_i32 = arith.constant 0 : i32
    %c0_i32_0 = arith.constant 0 : i32
    %c0_i32_1 = arith.constant 0 : i32
    return %arg0, %c0_i32, %c0_i32_0 : i32, i32, i32
  }
}

</mosaic_0001>

<bundles_post_ra>
// kernel: simple_cnn2layer_forward.1
= control target key start
LH: loop header
LB: loop body
LE: loop exit
PB: predicated region body
PF: predicated region fallthrough
CT: control target
= control target key end

     0   :  { %12 = vsyncpa [#allocation6], 0  ;;  %s20181_s0 = inlined_call_operand.vmem [shape: f32[2,9,9,3], index: 0, kind: input, shape index: {}]   ;;  %s20182_s1 = inlined_call_operand.vmem [shape: f32[4,3,128], index: 1, kind: input, shape index: {}]   ;;  %s20183_s2 = inlined_call_operand.vmem [shape: f32[1,128], index: 2, kind: input, shape index: {}]   ;;  %s20184_s3 = inlined_call_operand.vmem [shape: f32[4,128,64], index: 3, kind: input, shape index: {}]   ;;  %s20185_s4 = inlined_call_operand.vmem [shape: f32[1,64], index: 4, kind: input, shape index: {}]   ;;  %s20186_s5 = inlined_call_operand.vmem [shape: f32[3,3,64,128], index: 5, kind: input, shape index: {}]   ;;  %s20187_s6 = inlined_call_operand.vmem [shape: f32[1,128], index: 6, kind: input, shape index: {}]   ;;  %s20188_s7 = inlined_call_operand.hbm [shape: f32[2,1,128], index: 7, kind: output, shape index: {}]  }
   0x1   :  { %14 = vsyncpa [#allocation6 + $0x1], 0  ;;  %s17692_s24 = smov 0   ;;  %s17694_s25 = smov 0  }
   0x2   :  { %s17696_s26 = smov 0   ;;  %s17698_s27 = smov 0  }
   0x3 LB: > { %s17713_s28 = sadd.s32 4294967295, %s17645_s27   ;;  %s13163_s29 = sadd.s32 4294967294, %s17645_s27   ;;  %s17645_s27 = sphi %s17698_s27, %s20198_s27   ;;  %s17641_s26 = sphi %s17696_s26, %s20197_s26   ;;  %s17637_s25 = sphi %s17694_s25, %s20196_s25   ;;  %s17633_s24 = sphi %s17692_s24, %s20195_s24  }
   0x4   : > { %s17717_s30 = sadd.s32 1, %s17645_s27   ;;  %s179_s8 = sadd.s32 1, %s17641_s26 }
   0x5   : > { %s176_s9 = ssub.s32 %s17645_s27, %s17717_s30  ;;  %p189_p0 = scmp.ne.s32.totalorder %s17641_s26, %s17637_s25 }
   0x6   : > { %p177_p1 = scmp.eq.s32.totalorder %s176_s9, 0  ;;  %p190_p2 = scmp.eq.s32.totalorder %s17713_s28, 1 }
   0x7   : > { %p195_p3 = scmp.ne.s32.totalorder %s17637_s25, %s17633_s24  ;;  %p196_p4 = scmp.eq.s32.totalorder %s13163_s29, 1 }
   0x8   : > { %s17728_s10 = scalar_select %p177_p1, %s17641_s26, %s179_s8  }
   0x9   : > { %p17730_p5 = por %p190_p2, %p189_p0  ;;  %p17734_p6 = por %p196_p4, %p195_p3 }
   0xa   : > { %p13166_p7 = scmp.ge.s32.totalorder %s17645_s27, 1  ;;  %p240_p8 = scmp.lt.s32.totalorder %s17645_s27, 3 }
   0xc   : > { %p241_p9 = pnand %p13166_p7, %p240_p8 }
   0xd   : > { %v276_v0 = vlaneseq (!%p241_p9)  ;;  %p271_p10 = scmp.lt.s32.totalorder (!%p241_p9), %s17713_s28, 1  ;;  %v17647_v1 = vmov (!%p241_p9), 0.0   ;;  %vm298_vm0 = vcmask (!%p241_p9), 72704   ;;  %vm305_vm1 = vcmask (!%p241_p9), 1040384   ;;  %v13178_v41 = vld [vmem:[%s20182_s1 + $0x4] sm:$0x7] (!%p241_p9) }
   0xe   : > { %244 = sbr.rel (%p241_p9) target bundleno = 4567 (0x11d7), region = 48  ;;  %14799 = vmatprep.subr.mxu1 (!%p241_p9), %v17647_v1  ;;  %14794 = vmatprep.subr.mxu0 (!%p241_p9), %v17647_v1  ;;  %vm17648_vm5 = vmmov (!%p241_p9), 1   ;;  %vm475_vm8 = vcmask (!%p241_p9), 1042432   ;;  %v17984_v43 = vld [vmem:[%s20182_s1] sm:$0x7] (!%p241_p9)  ;;  %vm468_vm9 = vcmask (!%p241_p9), 23552  }
   0xf   : > { %14800 = vmatpush3.msra.mxu1 (!%p241_p9), %v17647_v1  ;;  %v17744_v2 = vshrl.u32 (!%p241_p9), %v276_v0, 7  ;;  %v17746_v3 = vand.u32 (!%p241_p9), 127, %v276_v0  ;;  %14795 = vmatpush3.msra.mxu0 (!%p241_p9), %v17647_v1  ;;  %vm17776_vm6 = vmpackc.low (!%p241_p9), %vm305_vm1, %vm17648_vm5  ;;  %v13188_v62 = vld [vmem:[%s20182_s1 + $0x8] sm:$0x7] (!%p241_p9)  ;;  %vm17650_vm10 = vmmov (!%p241_p9), 0   ;;  %vm6787_vm11 = vcmask (!%p241_p9), 1041408  }
  0x10   : > { %14804 = vmatprep.subr.msk.mxu0 (!%p241_p9), %vm475_vm8, %v13178_v41  ;;  %vm18544_vm12 = vmpackc.low (!%p241_p9), %vm6787_vm11, %vm17648_vm5  ;;  %vm6783_vm14 = vcmask (!%p241_p9), 80896   ;;  %vm7549_vm1 = vcmask (!%p241_p9), 1044480   ;;  %s17651_s29 = smov (!%p241_p9), [#allocation5]  }
  0x11   : > { %vm289_vm2 = vcmp.eq.s32.totalorder (!%p241_p9), %v17746_v3, %v17744_v2  ;;  %v278_v4 = vadd.s32 (!%p241_p9), 8, %v17744_v2  ;;  %v13168_v5 = vadd.s32 (!%p241_p9), 4294967295, %v17744_v2  ;;  %vm11396_vm5 = vcmp.eq.s32.totalorder (!%p241_p9), %v17746_v3, 0  ;;  %s17587_s8 = sshll.u32 (!%p241_p9), %s17651_s29, 4  ;;  %s17588_s8 = int_to_ptr.vmem [resolvable:$false] %s17587_s8 }
  0x12   : > { %v17755_v6 = vsel (!%p241_p9), %vm289_vm2, 1.0, %v17647_v1  ;;  %vm8194_vm2 = vcmask (!%p241_p9), 521216   ;;  %vm11717_vm11 = vcmp.eq.s32.totalorder (!%p241_p9), %v17746_v3, 2  ;;  %s17589_s9 = scalar_lea.vmem (!%p241_p9), %s17588_s8, 32 }
  0x13   : > { %14801 = vmatprep.mubr.msk.f32.mxu1 (!%p241_p9), %vm298_vm0, %v17755_v6  ;;  %vm290_vm3 = vcmp.eq.s32.totalorder (!%p241_p9), %v17746_v3, %v278_v4  ;;  %vm283_vm4 = vcmp.eq.s32.totalorder (!%p241_p9), %v17746_v3, %v13168_v5  ;;  %v13169_v7 = vadd.s32 (!%p241_p9), 4294967295, %v278_v4 }
  0x14   : > { %v17767_v8 = vsel (!%p241_p9), %vm290_vm3, 1.0, %v17647_v1  ;;  %v17770_v9 = vsel (!%p241_p9), %vm283_vm4, 1.0, %v17647_v1  ;;  %vm11249_vm3 = vcmask (!%p241_p9), 1045504   ;;  %vm11246_vm4 = vcmask (!%p241_p9), 48128  }
  0x15   : > { %s272_s13 = scalar_select %p271_p10, %s17713_s28, 1  ;;  %14802 = vmatmul.mubr.msk.f32.vlgmr.msra.gmra.mrb[0].mxu1 %vm298_vm0, %v17767_v8  ;;  %14796 = vmatprep.mubr.msk.f32.mxu0 %vm298_vm0, %v17770_v9  ;;  %vm284_vm7 = vcmp.eq.s32.totalorder %v17746_v3, %v13169_v7  ;;  %v13195_v7 = vld [vmem:[%s20182_s1 + $0xc] sm:$0x7] }
  0x16   : > { %v17786_v14 = vsel %vm284_vm7, 1.0, %v17647_v1  ;;  %14818 = vmatprep.mubr.msk.f32.mxu1 %vm298_vm0, %v17770_v9  ;;  %vm11558_vm7 = vcmp.eq.s32.totalorder %v17746_v3, 1 }
  0x17   : > { %s17538_s14 = smul.u32 144, %s272_s13  ;;  %14797 = vmatmul.mubr.msk.f32.vlgmr.msra.gmra.mrb[0].mxu0 %vm298_vm0, %v17786_v14 }
  0x18   : > { %14805 = vmatpush3.msk.msra.mxu0 %vm475_vm8, %v13178_v41 }
  0x19   : > { %s17764_s17 = scalar_lea.vmem %s20181_s0, %s17538_s14  ;;  %14809 = vmatprep.subr.msk.mxu0 %vm475_vm8, %v17984_v43  ;;  %s269_s14 = sand.u32 1, %s17637_s25  }
  0x1a   : > { %v296_v10 = vld [vmem:[%s17764_s17] sm:$0xff]  ;;  %v297_v11 = vld [vmem:[%s17764_s17 + $0x8] sm:$0x1]  ;;  %v13200_v17 = vld [vmem:[%s17764_s17 + $0x10] sm:$0xff]  ;;  %s270_s18 = scalar_lea.vmem [#allocation5], %s269_s14  ;;  %s13096_s23 = scalar_lea.sflag [#allocation6], %s269_s14 }
  0x1b   : > { %v16522_v13 = vpack.c.bf16 %v297_v11, %v296_v10  ;;  %v980_v15 = vld [vmem:[%s17764_s17 + $0x8] sm:$0x1]  ;;  %v13201_v18 = vld [vmem:[%s17764_s17 + $0x18] sm:$0x1]  ;;  %v13231_v22 = vld [vmem:[%s17764_s17 + $0x20] sm:$0xff]  ;;  %s13108_s19 = sshll.u32 %s270_s18, 4  ;;  %s20141_s19 = int_to_ptr.vmem [resolvable:$true] %s13108_s19 }
  0x1c   : > { %v16534_v16 = vpack.c.bf16 %v980_v15, %v296_v10  ;;  %v16546_v19 = vpack.c.bf16 %v13201_v18, %v13200_v17  ;;  %v13230_v20 = vld [vmem:[%s17764_s17 + $0x18] sm:$0x1]  ;;  %v13232_v23 = vld [vmem:[%s17764_s17 + $0x28] sm:$0x1]  ;;  %v13262_v27 = vld [vmem:[%s17764_s17 + $0x30] sm:$0xff]  ;;  %p17590_p0 = scmp.lt.s32.totalorder %s20141_s19, %s17588_s8 }
  0x1d   : > { %16524 = vmatprep.subr.msk.bf16.mxu1 %vm17776_vm6, %v16522_v13  ;;  %v16558_v21 = vpack.c.bf16 %v13230_v20, %v13200_v17  ;;  %v16570_v24 = vpack.c.bf16 %v13232_v23, %v13231_v22  ;;  %v13261_v25 = vld [vmem:[%s17764_s17 + $0x28] sm:$0x1]  ;;  %v13263_v28 = vld [vmem:[%s17764_s17 + $0x38] sm:$0x1]  ;;  %v13293_v32 = vld [vmem:[%s17764_s17 + $0x40] sm:$0xff] }
  0x1e   : > { %16527 = vmatpush3.bf16.msk.msra.mxu1 %vm17776_vm6, %v16522_v13  ;;  %v16582_v26 = vpack.c.bf16 %v13261_v25, %v13231_v22  ;;  %v16594_v29 = vpack.c.bf16 %v13263_v28, %v13262_v27  ;;  %v13292_v30 = vld [vmem:[%s17764_s17 + $0x38] sm:$0x1]  ;;  %v13294_v33 = vld [vmem:[%s17764_s17 + $0x48] sm:$0x1]  ;;  %v13324_v37 = vld [vmem:[%s17764_s17 + $0x50] sm:$0xff] }
  0x1f   : > { %16530 = vmatprep.subr.msk.bf16.mxu1 %vm17776_vm6, %v16522_v13  ;;  %v16606_v31 = vpack.c.bf16 %v13292_v30, %v13262_v27  ;;  %v16618_v34 = vpack.c.bf16 %v13294_v33, %v13293_v32  ;;  %v13323_v35 = vld [vmem:[%s17764_s17 + $0x48] sm:$0x1]  ;;  %v13325_v38 = vld [vmem:[%s17764_s17 + $0x58] sm:$0x1]  ;;  %v13355_v44 = vld [vmem:[%s17764_s17 + $0x60] sm:$0xff] }
  0x20   : > { %v16630_v36 = vpack.c.bf16 %v13323_v35, %v13293_v32  ;;  %v16642_v39 = vpack.c.bf16 %v13325_v38, %v13324_v37  ;;  %v13354_v40 = vld [vmem:[%s17764_s17 + $0x58] sm:$0x1]  ;;  %v13356_v45 = vld [vmem:[%s17764_s17 + $0x68] sm:$0x1]  ;;  %v13386_v49 = vld [vmem:[%s17764_s17 + $0x70] sm:$0xff] }
  0x21   : > { %14819 = vmatmul.mubr.msk.f32.vlgmr.msra.gmra.mrb[2].mxu1 %vm298_vm0, %v17786_v14  ;;  %v16654_v42 = vpack.c.bf16 %v13354_v40, %v13324_v37  ;;  %v16666_v46 = vpack.c.bf16 %v13356_v45, %v13355_v44  ;;  %v13385_v47 = vld [vmem:[%s17764_s17 + $0x68] sm:$0x1]  ;;  %v13387_v50 = vld [vmem:[%s17764_s17 + $0x78] sm:$0x1]  ;;  %v13417_v54 = vld [vmem:[%s17764_s17 + $0x80] sm:$0xff] }
  0x22   : > { %16533 = vmatpush3.bf16.msk.msra.mxu1 %vm17776_vm6, %v16522_v13  ;;  %14830 = vmatprep.mubr.msk.f32.mxu1 %vm298_vm0, %v17755_v6  ;;  %v16678_v48 = vpack.c.bf16 %v13385_v47, %v13355_v44  ;;  %v16690_v51 = vpack.c.bf16 %v13387_v50, %v13386_v49  ;;  %v13416_v52 = vld [vmem:[%s17764_s17 + $0x78] sm:$0x1]  ;;  %v13418_v55 = vld [vmem:[%s17764_s17 + $0x88] sm:$0x1]  ;;  %v13208_v13 = vld [vmem:[%s20182_s1 + $0x4] sm:$0x7] }
  0x23   : > { %16536 = vmatprep.subr.msk.bf16.mxu1 %vm17776_vm6, %v16534_v16  ;;  %v16702_v53 = vpack.c.bf16 %v13416_v52, %v13386_v49  ;;  %v16714_v56 = vpack.c.bf16 %v13418_v55, %v13417_v54  ;;  %v13447_v57 = vld [vmem:[%s17764_s17 + $0x88] sm:$0x1]  ;;  %v1062_v17 = vld [vmem:[%s20182_s1] sm:$0x7]  ;;  %v13225_v25 = vld [vmem:[%s20182_s1 + $0xc] sm:$0x7] }
  0x24   : > { %v16726_v58 = vpack.c.bf16 %v13447_v57, %v13417_v54  ;;  %v13218_v20 = vld [vmem:[%s20182_s1 + $0x8] sm:$0x7]  ;;  %v13239_v30 = vld [vmem:[%s20182_s1 + $0x4] sm:$0x7]  ;;  %v1724_v35 = vld [vmem:[%s20182_s1] sm:$0x7] }
  0x25   : > { %14831 = vmatmul.mubr.msk.f32.vlgmr.msra.gmra.mrb[4].mxu1 %vm298_vm0, %v17767_v8  ;;  %v13249_v38 = vld [vmem:[%s20182_s1 + $0x8] sm:$0x7]  ;;  %s13928_s17 = sshll.u32 %s17713_s28, 4  ;;  %s17583_s28 = scalar_lea.vmem %s20141_s19, 16 }
  0x26   : > { %16539 = vmatpush3.bf16.msk.msra.mxu1 %vm17776_vm6, %v16534_v16  ;;  %14842 = vmatprep.mubr.msk.f32.mxu1 %vm298_vm0, %v17770_v9  ;;  %s20139_s22 = scalar_lea.hbm %s20188_s7, %s13928_s17  ;;  %p17584_p11 = scmp.ne.s32.totalorder %s20141_s19, %s17583_s28 }
  0x27   : > { %16542 = vmatprep.subr.msk.bf16.mxu1 %vm17776_vm6, %v16534_v16  ;;  %p17591_p1 = scmp.lt.s32.totalorder %s17589_s9, %s17583_s28 }
  0x28   : > { %p17585_p12 = pnand %p17584_p11, %p17730_p5 }
  0x29   : > { %14843 = vmatmul.mubr.msk.f32.vlgmr.msra.gmra.mrb[6].mxu1 %vm298_vm0, %v17786_v14  ;;  %p17592_p2 = por %p17591_p1, %p17590_p0 }
  0x2a   : > { %16545 = vmatpush3.bf16.msk.msra.mxu1 %vm17776_vm6, %v16534_v16  ;;  %14849 = vmatprep.mubr.msk.f32.mxu1 %vm298_vm0, %v17755_v6  ;;  %p17586_p13 = pneg %p17585_p12 }
  0x2b   : > { %16548 = vmatprep.subr.msk.bf16.mxu1 %vm17776_vm6, %v16546_v19 }
  0x2c   : > { %p17593_p3 = pnand %p17592_p2, %p17586_p13 }
  0x2d   : > { %14850 = vmatmul.mubr.msk.f32.vlgmr.msra.gmra.mrb[8].mxu1 %vm298_vm0, %v17767_v8 }
  0x2e   : > { %16551 = vmatpush3.bf16.msk.msra.mxu1 %vm17776_vm6, %v16546_v19  ;;  %14866 = vmatprep.mubr.msk.f32.mxu1 %vm298_vm0, %v17770_v9 }
  0x2f   : > { %16554 = vmatprep.subr.msk.bf16.mxu1 %vm17776_vm6, %v16546_v19 }
  0x31   : > { %14867 = vmatmul.mubr.msk.f32.vlgmr.msra.gmra.mrb[10].mxu1 %vm298_vm0, %v17786_v14 }
  0x32   : > { %16557 = vmatpush3.bf16.msk.msra.mxu1 %vm17776_vm6, %v16546_v19  ;;  %14878 = vmatprep.mubr.msk.f32.mxu1 %vm298_vm0, %v17755_v6 }
  0x33   : > { %16560 = vmatprep.subr.msk.bf16.mxu1 %vm17776_vm6, %v16558_v21 }
  0x35   : > { %14879 = vmatmul.mubr.msk.f32.vlgmr.msra.gmra.mrb[12].mxu1 %vm298_vm0, %v17767_v8 }
  0x36   : > { %16563 = vmatpush3.bf16.msk.msra.mxu1 %vm17776_vm6, %v16558_v21  ;;  %14890 = vmatprep.mubr.msk.f32.mxu1 %vm298_vm0, %v17770_v9 }
  0x37   : > { %16566 = vmatprep.subr.msk.bf16.mxu1 %vm17776_vm6, %v16558_v21 }
  0x39   : > { %14891 = vmatmul.mubr.msk.f32.vlgmr.msra.gmra.mrb[14].mxu1 %vm298_vm0, %v17786_v14 }
  0x3a   : > { %16569 = vmatpush3.bf16.msk.msra.mxu1 %vm17776_vm6, %v16558_v21  ;;  %14897 = vmatprep.mubr.msk.f32.mxu1 %vm298_vm0, %v17755_v6 }
  0x3b   : > { %16572 = vmatprep.subr.msk.bf16.mxu1 %vm17776_vm6, %v16570_v24 }
  0x3d   : > { %14898 = vmatmul.mubr.msk.f32.vlgmr.msra.gmra.mrb[16].mxu1 %vm298_vm0, %v17767_v8 }
  0x3e   : > { %16575 = vmatpush3.bf16.msk.msra.mxu1 %vm17776_vm6, %v16570_v24  ;;  %14914 = vmatprep.mubr.msk.f32.mxu1 %vm298_vm0, %v17770_v9 }
  0x3f   : > { %16578 = vmatprep.subr.msk.bf16.mxu1 %vm17776_vm6, %v16570_v24 }
  0x41   : > { %14915 = vmatmul.mubr.msk.f32.vlgmr.msra.gmra.mrb[18].mxu1 %vm298_vm0, %v17786_v14 }
  0x42   : > { %16581 = vmatpush3.bf16.msk.msra.mxu1 %vm17776_vm6, %v16570_v24  ;;  %14926 = vmatprep.mubr.msk.f32.mxu1 %vm298_vm0, %v17755_v6 }
  0x43   : > { %16584 = vmatprep.subr.msk.bf16.mxu1 %vm17776_vm6, %v16582_v26 }
  0x45   : > { %14927 = vmatmul.mubr.msk.f32.vlgmr.msra.gmra.mrb[20].mxu1 %vm298_vm0, %v17767_v8 }
  0x46   : > { %16587 = vmatpush3.bf16.msk.msra.mxu1 %vm17776_vm6, %v16582_v26  ;;  %14938 = vmatprep.mubr.msk.f32.mxu1 %vm298_vm0, %v17770_v9 }
  0x47   : > { %16590 = vmatprep.subr.msk.bf16.mxu1 %vm17776_vm6, %v16582_v26 }
  0x49   : > { %14939 = vmatmul.mubr.msk.f32.vlgmr.msra.gmra.mrb[22].mxu1 %vm298_vm0, %v17786_v14 }
  0x4a   : > { %16593 = vmatpush3.bf16.msk.msra.mxu1 %vm17776_vm6, %v16582_v26  ;;  %14945 = vmatprep.mubr.msk.f32.mxu1 %vm298_vm0, %v17755_v6 }
  0x4b   : > { %16596 = vmatprep.subr.msk.bf16.mxu1 %vm17776_vm6, %v16594_v29 }
  0x4d   : > { %14946 = vmatmul.mubr.msk.f32.vlgmr.msra.gmra.mrb[24].mxu1 %vm298_vm0, %v17767_v8 }
  0x4e   : > { %16599 = vmatpush3.bf16.msk.msra.mxu1 %vm17776_vm6, %v16594_v29  ;;  %14962 = vmatprep.mubr.msk.f32.mxu1 %vm298_vm0, %v17770_v9 }
  0x4f   : > { %16602 = vmatprep.subr.msk.bf16.mxu1 %vm17776_vm6, %v16594_v29 }
  0x51   : > { %14963 = vmatmul.mubr.msk.f32.vlgmr.msra.gmra.mrb[26].mxu1 %vm298_vm0, %v17786_v14 }
  0x52   : > { %16605 = vmatpush3.bf16.msk.msra.mxu1 %vm17776_vm6, %v16594_v29  ;;  %14974 = vmatprep.mubr.msk.f32.mxu1 %vm298_vm0, %v17755_v6 }
  0x53   : > { %16608 = vmatprep.subr.msk.bf16.mxu1 %vm17776_vm6, %v16606_v31 }
  0x55   : > { %14975 = vmatmul.mubr.msk.f32.vlgmr.msra.gmra.mrb[28].mxu1 %vm298_vm0, %v17767_v8 }
  0x56   : > { %16611 = vmatpush3.bf16.msk.msra.mxu1 %vm17776_vm6, %v16606_v31  ;;  %14986 = vmatprep.mubr.msk.f32.mxu1 %vm298_vm0, %v17770_v9 }
  0x57   : > { %16614 = vmatprep.subr.msk.bf16.mxu1 %vm17776_vm6, %v16606_v31 }
  0x59   : > { %14987 = vmatmul.mubr.msk.f32.vlgmr.msra.gmra.mrb[30].mxu1 %vm298_vm0, %v17786_v14 }
  0x5a   : > { %16617 = vmatpush3.bf16.msk.msra.mxu1 %vm17776_vm6, %v16606_v31  ;;  %14993 = vmatprep.mubr.msk.f32.mxu1 %vm298_vm0, %v17755_v6 }
  0x5b   : > { %16620 = vmatprep.subr.msk.bf16.mxu1 %vm17776_vm6, %v16618_v34 }
  0x5d   : > { %14994 = vmatmul.mubr.msk.f32.vlgmr.msra.gmra.mrb[32].mxu1 %vm298_vm0, %v17767_v8 }
  0x5e   : > { %16623 = vmatpush3.bf16.msk.msra.mxu1 %vm17776_vm6, %v16618_v34  ;;  %15010 = vmatprep.mubr.msk.f32.mxu1 %vm298_vm0, %v17770_v9 }
  0x5f   : > { %16626 = vmatprep.subr.msk.bf16.mxu1 %vm17776_vm6, %v16618_v34 }
  0x61   : > { %15011 = vmatmul.mubr.msk.f32.vlgmr.msra.gmra.mrb[34].mxu1 %vm298_vm0, %v17786_v14 }
  0x62   : > { %16629 = vmatpush3.bf16.msk.msra.mxu1 %vm17776_vm6, %v16618_v34  ;;  %15022 = vmatprep.mubr.msk.f32.mxu1 %vm298_vm0, %v17755_v6 }
  0x63   : > { %16632 = vmatprep.subr.msk.bf16.mxu1 %vm17776_vm6, %v16630_v36 }
  0x65   : > { %15023 = vmatmul.mubr.msk.f32.vlgmr.msra.gmra.mrb[36].mxu1 %vm298_vm0, %v17767_v8 }
  0x66   : > { %16635 = vmatpush3.bf16.msk.msra.mxu1 %vm17776_vm6, %v16630_v36  ;;  %15034 = vmatprep.mubr.msk.f32.mxu1 %vm298_vm0, %v17770_v9 }
  0x67   : > { %16638 = vmatprep.subr.msk.bf16.mxu1 %vm17776_vm6, %v16630_v36 }
  0x69   : > { %15035 = vmatmul.mubr.msk.f32.vlgmr.msra.gmra.mrb[38].mxu1 %vm298_vm0, %v17786_v14 }
  0x6a   : > { %16641 = vmatpush3.bf16.msk.msra.mxu1 %vm17776_vm6, %v16630_v36  ;;  %15041 = vmatprep.mubr.msk.f32.mxu1 %vm298_vm0, %v17755_v6 }
  0x6b   : > { %16644 = vmatprep.subr.msk.bf16.mxu1 %vm17776_vm6, %v16642_v39 }
  0x6d   : > { %15042 = vmatmul.mubr.msk.f32.vlgmr.msra.gmra.mrb[40].mxu1 %vm298_vm0, %v17767_v8 }
  0x6e   : > { %16647 = vmatpush3.bf16.msk.msra.mxu1 %vm17776_vm6, %v16642_v39  ;;  %15058 = vmatprep.mubr.msk.f32.mxu1 %vm298_vm0, %v17770_v9 }
  0x6f   : > { %16650 = vmatprep.subr.msk.bf16.mxu1 %vm17776_vm6, %v16642_v39 }
  0x71   : > { %15059 = vmatmul.mubr.msk.f32.vlgmr.msra.gmra.mrb[42].mxu1 %vm298_vm0, %v17786_v14 }
  0x72   : > { %16653 = vmatpush3.bf16.msk.msra.mxu1 %vm17776_vm6, %v16642_v39  ;;  %15070 = vmatprep.mubr.msk.f32.mxu1 %vm298_vm0, %v17755_v6 }
  0x73   : > { %16656 = vmatprep.subr.msk.bf16.mxu1 %vm17776_vm6, %v16654_v42 }
  0x75   : > { %15071 = vmatmul.mubr.msk.f32.vlgmr.msra.gmra.mrb[44].mxu1 %vm298_vm0, %v17767_v8 }
  0x76   : > { %16659 = vmatpush3.bf16.msk.msra.mxu1 %vm17776_vm6, %v16654_v42  ;;  %15082 = vmatprep.mubr.msk.f32.mxu1 %vm298_vm0, %v17770_v9 }
  0x77   : > { %16662 = vmatprep.subr.msk.bf16.mxu1 %vm17776_vm6, %v16654_v42 }
  0x79   : > { %15083 = vmatmul.mubr.msk.f32.vlgmr.msra.gmra.mrb[46].mxu1 %vm298_vm0, %v17786_v14 }
  0x7a   : > { %16665 = vmatpush3.bf16.msk.msra.mxu1 %vm17776_vm6, %v16654_v42  ;;  %15089 = vmatprep.mubr.msk.f32.mxu1 %vm298_vm0, %v17755_v6 }
  0x7b   : > { %16668 = vmatprep.subr.msk.bf16.mxu1 %vm17776_vm6, %v16666_v46 }
  0x7d   : > { %15090 = vmatmul.mubr.msk.f32.vlgmr.msra.gmra.mrb[48].mxu1 %vm298_vm0, %v17767_v8 }
  0x7e   : > { %16671 = vmatpush3.bf16.msk.msra.mxu1 %vm17776_vm6, %v16666_v46  ;;  %15106 = vmatprep.mubr.msk.f32.mxu1 %vm298_vm0, %v17770_v9 }
  0x7f   : > { %16674 = vmatprep.subr.msk.bf16.mxu1 %vm17776_vm6, %v16666_v46 }
  0x81   : > { %15107 = vmatmul.mubr.msk.f32.vlgmr.msra.gmra.mrb[50].mxu1 %vm298_vm0, %v17786_v14 }
  0x82   : > { %16677 = vmatpush3.bf16.msk.msra.mxu1 %vm17776_vm6, %v16666_v46  ;;  %15118 = vmatprep.mubr.msk.f32.mxu1 %vm298_vm0, %v17755_v6 }
  0x83   : > { %16680 = vmatprep.subr.msk.bf16.mxu1 %vm17776_vm6, %v16678_v48 }
  0x85   : > { %15119 = vmatmul.mubr.msk.f32.vlgmr.msra.gmra.mrb[52].mxu1 %vm298_vm0, %v17767_v8 }
  0x86   : > { %16683 = vmatpush3.bf16.msk.msra.mxu1 %vm17776_vm6, %v16678_v48  ;;  %15130 = vmatprep.mubr.msk.f32.mxu1 %vm298_vm0, %v17770_v9 }
  0x87   : > { %16686 = vmatprep.subr.msk.bf16.mxu1 %vm17776_vm6, %v16678_v48 }
  0x89   : > { %15131 = vmatmul.mubr.msk.f32.vlgmr.msra.gmra.mrb[54].mxu1 %vm298_vm0, %v17786_v14 }
  0x8a   : > { %16689 = vmatpush3.bf16.msk.msra.mxu1 %vm17776_vm6, %v16678_v48  ;;  %15137 = vmatprep.mubr.msk.f32.mxu1 %vm298_vm0, %v17755_v6  ;;  %v13270_v48 = vld [vmem:[%s20182_s1 + $0x4] sm:$0x7] }
  0x8b   : > { %16692 = vmatprep.subr.msk.bf16.mxu1 %vm17776_vm6, %v16690_v51 }
  0x8d   : > { %15138 = vmatmul.mubr.msk.f32.vlgmr.msra.gmra.mrb[56].mxu1 %vm298_vm0, %v17767_v8 }
  0x8e   : > { %16695 = vmatpush3.bf16.msk.msra.mxu1 %vm17776_vm6, %v16690_v51  ;;  %15154 = vmatprep.mubr.msk.f32.mxu1 %vm298_vm0, %v17770_v9 }
  0x8f   : > { %16698 = vmatprep.subr.msk.bf16.mxu1 %vm17776_vm6, %v16690_v51 }
  0x91   : > { %15155 = vmatmul.mubr.msk.f32.vlgmr.msra.gmra.mrb[58].mxu1 %vm298_vm0, %v17786_v14 }
  0x92   : > { %16701 = vmatpush3.bf16.msk.msra.mxu1 %vm17776_vm6, %v16690_v51  ;;  %15166 = vmatprep.mubr.msk.f32.mxu1 %vm298_vm0, %v17755_v6 }
  0x93   : > { %16704 = vmatprep.subr.msk.bf16.mxu1 %vm17776_vm6, %v16702_v53 }
  0x95   : > { %15167 = vmatmul.mubr.msk.f32.vlgmr.msra.gmra.mrb[60].mxu1 %vm298_vm0, %v17767_v8 }
  0x96   : > { %16707 = vmatpush3.bf16.msk.msra.mxu1 %vm17776_vm6, %v16702_v53  ;;  %15178 = vmatprep.mubr.msk.f32.mxu1 %vm298_vm0, %v17770_v9 }
  0x97   : > { %16710 = vmatprep.subr.msk.bf16.mxu1 %vm17776_vm6, %v16702_v53 }
  0x99   : > { %15179 = vmatmul.mubr.msk.f32.vlgmr.msra.gmra.mrb[62].mxu1 %vm298_vm0, %v17786_v14 }
  0x9a   : > { %16713 = vmatpush3.bf16.msk.msra.mxu1 %vm17776_vm6, %v16702_v53  ;;  %15185 = vmatprep.mubr.msk.f32.mxu1 %vm298_vm0, %v17755_v6  ;;  %v2386_v53 = vld [vmem:[%s20182_s1] sm:$0x7] }
  0x9b   : > { %16716 = vmatprep.subr.msk.bf16.mxu1 %vm17776_vm6, %v16714_v56 }
  0x9d   : > { %15186 = vmatmul.mubr.msk.f32.vlgmr.msra.gmra.mrb[64].mxu1 %vm298_vm0, %v17767_v8 }
  0x9e   : > { %16719 = vmatpush3.bf16.msk.msra.mxu1 %vm17776_vm6, %v16714_v56  ;;  %15202 = vmatprep.mubr.msk.f32.mxu1 %vm298_vm0, %v17770_v9 }
  0x9f   : > { %16722 = vmatprep.subr.msk.bf16.mxu1 %vm17776_vm6, %v16714_v56 }
  0xa1   : > { %15203 = vmatmul.mubr.msk.f32.vlgmr.msra.gmra.mrb[66].mxu1 %vm298_vm0, %v17786_v14 }
  0xa2   : > { %16725 = vmatpush3.bf16.msk.msra.mxu1 %vm17776_vm6, %v16714_v56  ;;  %15214 = vmatprep.mubr.msk.f32.mxu1 %vm298_vm0, %v17755_v6  ;;  %v13280_v56 = vld [vmem:[%s20182_s1 + $0x8] sm:$0x7] }
  0xa3   : > { %16728 = vmatprep.subr.msk.bf16.mxu1 %vm17776_vm6, %v16726_v58 }
  0xa5   : > { %15215 = vmatmul.mubr.msk.f32.vlgmr.msra.gmra.mrb[68].mxu1 %vm298_vm0, %v17767_v8 }
  0xa6   : > { %16731 = vmatpush3.bf16.msk.msra.mxu1 %vm17776_vm6, %v16726_v58  ;;  %15226 = vmatprep.mubr.msk.f32.mxu1 %vm298_vm0, %v17770_v9 }
  0xa7   : > { %16734 = vmatprep.subr.msk.bf16.mxu1 %vm17776_vm6, %v16726_v58 }
  0xa9   : > { %15227 = vmatmul.mubr.msk.f32.vlgmr.msra.gmra.mrb[70].mxu1 %vm298_vm0, %v17786_v14 }
  0xaa   : > { %16737 = vmatpush3.bf16.msk.msra.mxu1 %vm17776_vm6, %v16726_v58  ;;  %15233 = vmatprep.mubr.msk.f32.mxu1 %vm298_vm0, %v17755_v6  ;;  %vm11483_vm6 = vcmask 523264  }
  0xad   : > { %15234 = vmatmul.mubr.msk.f32.vlgmr.msra.gmra.mrb[72].mxu1 %vm298_vm0, %v17767_v8  ;;  %vm7546_vm0 = vcmask 39936  }
  0xae   : > { %15260 = vmatprep.mubr.msk.f32.mxu1 %vm17650_vm10, %v17647_v1 }
  0xe8   : > { %v18115_v59 = vpop.f32.mrb[0].mxu1 }
  0xe9   : > { %v18117_v60 = vpop.f32.mrb[1].mxu1 }
  0xea   : > { %14806 = vmatprep.mubr.msk.f32.mxu0 %vm468_vm9, %v18117_v60  ;;  %v18121_v61 = vpop.f32.mrb[0].mxu0 }
  0xeb   : > { %14807 = vmatmul.mubr.msk.f32.vlgmr.msra.gmra.mrb[2].mxu0 %vm468_vm9, %v18115_v59  ;;  %v18128_v63 = vpop.f32.mrb[1].mxu0 }
  0xec   : > { %14810 = vmatpush3.msk.msra.mxu0 %vm475_vm8, %v17984_v43  ;;  %14811 = vmatprep.mubr.msk.f32.mxu0 %vm468_vm9, %v18128_v63  ;;  %v13256_v43 = vld [vmem:[%s20182_s1 + $0xc] sm:$0x7] }
  0xed   : > { %14821 = vmatprep.subr.msk.mxu0 %vm475_vm8, %v13188_v62 }
  0xf3   : > { %14812 = vmatmul.mubr.msk.f32.vlgmr.msra.gmra.mrb[2].mxu0 %vm468_vm9, %v18121_v61 }
  0xf4   : > { %v14820_v0 = vpop.f32.mrb[2].mxu1  ;;  %14822 = vmatpush3.msk.msra.mxu0 %vm475_vm8, %v13188_v62 }
  0xf5   : > { %v707_v4 = vpop.f32.mrb[3].mxu1  ;;  %14833 = vmatprep.subr.msk.mxu0 %vm475_vm8, %v13195_v7 }
  0xf6   : > { %14823 = vmatprep.mubr.msk.f32.mxu0 %vm468_vm9, %v707_v4  ;;  %v13287_v4 = vld [vmem:[%s20182_s1 + $0xc] sm:$0x7] }
  0xf8   : > { %v14832_v5 = vpop.f32.mrb[4].mxu1 }
  0xf9   : > { %v870_v8 = vpop.f32.mrb[5].mxu1 }
  0xfb   : > { %14824 = vmatmul.mubr.msk.f32.vlgmr.msra.gmra.mrb[2].mxu0 %vm468_vm9, %v14820_v0 }
  0xfc   : > { %v14844_v10 = vpop.f32.mrb[6].mxu1  ;;  %14835 = vmatprep.mubr.msk.f32.mxu0 %vm468_vm9, %v870_v8  ;;  %14834 = vmatpush3.msk.msra.mxu0 %vm475_vm8, %v13195_v7 }
  0xfd   : > { %v1053_v11 = vpop.f32.mrb[7].mxu1  ;;  %14852 = vmatprep.subr.msk.mxu0 %vm475_vm8, %v13208_v13 }
 0x100   : > { %v14851_v12 = vpop.f32.mrb[8].mxu1 }
 0x101   : > { %v1129_v14 = vpop.f32.mrb[9].mxu1 }
 0x103   : > { %14836 = vmatmul.mubr.msk.f32.vlgmr.msra.gmra.mrb[2].mxu0 %vm468_vm9, %v14832_v5 }
 0x104   : > { %v14868_v15 = vpop.f32.mrb[10].mxu1  ;;  %14854 = vmatprep.mubr.msk.f32.mxu0 %vm468_vm9, %v1129_v14  ;;  %14853 = vmatpush3.msk.msra.mxu0 %vm475_vm8, %v13208_v13 }
 0x105   : > { %v1376_v16 = vpop.f32.mrb[11].mxu1  ;;  %14857 = vmatprep.subr.msk.mxu0 %vm475_vm8, %v1062_v17 }
 0x107   : > { %14855 = vmatmul.mubr.msk.f32.vlgmr.msra.gmra.mrb[4].mxu0 %vm468_vm9, %v14851_v12 }
 0x108   : > { %v14880_v18 = vpop.f32.mrb[12].mxu1  ;;  %14859 = vmatprep.mubr.msk.f32.mxu0 %vm468_vm9, %v1053_v11  ;;  %14858 = vmatpush3.msk.msra.mxu0 %vm475_vm8, %v1062_v17  ;;  %v13301_v11 = vld [vmem:[%s20182_s1 + $0x4] sm:$0x7] }
 0x109   : > { %v1538_v19 = vpop.f32.mrb[13].mxu1  ;;  %14869 = vmatprep.subr.msk.mxu0 %vm475_vm8, %v13218_v20 }
 0x10c   : > { %v14892_v21 = vpop.f32.mrb[14].mxu1 }
 0x10d   : > { %v1715_v22 = vpop.f32.mrb[15].mxu1 }
 0x10f   : > { %14860 = vmatmul.mubr.msk.f32.vlgmr.msra.gmra.mrb[4].mxu0 %vm468_vm9, %v14844_v10 }
 0x110   : > { %v14899_v23 = vpop.f32.mrb[16].mxu1  ;;  %14870 = vmatpush3.msk.msra.mxu0 %vm475_vm8, %v13218_v20  ;;  %14871 = vmatprep.mubr.msk.f32.mxu0 %vm468_vm9, %v1376_v16  ;;  %v3048_v16 = vld [vmem:[%s20182_s1] sm:$0x7] }
 0x111   : > { %v1791_v24 = vpop.f32.mrb[17].mxu1  ;;  %14881 = vmatprep.subr.msk.mxu0 %vm475_vm8, %v13225_v25 }
 0x114   : > { %v14916_v26 = vpop.f32.mrb[18].mxu1 }
 0x115   : > { %v2038_v27 = vpop.f32.mrb[19].mxu1 }
 0x117   : > { %14872 = vmatmul.mubr.msk.f32.vlgmr.msra.gmra.mrb[4].mxu0 %vm468_vm9, %v14868_v15 }
 0x118   : > { %v14928_v28 = vpop.f32.mrb[20].mxu1  ;;  %14883 = vmatprep.mubr.msk.f32.mxu0 %vm468_vm9, %v1538_v19  ;;  %14882 = vmatpush3.msk.msra.mxu0 %vm475_vm8, %v13225_v25  ;;  %v13311_v19 = vld [vmem:[%s20182_s1 + $0x8] sm:$0x7] }
 0x119   : > { %v2200_v29 = vpop.f32.mrb[21].mxu1  ;;  %14900 = vmatprep.subr.msk.mxu0 %vm475_vm8, %v13239_v30 }
 0x11c   : > { %v14940_v31 = vpop.f32.mrb[22].mxu1 }
 0x11d   : > { %v2377_v32 = vpop.f32.mrb[23].mxu1 }
 0x11f   : > { %14884 = vmatmul.mubr.msk.f32.vlgmr.msra.gmra.mrb[4].mxu0 %vm468_vm9, %v14880_v18 }
 0x120   : > { %v14947_v33 = vpop.f32.mrb[24].mxu1  ;;  %14902 = vmatprep.mubr.msk.f32.mxu0 %vm468_vm9, %v1791_v24  ;;  %14901 = vmatpush3.msk.msra.mxu0 %vm475_vm8, %v13239_v30  ;;  %v13318_v24 = vld [vmem:[%s20182_s1 + $0xc] sm:$0x7] }
 0x121   : > { %v2453_v34 = vpop.f32.mrb[25].mxu1  ;;  %14905 = vmatprep.subr.msk.mxu0 %vm475_vm8, %v1724_v35 }
 0x123   : > { %14903 = vmatmul.mubr.msk.f32.vlgmr.msra.gmra.mrb[6].mxu0 %vm468_vm9, %v14899_v23 }
 0x124   : > { %v14964_v36 = vpop.f32.mrb[26].mxu1  ;;  %14907 = vmatprep.mubr.msk.f32.mxu0 %vm468_vm9, %v1715_v22  ;;  %14906 = vmatpush3.msk.msra.mxu0 %vm475_vm8, %v1724_v35 }
 0x125   : > { %v2700_v37 = vpop.f32.mrb[27].mxu1  ;;  %14917 = vmatprep.subr.msk.mxu0 %vm475_vm8, %v13249_v38 }
 0x128   : > { %v14976_v39 = vpop.f32.mrb[28].mxu1 }
 0x129   : > { %v2862_v40 = vpop.f32.mrb[29].mxu1 }
 0x12b   : > { %14908 = vmatmul.mubr.msk.f32.vlgmr.msra.gmra.mrb[6].mxu0 %vm468_vm9, %v14892_v21 }
 0x12c   : > { %v18192_v41 = vpop.f32.mrb[30].mxu1  ;;  %14918 = vmatpush3.msk.msra.mxu0 %vm475_vm8, %v13249_v38  ;;  %14919 = vmatprep.mubr.msk.f32.mxu0 %vm468_vm9, %v2038_v27 }
 0x12d   : > { %v18194_v42 = vpop.f32.mrb[31].mxu1  ;;  %14929 = vmatprep.subr.msk.mxu0 %vm475_vm8, %v13256_v43 }
 0x130   : > { %v14995_v44 = vpop.f32.mrb[32].mxu1 }
 0x131   : > { %v3115_v45 = vpop.f32.mrb[33].mxu1 }
 0x133   : > { %14920 = vmatmul.mubr.msk.f32.vlgmr.msra.gmra.mrb[6].mxu0 %vm468_vm9, %v14916_v26 }
 0x134   : > { %v18203_v46 = vpop.f32.mrb[34].mxu1  ;;  %14931 = vmatprep.mubr.msk.f32.mxu0 %vm468_vm9, %v2200_v29  ;;  %14930 = vmatpush3.msk.msra.mxu0 %vm475_vm8, %v13256_v43  ;;  %v13332_v29 = vld [vmem:[%s20182_s1 + $0x4] sm:$0x7]  ;;  %v17649_v43 = vmov 0.0|0.0  }
 0x135   : > { %v18205_v47 = vpop.f32.mrb[35].mxu1  ;;  %14948 = vmatprep.subr.msk.mxu0 %vm475_vm8, %v13270_v48  ;;  %16738 = vmatprep.subr.bf16.mxu1 %v17649_v43 }
 0x138   : > { %v18210_v49 = vpop.f32.mrb[36].mxu1 }
 0x139   : > { %v18213_v50 = vpop.f32.mrb[37].mxu1 }
 0x13b   : > { %14932 = vmatmul.mubr.msk.f32.vlgmr.msra.gmra.mrb[6].mxu0 %vm468_vm9, %v14928_v28 }
 0x13c   : > { %v18218_v51 = vpop.f32.mrb[38].mxu1  ;;  %14950 = vmatprep.mubr.msk.f32.mxu0 %vm468_vm9, %v2453_v34  ;;  %14949 = vmatpush3.msk.msra.mxu0 %vm475_vm8, %v13270_v48  ;;  %v3710_v34 = vld [vmem:[%s20182_s1] sm:$0x7]  ;;  %v13394_v48 = vld [vmem:[%s20182_s1 + $0x4] sm:$0x7] }
 0x13d   : > { %v18220_v52 = vpop.f32.mrb[39].mxu1  ;;  %14953 = vmatprep.subr.msk.mxu0 %vm475_vm8, %v2386_v53 }
 0x13f   : > { %14951 = vmatmul.mubr.msk.f32.vlgmr.msra.gmra.mrb[8].mxu0 %vm468_vm9, %v14947_v33 }
 0x140   : > { %v18225_v54 = vpop.f32.mrb[40].mxu1  ;;  %14955 = vmatprep.mubr.msk.f32.mxu0 %vm468_vm9, %v2377_v32  ;;  %14954 = vmatpush3.msk.msra.mxu0 %vm475_vm8, %v2386_v53  ;;  %v5696_v53 = vld [vmem:[%s20182_s1] sm:$0x7] }
 0x141   : > { %v18228_v55 = vpop.f32.mrb[41].mxu1  ;;  %14965 = vmatprep.subr.msk.mxu0 %vm475_vm8, %v13280_v56 }
 0x144   : > { %v18236_v57 = vpop.f32.mrb[42].mxu1 }
 0x145   : > { %v18239_v58 = vpop.f32.mrb[43].mxu1 }
 0x147   : > { %14956 = vmatmul.mubr.msk.f32.vlgmr.msra.gmra.mrb[8].mxu0 %vm468_vm9, %v14940_v31 }
 0x148   : > { %v18244_v62 = vpop.f32.mrb[44].mxu1  ;;  %14966 = vmatpush3.msk.msra.mxu0 %vm475_vm8, %v13280_v56  ;;  %14967 = vmatprep.mubr.msk.f32.mxu0 %vm468_vm9, %v2700_v37  ;;  %v13342_v37 = vld [vmem:[%s20182_s1 + $0x8] sm:$0x7]  ;;  %v18488_v56 = vld [vmem:[%s20183_s2] ss:$0 sm:$0xff] }
 0x149   : > { %v18246_v0 = vpop.f32.mrb[45].mxu1  ;;  %14977 = vmatprep.subr.msk.mxu0 %vm475_vm8, %v13287_v4 }
 0x14c   : > { %v18251_v5 = vpop.f32.mrb[46].mxu1 }
 0x14d   : > { %v18254_v7 = vpop.f32.mrb[47].mxu1 }
 0x14f   : > { %14968 = vmatmul.mubr.msk.f32.vlgmr.msra.gmra.mrb[8].mxu0 %vm468_vm9, %v14964_v36 }
 0x150   : > { %v18259_v8 = vpop.f32.mrb[48].mxu1  ;;  %14979 = vmatprep.mubr.msk.f32.mxu0 %vm468_vm9, %v2862_v40  ;;  %14978 = vmatpush3.msk.msra.mxu0 %vm475_vm8, %v13287_v4 }
 0x151   : > { %v18261_v10 = vpop.f32.mrb[49].mxu1  ;;  %14996 = vmatprep.subr.msk.mxu0 %vm475_vm8, %v13301_v11 }
 0x154   : > { %v18266_v12 = vpop.f32.mrb[50].mxu1 }
 0x155   : > { %v18269_v13 = vpop.f32.mrb[51].mxu1 }
 0x157   : > { %14980 = vmatmul.mubr.msk.f32.vlgmr.msra.gmra.mrb[8].mxu0 %vm468_vm9, %v14976_v39 }
 0x158   : > { %v18274_v14 = vpop.f32.mrb[52].mxu1  ;;  %14998 = vmatprep.mubr.msk.f32.mxu0 %vm468_vm9, %v3115_v45  ;;  %14997 = vmatpush3.msk.msra.mxu0 %vm475_vm8, %v13301_v11  ;;  %v4372_v45 = vld [vmem:[%s20182_s1] sm:$0x7]  ;;  %v13465_v11 = vld [vmem:[%s20182_s1 + $0xc] sm:$0x7] }
 0x159   : > { %v18276_v15 = vpop.f32.mrb[53].mxu1  ;;  %15001 = vmatprep.subr.msk.mxu0 %vm475_vm8, %v3048_v16 }
 0x15b   : > { %14999 = vmatmul.mubr.msk.f32.vlgmr.msra.gmra.mrb[10].mxu0 %vm468_vm9, %v14995_v44  ;;  %v13363_v44 = vld [vmem:[%s20182_s1 + $0x4] sm:$0x7] }
 0x15c   : > { %v18281_v17 = vpop.f32.mrb[54].mxu1  ;;  %15003 = vmatprep.mubr.msk.f32.mxu0 %vm468_vm9, %v18194_v42  ;;  %15002 = vmatpush3.msk.msra.mxu0 %vm475_vm8, %v3048_v16  ;;  %v13349_v42 = vld [vmem:[%s20182_s1 + $0xc] sm:$0x7] }
 0x15d   : > { %v18284_v18 = vpop.f32.mrb[55].mxu1  ;;  %15013 = vmatprep.subr.msk.mxu0 %vm475_vm8, %v13311_v19 }
 0x160   : > { %v18292_v20 = vpop.f32.mrb[56].mxu1 }
 0x161   : > { %v18295_v21 = vpop.f32.mrb[57].mxu1 }
 0x163   : > { %15004 = vmatmul.mubr.msk.f32.vlgmr.msra.gmra.mrb[10].mxu0 %vm468_vm9, %v18192_v41 }
 0x164   : > { %v18301_v22 = vpop.f32.mrb[58].mxu1  ;;  %15014 = vmatpush3.msk.msra.mxu0 %vm475_vm8, %v13311_v19  ;;  %15015 = vmatprep.mubr.msk.f32.mxu0 %vm468_vm9, %v18205_v47  ;;  %v13380_v47 = vld [vmem:[%s20182_s1 + $0xc] sm:$0x7] }
 0x165   : > { %v18303_v23 = vpop.f32.mrb[59].mxu1  ;;  %15025 = vmatprep.subr.msk.mxu0 %vm475_vm8, %v13318_v24 }
 0x168   : > { %v18308_v25 = vpop.f32.mrb[60].mxu1 }
 0x169   : > { %v18312_v26 = vpop.f32.mrb[61].mxu1 }
 0x16b   : > { %15016 = vmatmul.mubr.msk.f32.vlgmr.msra.gmra.mrb[10].mxu0 %vm468_vm9, %v18203_v46  ;;  %v13373_v46 = vld [vmem:[%s20182_s1 + $0x8] sm:$0x7] }
 0x16c   : > { %v18318_v27 = vpop.f32.mrb[62].mxu1  ;;  %15027 = vmatprep.mubr.msk.f32.mxu0 %vm468_vm9, %v18213_v50  ;;  %15026 = vmatpush3.msk.msra.mxu0 %vm475_vm8, %v13318_v24  ;;  %v13404_v50 = vld [vmem:[%s20182_s1 + $0x8] sm:$0x7] }
 0x16d   : > { %v18320_v28 = vpop.f32.mrb[63].mxu1  ;;  %15044 = vmatprep.subr.msk.mxu0 %vm475_vm8, %v13332_v29 }
 0x170   : > { %v18325_v30 = vpop.f32.mrb[64].mxu1 }
 0x171   : > { %v18329_v31 = vpop.f32.mrb[65].mxu1 }
 0x173   : > { %15028 = vmatmul.mubr.msk.f32.vlgmr.msra.gmra.mrb[10].mxu0 %vm468_vm9, %v18210_v49  ;;  %v5034_v49 = vld [vmem:[%s20182_s1] sm:$0x7] }
 0x174   : > { %v18335_v32 = vpop.f32.mrb[66].mxu1  ;;  %15046 = vmatprep.mubr.msk.f32.mxu0 %vm468_vm9, %v18228_v55  ;;  %15045 = vmatpush3.msk.msra.mxu0 %vm475_vm8, %v13332_v29  ;;  %v13442_v55 = vld [vmem:[%s20182_s1 + $0xc] sm:$0x7] }
 0x175   : > { %v18337_v33 = vpop.f32.mrb[67].mxu1  ;;  %15049 = vmatprep.subr.msk.mxu0 %vm475_vm8, %v3710_v34 }
 0x177   : > { %15047 = vmatmul.mubr.msk.f32.vlgmr.msra.gmra.mrb[12].mxu0 %vm468_vm9, %v18225_v54  ;;  %v13435_v54 = vld [vmem:[%s20182_s1 + $0x8] sm:$0x7] }
 0x178   : > { %v18342_v35 = vpop.f32.mrb[68].mxu1  ;;  %15051 = vmatprep.mubr.msk.f32.mxu0 %vm468_vm9, %v18220_v52  ;;  %15050 = vmatpush3.msk.msra.mxu0 %vm475_vm8, %v3710_v34  ;;  %v13425_v52 = vld [vmem:[%s20182_s1 + $0x4] sm:$0x7] }
 0x179   : > { %v18346_v36 = vpop.f32.mrb[69].mxu1  ;;  %15061 = vmatprep.subr.msk.mxu0 %vm475_vm8, %v13342_v37 }
 0x17c   : > { %v18355_v38 = vpop.f32.mrb[70].mxu1 }
 0x17d   : > { %v18359_v39 = vpop.f32.mrb[71].mxu1 }
 0x17f   : > { %15052 = vmatmul.mubr.msk.f32.vlgmr.msra.gmra.mrb[12].mxu0 %vm468_vm9, %v18218_v51  ;;  %v13411_v51 = vld [vmem:[%s20182_s1 + $0xc] sm:$0x7] }
 0x180   : > { %v18365_v40 = vpop.f32.mrb[72].mxu1  ;;  %15062 = vmatpush3.msk.msra.mxu0 %vm475_vm8, %v13342_v37  ;;  %15063 = vmatprep.mubr.msk.f32.mxu0 %vm468_vm9, %v18239_v58 }
 0x181   : > { %v18367_v41 = vpop.f32.mrb[73].mxu1  ;;  %15073 = vmatprep.subr.msk.mxu0 %vm475_vm8, %v13349_v42 }
 0x187   : > { %15064 = vmatmul.mubr.msk.f32.vlgmr.msra.gmra.mrb[12].mxu0 %vm468_vm9, %v18236_v57 }
 0x188   : > { %15075 = vmatprep.mubr.msk.f32.mxu0 %vm468_vm9, %v18246_v0  ;;  %15074 = vmatpush3.msk.msra.mxu0 %vm475_vm8, %v13349_v42 }
 0x189   : > { %15092 = vmatprep.subr.msk.mxu0 %vm475_vm8, %v13363_v44 }
 0x18f   : > { %15076 = vmatmul.mubr.msk.f32.vlgmr.msra.gmra.mrb[12].mxu0 %vm468_vm9, %v18244_v62 }
 0x190   : > { %15094 = vmatprep.mubr.msk.f32.mxu0 %vm468_vm9, %v18261_v10  ;;  %15093 = vmatpush3.msk.msra.mxu0 %vm475_vm8, %v13363_v44  ;;  %v13461_v10 = vld [vmem:[%s20182_s1 + $0x8] sm:$0x7] }
 0x191   : > { %15097 = vmatprep.subr.msk.mxu0 %vm475_vm8, %v4372_v45 }
 0x193   : > { %15095 = vmatmul.mubr.msk.f32.vlgmr.msra.gmra.mrb[14].mxu0 %vm468_vm9, %v18259_v8  ;;  %v6355_v8 = vld [vmem:[%s20182_s1] sm:$0x7] }
 0x194   : > { %15099 = vmatprep.mubr.msk.f32.mxu0 %vm468_vm9, %v18254_v7  ;;  %15098 = vmatpush3.msk.msra.mxu0 %vm475_vm8, %v4372_v45  ;;  %v13454_v7 = vld [vmem:[%s20182_s1 + $0x4] sm:$0x7] }
 0x195   : > { %15109 = vmatprep.subr.msk.mxu0 %vm475_vm8, %v13373_v46 }
 0x19b   : > { %15100 = vmatmul.mubr.msk.f32.vlgmr.msra.gmra.mrb[14].mxu0 %vm468_vm9, %v18251_v5 }
 0x19c   : > { %15110 = vmatpush3.msk.msra.mxu0 %vm475_vm8, %v13373_v46  ;;  %15111 = vmatprep.mubr.msk.f32.mxu0 %vm468_vm9, %v18269_v13 }
 0x19d   : > { %15121 = vmatprep.subr.msk.mxu0 %vm475_vm8, %v13380_v47 }
 0x1a3   : > { %15112 = vmatmul.mubr.msk.f32.vlgmr.msra.gmra.mrb[14].mxu0 %vm468_vm9, %v18266_v12 }
 0x1a4   : > { %15123 = vmatprep.mubr.msk.f32.mxu0 %vm468_vm9, %v18276_v15  ;;  %15122 = vmatpush3.msk.msra.mxu0 %vm475_vm8, %v13380_v47 }
 0x1a5   : > { %15140 = vmatprep.subr.msk.mxu0 %vm475_vm8, %v13394_v48 }
 0x1ab   : > { %15124 = vmatmul.mubr.msk.f32.vlgmr.msra.gmra.mrb[14].mxu0 %vm468_vm9, %v18274_v14 }
 0x1ac   : > { %15142 = vmatprep.mubr.msk.f32.mxu0 %vm468_vm9, %v18295_v21  ;;  %15141 = vmatpush3.msk.msra.mxu0 %vm475_vm8, %v13394_v48 }
 0x1ad   : > { %15145 = vmatprep.subr.msk.mxu0 %vm475_vm8, %v5034_v49 }
 0x1af   : > { %15143 = vmatmul.mubr.msk.f32.vlgmr.msra.gmra.mrb[16].mxu0 %vm468_vm9, %v18292_v20 }
 0x1b0   : > { %15147 = vmatprep.mubr.msk.f32.mxu0 %vm468_vm9, %v18284_v18  ;;  %15146 = vmatpush3.msk.msra.mxu0 %vm475_vm8, %v5034_v49  ;;  %v6769_v18 = vmul.u32 2, %v17744_v2 }
 0x1b1   : > { %15157 = vmatprep.subr.msk.mxu0 %vm475_vm8, %v13404_v50 }
 0x1b2   : > { %vm6770_vm13 = vcmp.eq.s32.totalorder %v17746_v3, %v6769_v18 }
 0x1b3   : > { %v18554_v2 = vsel %vm6770_vm13, 1.0, %v17647_v1 }
 0x1b7   : > { %15148 = vmatmul.mubr.msk.f32.vlgmr.msra.gmra.mrb[16].mxu0 %vm468_vm9, %v18281_v17 }
 0x1b8   : > { %15158 = vmatpush3.msk.msra.mxu0 %vm475_vm8, %v13404_v50  ;;  %15159 = vmatprep.mubr.msk.f32.mxu0 %vm468_vm9, %v18303_v23 }
 0x1b9   : > { %15169 = vmatprep.subr.msk.mxu0 %vm475_vm8, %v13411_v51 }
 0x1bf   : > { %15160 = vmatmul.mubr.msk.f32.vlgmr.msra.gmra.mrb[16].mxu0 %vm468_vm9, %v18301_v22 }
 0x1c0   : > { %15171 = vmatprep.mubr.msk.f32.mxu0 %vm468_vm9, %v18312_v26  ;;  %15170 = vmatpush3.msk.msra.mxu0 %vm475_vm8, %v13411_v51 }
 0x1c1   : > { %15188 = vmatprep.subr.msk.mxu0 %vm475_vm8, %v13425_v52 }
 0x1c7   : > { %15172 = vmatmul.mubr.msk.f32.vlgmr.msra.gmra.mrb[16].mxu0 %vm468_vm9, %v18308_v25 }
 0x1c8   : > { %15190 = vmatprep.mubr.msk.f32.mxu0 %vm468_vm9, %v18329_v31  ;;  %15189 = vmatpush3.msk.msra.mxu0 %vm475_vm8, %v13425_v52 }
 0x1c9   : > { %15193 = vmatprep.subr.msk.mxu0 %vm475_vm8, %v5696_v53 }
 0x1cb   : > { %15191 = vmatmul.mubr.msk.f32.vlgmr.msra.gmra.mrb[18].mxu0 %vm468_vm9, %v18325_v30 }
 0x1cc   : > { %15195 = vmatprep.mubr.msk.f32.mxu0 %vm468_vm9, %v18320_v28  ;;  %15194 = vmatpush3.msk.msra.mxu0 %vm475_vm8, %v5696_v53 }
 0x1cd   : > { %15205 = vmatprep.subr.msk.mxu0 %vm475_vm8, %v13435_v54 }
 0x1d3   : > { %15196 = vmatmul.mubr.msk.f32.vlgmr.msra.gmra.mrb[18].mxu0 %vm468_vm9, %v18318_v27 }
 0x1d4   : > { %15206 = vmatpush3.msk.msra.mxu0 %vm475_vm8, %v13435_v54  ;;  %15207 = vmatprep.mubr.msk.f32.mxu0 %vm468_vm9, %v18337_v33 }
 0x1d5   : > { %15217 = vmatprep.subr.msk.mxu0 %vm475_vm8, %v13442_v55 }
 0x1d6   : > { %v14837_v57 = vpop.f32.mrb[2].mxu0 }
 0x1d7   : > { %v974_v58 = vadd.f32 %v14837_v57, %v18488_v56  ;;  %v956_v62 = vpop.f32.mrb[3].mxu0 }
 0x1d8   : > { %v973_v0 = vadd.f32 %v18488_v56, %v956_v62 }
 0x1d9   : > { %v976_v4 = vmax.f32 %v974_v58, 0.0 }
 0x1da   : > { %v975_v5 = vmax.f32 %v973_v0, 0.0 }
 0x1db   : > { %978 = vst [vmem:[#allocation2 + $0x8] sm:$0x3] %v976_v4  ;;  %15208 = vmatmul.mubr.msk.f32.vlgmr.msra.gmra.mrb[18].mxu0 %vm468_vm9, %v18335_v32 }
 0x1dc   : > { %15219 = vmatprep.mubr.msk.f32.mxu0 %vm468_vm9, %v18346_v36  ;;  %15218 = vmatpush3.msk.msra.mxu0 %vm475_vm8, %v13442_v55 }
 0x1dd   : > { %15236 = vmatprep.subr.msk.mxu0 %vm475_vm8, %v13454_v7 }
 0x1e2   : > { %v6778_v19 = vld [vmem:[#allocation2 + $0x8] sm:$0x3] }
 0x1e3   : > { %15220 = vmatmul.mubr.msk.f32.vlgmr.msra.gmra.mrb[18].mxu0 %vm468_vm9, %v18342_v35 }
 0x1e4   : > { %15238 = vmatprep.mubr.msk.f32.mxu0 %vm468_vm9, %v18367_v41  ;;  %15237 = vmatpush3.msk.msra.mxu0 %vm475_vm8, %v13454_v7 }
 0x1e5   : > { %15241 = vmatprep.subr.msk.mxu0 %vm475_vm8, %v6355_v8 }
 0x1e7   : > { %15239 = vmatmul.mubr.msk.f32.vlgmr.msra.gmra.mrb[20].mxu0 %vm468_vm9, %v18365_v40 }
 0x1e8   : > { %15243 = vmatprep.mubr.msk.f32.mxu0 %vm468_vm9, %v18359_v39  ;;  %15242 = vmatpush3.msk.msra.mxu0 %vm475_vm8, %v6355_v8 }
 0x1e9   : > { %15246 = vmatprep.subr.msk.mxu0 %vm475_vm8, %v13461_v10 }
 0x1ef   : > { %15244 = vmatmul.mubr.msk.f32.vlgmr.msra.gmra.mrb[20].mxu0 %vm468_vm9, %v18355_v38 }
 0x1f0   : > { %15248 = vmatprep.mubr.msk.f32.mxu0 %vm468_vm9, %v18128_v63  ;;  %15247 = vmatpush3.msk.msra.mxu0 %vm475_vm8, %v13461_v10 }
 0x1f1   : > { %15251 = vmatprep.subr.msk.mxu0 %vm475_vm8, %v13465_v11 }
 0x1f2   : > { %v14885_v12 = vpop.f32.mrb[4].mxu0 }
 0x1f3   : > { %v1635_v13 = vadd.f32 %v14885_v12, %v18488_v56  ;;  %v1623_v14 = vpop.f32.mrb[5].mxu0 }
 0x1f4   : > { %v1634_v15 = vadd.f32 %v18488_v56, %v1623_v14 }
 0x1f5   : > { %v1637_v16 = vmax.f32 %v1635_v13, 0.0 }
 0x1f6   : > { %v1636_v17 = vmax.f32 %v1634_v15, 0.0 }
 0x1f7   : > { %1640 = vst [vmem:[#allocation2 + $0x18] sm:$0x3] %v1637_v16  ;;  %15249 = vmatmul.mubr.msk.f32.vlgmr.msra.gmra.mrb[20].mxu0 %vm468_vm9, %v18121_v61 }
 0x1f8   : > { %15253 = vmatprep.mubr.msk.f32.mxu0 %vm468_vm9, %v18117_v60  ;;  %15252 = vmatpush3.msk.msra.mxu0 %vm475_vm8, %v13465_v11  ;;  %v6781_v63 = vmax.f32 %v975_v5, %v1636_v17  ;;  %v6773_v60 = vadd.s32 1, %v6769_v18 }
 0x1f9   : > { %16754 = vmatprep.subr.bf16.mxu0 %v17649_v43 }
 0x1fa   : > { %vm6774_vm15 = vcmp.eq.s32.totalorder %v17746_v3, %v6773_v60  ;;  %v13839_v3 = vld [vmem:[%s20186_s5 + $0x70] sm:$0xff] }
 0x1fe   : > { %v6780_v20 = vld [vmem:[#allocation2 + $0x18] sm:$0x3] }
 0x1ff   : > { %15254 = vmatmul.mubr.msk.f32.vlgmr.msra.gmra.mrb[20].mxu0 %vm468_vm9, %v18115_v59  ;;  %v6782_v21 = vmax.f32 %v6778_v19, %v6780_v20  ;;  %v18565_v59 = vsel %vm6774_vm15, 1.0, %v17647_v1 }
 0x200   : > { %15288 = vmatprep.mubr.msk.f32.mxu0 %vm17650_vm10, %v17647_v1 }
 0x201   : > { %v16739_v22 = vpack.c.bf16 %v6782_v21, %v6781_v63 }
 0x203   : > { %16741 = vmatpush3.bf16.msk.msra.mxu1 %vm18544_vm12, %v16739_v22 }
 0x204   : > { %16742 = vmatprep.subr.bf16.mxu1 %v17649_v43 }
 0x206   : > { %15261 = vmatmul.mubr.msk.f32.vlgmr.msra.gmra.mrb[74].mxu1 %vm6783_vm14, %v18554_v2 }
 0x207   : > { %16745 = vmatpush3.bf16.msk.msra.mxu1 %vm18544_vm12, %v16739_v22  ;;  %15267 = vmatprep.mubr.msk.f32.mxu1 %vm17650_vm10, %v17647_v1 }
 0x208   : > { %16746 = vmatprep.subr.bf16.mxu1 %v17649_v43 }
 0x20a   : > { %15268 = vmatmul.mubr.msk.f32.vlgmr.msra.gmra.mrb[76].mxu1 %vm6783_vm14, %v18565_v59 }
 0x20b   : > { %15274 = vmatprep.mubr.msk.f32.mxu1 %vm17650_vm10, %v17647_v1 }
 0x20e   : > { %v14933_v23 = vpop.f32.mrb[6].mxu0 }
 0x20f   : > { %v2297_v24 = vadd.f32 %v14933_v23, %v18488_v56  ;;  %v2285_v25 = vpop.f32.mrb[7].mxu0 }
 0x210   : > { %v2296_v26 = vadd.f32 %v18488_v56, %v2285_v25 }
 0x211   : > { %v2299_v27 = vmax.f32 %v2297_v24, 0.0 }
 0x212   : > { %v2298_v28 = vmax.f32 %v2296_v26, 0.0 }
 0x213   : > { %2302 = vst [vmem:[#allocation2 + $0x28] sm:$0x3] %v2299_v27 }
 0x21a   : > { %v6937_v36 = vld [vmem:[#allocation2 + $0x28] sm:$0x3] }
 0x22a   : > { %v14981_v29 = vpop.f32.mrb[8].mxu0 }
 0x22b   : > { %v2959_v30 = vadd.f32 %v14981_v29, %v18488_v56  ;;  %v2947_v31 = vpop.f32.mrb[9].mxu0 }
 0x22c   : > { %v2958_v32 = vadd.f32 %v18488_v56, %v2947_v31 }
 0x22d   : > { %v2961_v33 = vmax.f32 %v2959_v30, 0.0 }
 0x22e   : > { %v2960_v34 = vmax.f32 %v2958_v32, 0.0 }
 0x22f   : > { %2964 = vst [vmem:[#allocation2 + $0x38] sm:$0x3] %v2961_v33 }
 0x230   : > { %v6940_v35 = vmax.f32 %v2298_v28, %v2960_v34 }
 0x236   : > { %v6939_v37 = vld [vmem:[#allocation2 + $0x38] sm:$0x3] }
 0x237   : > { %v6941_v38 = vmax.f32 %v6937_v36, %v6939_v37 }
 0x239   : > { %v16747_v39 = vpack.c.bf16 %v6941_v38, %v6940_v35 }
 0x23b   : > { %16749 = vmatpush3.bf16.msk.msra.mxu1 %vm18544_vm12, %v16747_v39 }
 0x23c   : > { %16750 = vmatprep.subr.bf16.mxu1 %v17649_v43 }
 0x23e   : > { %15275 = vmatmul.mubr.msk.f32.vlgmr.msra.gmra.mrb[78].mxu1 %vm6783_vm14, %v18554_v2 }
 0x23f   : > { %16753 = vmatpush3.bf16.msk.msra.mxu1 %vm18544_vm12, %v16747_v39  ;;  %15281 = vmatprep.mubr.msk.f32.mxu1 %vm17650_vm10, %v17647_v1 }
 0x240   : > { %16758 = vmatprep.subr.bf16.mxu1 %v17649_v43 }
 0x242   : > { %15282 = vmatmul.mubr.msk.f32.vlgmr.msra.gmra.mrb[80].mxu1 %vm6783_vm14, %v18565_v59 }
 0x243   : > { %15295 = vmatprep.mubr.msk.f32.mxu1 %vm17650_vm10, %v17647_v1 }
 0x246   : > { %v15029_v40 = vpop.f32.mrb[10].mxu0 }
 0x247   : > { %v3621_v41 = vadd.f32 %v15029_v40, %v18488_v56  ;;  %v3609_v42 = vpop.f32.mrb[11].mxu0 }
 0x248   : > { %v3620_v44 = vadd.f32 %v18488_v56, %v3609_v42  ;;  %v13495_v42 = vld [vmem:[%s20184_s3 + $0x90] sm:$0xff] }
 0x249   : > { %v3623_v45 = vmax.f32 %v3621_v41, 0.0  ;;  %v13494_v41 = vld [vmem:[%s20184_s3 + $0x88] sm:$0xff] }
 0x24a   : > { %v3622_v46 = vmax.f32 %v3620_v44, 0.0  ;;  %v13496_v44 = vld [vmem:[%s20184_s3 + $0x98] sm:$0xff] }
 0x24b   : > { %3626 = vst [vmem:[#allocation2 + $0x48] sm:$0x3] %v3623_v45  ;;  %v18667_v45 = vpack.c.bf16 %v13496_v44, %v13495_v42  ;;  %v7630_v44 = vld [vmem:[%s20184_s3 + $0x40] sm:$0xff] }
 0x252   : > { %v7089_v54 = vld [vmem:[#allocation2 + $0x48] sm:$0x3] }
 0x262   : > { %v15077_v47 = vpop.f32.mrb[12].mxu0 }
 0x263   : > { %v4283_v48 = vadd.f32 %v15077_v47, %v18488_v56  ;;  %v4271_v49 = vpop.f32.mrb[13].mxu0  ;;  %v13498_v47 = vld [vmem:[%s20184_s3 + $0xa8] sm:$0xff] }
 0x264   : > { %v4282_v50 = vadd.f32 %v18488_v56, %v4271_v49  ;;  %v13499_v49 = vld [vmem:[%s20184_s3 + $0xb0] sm:$0xff] }
 0x265   : > { %v4285_v51 = vmax.f32 %v4283_v48, 0.0 }
 0x266   : > { %v4284_v52 = vmax.f32 %v4282_v50, 0.0  ;;  %v13500_v50 = vld [vmem:[%s20184_s3 + $0xb8] sm:$0xff] }
 0x267   : > { %4288 = vst [vmem:[#allocation2 + $0x58] sm:$0x3] %v4285_v51  ;;  %v18691_v51 = vpack.c.bf16 %v13500_v50, %v13499_v49  ;;  %v7632_v49 = vld [vmem:[%s20184_s3 + $0x50] sm:$0xff]  ;;  %v7633_v50 = vld [vmem:[%s20184_s3 + $0x58] sm:$0xff] }
 0x268   : > { %v7092_v53 = vmax.f32 %v3622_v46, %v4284_v52  ;;  %v13497_v46 = vld [vmem:[%s20184_s3 + $0xa0] sm:$0xff] }
 0x269   : > { %v18681_v48 = vpack.c.bf16 %v13498_v47, %v13497_v46  ;;  %v13501_v52 = vld [vmem:[%s20184_s3 + $0xc0] sm:$0xff]  ;;  %v7631_v46 = vld [vmem:[%s20184_s3 + $0x48] sm:$0xff] }
 0x26a   : > { %v18788_v47 = vpack.c.bf16 %v7631_v46, %v7630_v44  ;;  %v13522_v44 = vld [vmem:[%s20184_s3 + $0x158] sm:$0xff] }
 0x26e   : > { %v7091_v55 = vld [vmem:[#allocation2 + $0x58] sm:$0x3] }
 0x26f   : > { %v7093_v57 = vmax.f32 %v7089_v54, %v7091_v55  ;;  %v13503_v55 = vld [vmem:[%s20184_s3 + $0xd0] sm:$0xff] }
 0x271   : > { %v16755_v58 = vpack.c.bf16 %v7093_v57, %v7092_v53  ;;  %v13502_v53 = vld [vmem:[%s20184_s3 + $0xc8] sm:$0xff]  ;;  %v13504_v57 = vld [vmem:[%s20184_s3 + $0xd8] sm:$0xff] }
 0x272   : > { %v18701_v54 = vpack.c.bf16 %v13502_v53, %v13501_v52  ;;  %v18798_v52 = vpack.c.bf16 %v7633_v50, %v7632_v49  ;;  %v7634_v53 = vld [vmem:[%s20184_s3 + $0x60] sm:$0xff]  ;;  %v13539_v49 = vld [vmem:[%s20184_s3 + $0x1d0] sm:$0xff]  ;;  %v13540_v50 = vld [vmem:[%s20184_s3 + $0x1d8] sm:$0xff] }
 0x273   : > { %16757 = vmatpush3.bf16.msk.msra.mxu0 %vm18544_vm12, %v16755_v58  ;;  %16761 = vmatpush3.bf16.msk.msra.mxu1 %vm18544_vm12, %v16755_v58  ;;  %v18711_v58 = vpack.c.bf16 %v13504_v57, %v13503_v55  ;;  %v7635_v55 = vld [vmem:[%s20184_s3 + $0x68] sm:$0xff] }
 0x274   : > { %16762 = vmatprep.subr.bf16.mxu0 %v17649_v43  ;;  %16766 = vmatprep.subr.bf16.mxu1 %v17649_v43  ;;  %v18808_v57 = vpack.c.bf16 %v7635_v55, %v7634_v53  ;;  %v13523_v55 = vld [vmem:[%s20184_s3 + $0x160] sm:$0xff] }
 0x276   : > { %15289 = vmatmul.mubr.msk.f32.vlgmr.msra.gmra.mrb[22].mxu0 %vm6783_vm14, %v18554_v2  ;;  %15296 = vmatmul.mubr.msk.f32.vlgmr.msra.gmra.mrb[82].mxu1 %vm6783_vm14, %v18565_v59 }
 0x277   : > { %15309 = vmatprep.mubr.msk.f32.mxu1 %vm17650_vm10, %v17647_v1  ;;  %15302 = vmatprep.mubr.msk.f32.mxu0 %vm17650_vm10, %v17647_v1 }
 0x27e   : > { %v15125_v62 = vpop.f32.mrb[14].mxu0 }
 0x27f   : > { %v4945_v0 = vadd.f32 %v15125_v62, %v18488_v56  ;;  %v4933_v4 = vpop.f32.mrb[15].mxu0  ;;  %v13505_v62 = vld [vmem:[%s20184_s3 + $0xe0] sm:$0xff] }
 0x280   : > { %v4944_v5 = vadd.f32 %v18488_v56, %v4933_v4 }
 0x281   : > { %v4947_v7 = vmax.f32 %v4945_v0, 0.0  ;;  %v13506_v0 = vld [vmem:[%s20184_s3 + $0xe8] sm:$0xff] }
 0x282   : > { %v4946_v8 = vmax.f32 %v4944_v5, 0.0  ;;  %v18722_v4 = vpack.c.bf16 %v13506_v0, %v13505_v62  ;;  %v7636_v62 = vld [vmem:[%s20184_s3 + $0x70] sm:$0xff]  ;;  %v7637_v0 = vld [vmem:[%s20184_s3 + $0x78] sm:$0xff] }
 0x283   : > { %4950 = vst [vmem:[#allocation2 + $0x68] sm:$0x3] %v4947_v7 }
 0x28a   : > { %v7241_v17 = vld [vmem:[#allocation2 + $0x68] sm:$0x3] }
 0x29a   : > { %v15173_v10 = vpop.f32.mrb[16].mxu0 }
 0x29b   : > { %v5607_v11 = vadd.f32 %v15173_v10, %v18488_v56  ;;  %v5595_v12 = vpop.f32.mrb[17].mxu0 }
 0x29c   : > { %v5606_v13 = vadd.f32 %v18488_v56, %v5595_v12  ;;  %v13507_v12 = vld [vmem:[%s20184_s3 + $0xf0] sm:$0xff] }
 0x29d   : > { %v5609_v14 = vmax.f32 %v5607_v11, 0.0 }
 0x29e   : > { %v5608_v15 = vmax.f32 %v5606_v13, 0.0  ;;  %v13508_v13 = vld [vmem:[%s20184_s3 + $0xf8] sm:$0xff] }
 0x29f   : > { %5612 = vst [vmem:[#allocation2 + $0x78] sm:$0x3] %v5609_v14  ;;  %v18732_v14 = vpack.c.bf16 %v13508_v13, %v13507_v12  ;;  %v13514_v13 = vld [vmem:[%s20184_s3 + $0x118] sm:$0xff] }
 0x2a0   : > { %v7244_v16 = vmax.f32 %v4946_v8, %v5608_v15 }
 0x2a6   : > { %v7243_v63 = vld [vmem:[#allocation2 + $0x78] sm:$0x3] }
 0x2a7   : > { %v7245_v18 = vmax.f32 %v7241_v17, %v7243_v63 }
 0x2a9   : > { %v16763_v19 = vpack.c.bf16 %v7245_v18, %v7244_v16 }
 0x2ab   : > { %16765 = vmatpush3.bf16.msk.msra.mxu0 %vm18544_vm12, %v16763_v19  ;;  %16769 = vmatpush3.bf16.msk.msra.mxu1 %vm18544_vm12, %v16763_v19 }
 0x2ac   : > { %16770 = vmatprep.subr.bf16.mxu0 %v17649_v43  ;;  %16774 = vmatprep.subr.bf16.mxu1 %v17649_v43 }
 0x2ae   : > { %15310 = vmatmul.mubr.msk.f32.vlgmr.msra.gmra.mrb[84].mxu1 %vm6783_vm14, %v18565_v59  ;;  %15303 = vmatmul.mubr.msk.f32.vlgmr.msra.gmra.mrb[24].mxu0 %vm6783_vm14, %v18554_v2 }
 0x2af   : > { %15316 = vmatprep.mubr.msk.f32.mxu0 %vm17650_vm10, %v17647_v1  ;;  %15323 = vmatprep.mubr.msk.f32.mxu1 %vm17650_vm10, %v17647_v1 }
 0x2b6   : > { %v15221_v20 = vpop.f32.mrb[18].mxu0 }
 0x2b7   : > { %v6269_v21 = vadd.f32 %v15221_v20, %v18488_v56  ;;  %v6257_v60 = vpop.f32.mrb[19].mxu0 }
 0x2b8   : > { %v6268_v22 = vadd.f32 %v18488_v56, %v6257_v60 }
 0x2b9   : > { %v6271_v23 = vmax.f32 %v6269_v21, 0.0 }
 0x2ba   : > { %v6270_v24 = vmax.f32 %v6268_v22, 0.0 }
 0x2bb   : > { %6274 = vst [vmem:[#allocation2 + $0x88] sm:$0x3] %v6271_v23  ;;  %v7622_v23 = vld [vmem:[%s20184_s3] sm:$0xff] }
 0x2c2   : > { %v7393_v35 = vld [vmem:[#allocation2 + $0x88] sm:$0x3] }
 0x2d2   : > { %v15255_v25 = vpop.f32.mrb[20].mxu0 }
 0x2d3   : > { %v6763_v26 = vadd.f32 %v15255_v25, %v18488_v56  ;;  %v6751_v27 = vpop.f32.mrb[21].mxu0 }
 0x2d4   : > { %v6762_v28 = vadd.f32 %v18488_v56, %v6751_v27  ;;  %v13493_v56 = vld [vmem:[%s20184_s3 + $0x80] sm:$0xff] }
 0x2d5   : > { %v6765_v29 = vmax.f32 %v6763_v26, 0.0  ;;  %v18649_v61 = vpack.c.bf16 %v13494_v41, %v13493_v56  ;;  %v7628_v56 = vld [vmem:[%s20184_s3 + $0x30] sm:$0xff]  ;;  %v7629_v41 = vld [vmem:[%s20184_s3 + $0x38] sm:$0xff] }
 0x2d6   : > { %v6764_v30 = vmax.f32 %v6762_v28, 0.0  ;;  %v18778_v42 = vpack.c.bf16 %v7629_v41, %v7628_v56  ;;  %v13521_v41 = vld [vmem:[%s20184_s3 + $0x150] sm:$0xff] }
 0x2d7   : > { %6768 = vst [vmem:[#allocation2 + $0x98] sm:$0x3] %v6765_v29  ;;  %v18947_v53 = vpack.c.bf16 %v13522_v44, %v13521_v41 }
 0x2d8   : > { %v7396_v31 = vmax.f32 %v6270_v24, %v6764_v30  ;;  %v7623_v24 = vld [vmem:[%s20184_s3 + $0x8] sm:$0xff] }
 0x2d9   : > { %v6857_v32 = vpop.f32.mrb[74].mxu1  ;;  %v18742_v30 = vpack.c.bf16 %v7623_v24, %v7622_v23  ;;  %v13534_v23 = vld [vmem:[%s20184_s3 + $0x1a8] sm:$0xff] }
 0x2da   : > { %v15262_v33 = vpop.f32.mrb[75].mxu1 }
 0x2dd   : > { %v6930_v34 = vpop.f32.mrb[76].mxu1 }
 0x2de   : > { %v7395_v36 = vld [vmem:[#allocation2 + $0x98] sm:$0x3]  ;;  %v6934_v37 = vmax.f32 %v6857_v32, %v6930_v34  ;;  %v15269_v38 = vpop.f32.mrb[77].mxu1 }
 0x2df   : > { %v7397_v39 = vmax.f32 %v7393_v35, %v7395_v36  ;;  %v7625_v32 = vld [vmem:[%s20184_s3 + $0x18] sm:$0xff]  ;;  %v7626_v38 = vld [vmem:[%s20184_s3 + $0x20] sm:$0xff] }
 0x2e0   : > { %6935 = vst [vmem:[#allocation3] sm:$0x1f] %v6934_v37 }
 0x2e1   : > { %v16771_v40 = vpack.c.bf16 %v7397_v39, %v7396_v31  ;;  %v7624_v31 = vld [vmem:[%s20184_s3 + $0x10] sm:$0xff]  ;;  %v7627_v39 = vld [vmem:[%s20184_s3 + $0x28] sm:$0xff] }
 0x2e2   : > { %v18756_v37 = vpack.c.bf16 %v7625_v32, %v7624_v31  ;;  %v13519_v32 = vld [vmem:[%s20184_s3 + $0x140] sm:$0xff] }
 0x2e3   : > { %16773 = vmatpush3.bf16.msk.msra.mxu0 %vm18544_vm12, %v16771_v40  ;;  %16777 = vmatpush3.bf16.msk.msra.mxu1 %vm18544_vm12, %v16771_v40  ;;  %v18768_v40 = vpack.c.bf16 %v7627_v39, %v7626_v38  ;;  %v13537_v38 = vld [vmem:[%s20184_s3 + $0x1c0] sm:$0xff]  ;;  %v13538_v39 = vld [vmem:[%s20184_s3 + $0x1c8] sm:$0xff] }
 0x2e4   : > { %15331 = vmatprep.subr.mxu1 %v17647_v1  ;;  %15326 = vmatprep.subr.mxu0 %v17647_v1  ;;  %v18937_v46 = vpack.c.bf16 %v13538_v39, %v13537_v38 }
 0x2e6   : > { %15317 = vmatmul.mubr.msk.f32.vlgmr.msra.gmra.mrb[26].mxu0 %vm6783_vm14, %v18554_v2  ;;  %15324 = vmatmul.mubr.msk.f32.vlgmr.msra.gmra.mrb[86].mxu1 %vm6783_vm14, %v18565_v59 }
 0x2e7   : > { %15332 = vmatpush3.msra.mxu1 %v17647_v1  ;;  %15333 = vmatprep.mubr.msk.f32.mxu1 %vm17650_vm10, %v17647_v1 }
 0x2e8   : > { %15327 = vmatpush3.msra.mxu0 %v17647_v1  ;;  %15328 = vmatprep.mubr.msk.f32.mxu0 %vm17650_vm10, %v17647_v1 }
 0x2e9   : > { %16778 = vmatprep.subr.bf16.mxu0 %v17649_v43  ;;  %16826 = vmatprep.subr.bf16.mxu1 %v17649_v43 }
 0x2ea   : > { %15334 = vmatmul.mubr.msk.f32.vlgmr.msra.gmra.mrb[88].mxu1 %vm7546_vm0, %v17755_v6  ;;  %15329 = vmatmul.mubr.msk.f32.vlgmr.msra.gmra.mrb[28].mxu0 %vm7546_vm0, %v17770_v9 }
 0x2eb   : > { %16780 = vmatpush3.bf16.msra.mxu0 %v18649_v61  ;;  %15368 = vmatprep.mubr.msk.f32.mxu0 %vm17650_vm10, %v17647_v1 }
 0x2ec   : > { %16781 = vmatprep.subr.bf16.mxu0 %v17649_v43  ;;  %15443 = vmatprep.mubr.msk.f32.mxu1 %vm17650_vm10, %v17647_v1 }
 0x2ef   : > { %16783 = vmatpush3.bf16.msra.mxu0 %v18667_v45 }
 0x2f0   : > { %16784 = vmatprep.subr.bf16.mxu0 %v17649_v43 }
 0x2f3   : > { %16786 = vmatpush3.bf16.msra.mxu0 %v18681_v48 }
 0x2f4   : > { %16787 = vmatprep.subr.bf16.mxu0 %v17649_v43 }
 0x2f7   : > { %16789 = vmatpush3.bf16.msra.mxu0 %v18691_v51 }
 0x2f8   : > { %16790 = vmatprep.subr.bf16.mxu0 %v17649_v43 }
 0x2fb   : > { %16792 = vmatpush3.bf16.msra.mxu0 %v18701_v54 }
 0x2fc   : > { %16793 = vmatprep.subr.bf16.mxu0 %v17649_v43 }
 0x2ff   : > { %16795 = vmatpush3.bf16.msra.mxu0 %v18711_v58 }
 0x300   : > { %16796 = vmatprep.subr.bf16.mxu0 %v17649_v43 }
 0x303   : > { %16798 = vmatpush3.bf16.msra.mxu0 %v18722_v4 }
 0x304   : > { %16799 = vmatprep.subr.bf16.mxu0 %v17649_v43 }
 0x307   : > { %16801 = vmatpush3.bf16.msra.mxu0 %v18732_v14 }
 0x308   : > { %16802 = vmatprep.subr.bf16.mxu0 %v17649_v43 }
 0x311   : > { %v7011_v5 = vpop.f32.mrb[78].mxu1 }
 0x312   : > { %v15276_v7 = vpop.f32.mrb[79].mxu1 }
 0x313   : > { %v7545_v7 = vld [vmem:[#allocation3] sm:$0x1f] }
 0x315   : > { %v7081_v8 = vpop.f32.mrb[80].mxu1 }
 0x316   : > { %v7085_v10 = vmax.f32 %v7011_v5, %v7081_v8  ;;  %v15283_v11 = vpop.f32.mrb[81].mxu1  ;;  %v18818_v5 = vpack.c.bf16 %v7637_v0, %v7636_v62  ;;  %v13511_v8 = vld [vmem:[%s20184_s3 + $0x100] sm:$0xff]  ;;  %v13524_v62 = vld [vmem:[%s20184_s3 + $0x168] sm:$0xff]  ;;  %v18957_v0 = vpack.c.bf16 %v13540_v50, %v13539_v49 }
 0x317   : > { %v13513_v11 = vld [vmem:[%s20184_s3 + $0x110] sm:$0xff]  ;;  %v19049_v49 = vld [vmem:[%s20185_s4] ss:$0 sm:$0xff] }
 0x318   : > { %7087 = vst [vmem:[#allocation3 + $0x8] sm:$0x1f] %v7085_v10  ;;  %v13512_v10 = vld [vmem:[%s20184_s3 + $0x108] sm:$0xff] }
 0x319   : > { %v18847_v12 = vpack.c.bf16 %v13512_v10, %v13511_v8  ;;  %v13525_v8 = vld [vmem:[%s20184_s3 + $0x170] sm:$0xff]  ;;  %v13526_v10 = vld [vmem:[%s20184_s3 + $0x178] sm:$0xff] }
 0x31b   : > { %16828 = vmatpush3.bf16.msra.mxu1 %v18847_v12 }
 0x31c   : > { %16829 = vmatprep.subr.bf16.mxu1 %v17649_v43 }
 0x349   : > { %v7233_v15 = vpop.f32.mrb[82].mxu1  ;;  %v7163_v16 = vpop.f32.mrb[22].mxu0 }
 0x34a   : > { %v7237_v17 = vmax.f32 %v7163_v16, %v7233_v15  ;;  %v15297_v63 = vpop.f32.mrb[83].mxu1  ;;  %v15290_v18 = vpop.f32.mrb[23].mxu0  ;;  %v13529_v15 = vld [vmem:[%s20184_s3 + $0x180] sm:$0xff]  ;;  %v13530_v16 = vld [vmem:[%s20184_s3 + $0x188] sm:$0xff] }
 0x34b   : > { %v13531_v63 = vld [vmem:[%s20184_s3 + $0x190] sm:$0xff]  ;;  %v18864_v18 = vpack.c.bf16 %v13514_v13, %v13513_v11  ;;  %v18974_v11 = vpack.c.bf16 %v13526_v10, %v13525_v8  ;;  %v13541_v13 = vld [vmem:[%s20184_s3 + $0x1e0] sm:$0xff] }
 0x34c   : > { %7239 = vst [vmem:[#allocation3 + $0x10] sm:$0x1f] %v7237_v17  ;;  %v18858_v17 = vpack.c.bf16 %v13530_v16, %v13529_v15  ;;  %v13542_v15 = vld [vmem:[%s20184_s3 + $0x1e8] sm:$0xff] }
 0x34d   : > { %16831 = vmatpush3.bf16.msra.mxu1 %v18864_v18  ;;  %v18982_v16 = vpack.c.bf16 %v13542_v15, %v13541_v13 }
 0x34e   : > { %16832 = vmatprep.subr.bf16.mxu1 %v17649_v43 }
 0x381   : > { %v7385_v19 = vpop.f32.mrb[84].mxu1  ;;  %v7315_v20 = vpop.f32.mrb[24].mxu0 }
 0x382   : > { %v7389_v21 = vmax.f32 %v7315_v20, %v7385_v19  ;;  %v15311_v60 = vpop.f32.mrb[85].mxu1  ;;  %v15304_v22 = vpop.f32.mrb[25].mxu0  ;;  %v13532_v19 = vld [vmem:[%s20184_s3 + $0x198] sm:$0xff]  ;;  %v13515_v20 = vld [vmem:[%s20184_s3 + $0x120] sm:$0xff] }
 0x383   : > { %v18877_v60 = vpack.c.bf16 %v13532_v19, %v13531_v63  ;;  %v13533_v22 = vld [vmem:[%s20184_s3 + $0x1a0] sm:$0xff]  ;;  %v13543_v63 = vld [vmem:[%s20184_s3 + $0x1f0] sm:$0xff]  ;;  %v13544_v19 = vld [vmem:[%s20184_s3 + $0x1f8] sm:$0xff] }
 0x384   : > { %7391 = vst [vmem:[#allocation3 + $0x18] sm:$0x1f] %v7389_v21  ;;  %v13516_v21 = vld [vmem:[%s20184_s3 + $0x128] sm:$0xff] }
 0x385   : > { %v18887_v24 = vpack.c.bf16 %v13516_v21, %v13515_v20  ;;  %v18994_v20 = vpack.c.bf16 %v13544_v19, %v13543_v63 }
 0x387   : > { %16834 = vmatpush3.bf16.msra.mxu1 %v18887_v24 }
 0x388   : > { %16835 = vmatprep.subr.bf16.mxu1 %v17649_v43 }
 0x3b9   : > { %v7467_v25 = vpop.f32.mrb[26].mxu0  ;;  %v7537_v26 = vpop.f32.mrb[86].mxu1 }
 0x3ba   : > { %v7541_v27 = vmax.f32 %v7467_v25, %v7537_v26  ;;  %v15325_v28 = vpop.f32.mrb[87].mxu1  ;;  %v15318_v29 = vpop.f32.mrb[27].mxu0  ;;  %v13517_v25 = vld [vmem:[%s20184_s3 + $0x130] sm:$0xff]  ;;  %v13518_v26 = vld [vmem:[%s20184_s3 + $0x138] sm:$0xff] }
 0x3bb   : > { %v13535_v28 = vld [vmem:[%s20184_s3 + $0x1b0] sm:$0xff]  ;;  %v13536_v29 = vld [vmem:[%s20184_s3 + $0x1b8] sm:$0xff]  ;;  %v18907_v31 = vpack.c.bf16 %v13518_v26, %v13517_v25 }
 0x3bc   : > { %7543 = vst [vmem:[#allocation3 + $0x20] sm:$0x1f] %v7541_v27  ;;  %v18897_v27 = vpack.c.bf16 %v13534_v23, %v13533_v22 }
 0x3bd   : > { %v18750_v33 = vpop.f32.mrb[88].mxu1  ;;  %v18752_v34 = vpop.f32.mrb[28].mxu0  ;;  %16837 = vmatpush3.bf16.msra.mxu1 %v18907_v31 }
 0x3be   : > { %v15335_v35 = vpop.f32.mrb[89].mxu1  ;;  %15369 = vmatmul.mubr.f32.vlgmr.msra.gmra.mrb[30].mxu0 %v18750_v33  ;;  %v15330_v36 = vpop.f32.mrb[29].mxu0  ;;  %16838 = vmatprep.subr.bf16.mxu1 %v17649_v43 }
 0x3bf   : > { %16804 = vmatpush3.bf16.msra.mxu0 %v18742_v30  ;;  %15403 = vmatprep.mubr.msk.f32.mxu0 %vm17650_vm10, %v17647_v1  ;;  %v13520_v35 = vld [vmem:[%s20184_s3 + $0x148] sm:$0xff]  ;;  %v18917_v36 = vpack.c.bf16 %v13536_v29, %v13535_v28 }
 0x3c0   : > { %16805 = vmatprep.subr.bf16.mxu0 %v17649_v43  ;;  %v18927_v56 = vpack.c.bf16 %v13520_v35, %v13519_v32  ;;  %v8196_v32 = vld [vmem:[#allocation3] sm:$0x1f] }
 0x3c2   : > { %16840 = vmatpush3.bf16.msra.mxu1 %v18927_v56 }
 0x3c3   : > { %16807 = vmatpush3.bf16.msra.mxu0 %v18756_v37  ;;  %16841 = vmatprep.subr.bf16.mxu1 %v17649_v43 }
 0x3c4   : > { %16808 = vmatprep.subr.bf16.mxu0 %v17649_v43 }
 0x3c6   : > { %16843 = vmatpush3.bf16.msra.mxu1 %v18947_v53 }
 0x3c7   : > { %16810 = vmatpush3.bf16.msra.mxu0 %v18768_v40  ;;  %16844 = vmatprep.subr.bf16.mxu1 %v17649_v43 }
 0x3c8   : > { %16811 = vmatprep.subr.bf16.mxu0 %v17649_v43 }
 0x3cb   : > { %16813 = vmatpush3.bf16.msra.mxu0 %v18778_v42 }
 0x3cc   : > { %16814 = vmatprep.subr.bf16.mxu0 %v17649_v43 }
 0x3cf   : > { %16816 = vmatpush3.bf16.msra.mxu0 %v18788_v47 }
 0x3d0   : > { %16817 = vmatprep.subr.bf16.mxu0 %v17649_v43 }
 0x3d3   : > { %16819 = vmatpush3.bf16.msra.mxu0 %v18798_v52 }
 0x3d4   : > { %16820 = vmatprep.subr.bf16.mxu0 %v17649_v43 }
 0x3d7   : > { %16822 = vmatpush3.bf16.msra.mxu0 %v18808_v57 }
 0x3d8   : > { %16823 = vmatprep.subr.bf16.mxu0 %v17649_v43 }
 0x3db   : > { %16825 = vmatpush3.bf16.msra.mxu0 %v18818_v5 }
 0x3dc   : > { %15406 = vmatprep.subr.mxu0 %v17647_v1 }
 0x3de   : > { %15404 = vmatmul.mubr.f32.vlgmr.msra.gmra.mrb[32].mxu0 %v18752_v34 }
 0x3df   : > { %15407 = vmatpush3.msk.msra.mxu0 %vm7549_vm1, %v7545_v7  ;;  %15408 = vmatprep.mubr.msk.f32.mxu0 %vm17650_vm10, %v17647_v1 }
 0x3e0   : > { %15446 = vmatprep.subr.mxu0 %v17647_v1 }
 0x3e2   : > { %15409 = vmatmul.mubr.msk.f32.vlgmr.msra.gmra.mrb[34].mxu0 %vm7546_vm0, %v17770_v9 }
 0x3e3   : > { %15447 = vmatpush3.msk.msra.mxu0 %vm7549_vm1, %v7545_v7  ;;  %15448 = vmatprep.mubr.msk.f32.mxu0 %vm17650_vm10, %v17647_v1  ;;  %v18961_v7 = vpack.c.bf16 %v13524_v62, %v13523_v55 }
 0x3e4   : > { %16850 = vmatprep.subr.bf16.mxu0 %v17649_v43 }
 0x3e5   : > { %16846 = vmatpush3.bf16.msra.mxu1 %v18961_v7 }
 0x3e6   : > { %15449 = vmatmul.mubr.msk.f32.vlgmr.msra.gmra.mrb[36].mxu0 %vm7546_vm0, %v17755_v6  ;;  %16847 = vmatprep.subr.bf16.mxu1 %v17649_v43 }
 0x3e7   : > { %15483 = vmatprep.mubr.msk.f32.mxu0 %vm17650_vm10, %v17647_v1  ;;  %16852 = vmatpush3.bf16.msra.mxu0 %v18858_v17 }
 0x3e8   : > { %16853 = vmatprep.subr.bf16.mxu0 %v17649_v43 }
 0x3e9   : > { %16849 = vmatpush3.bf16.msra.mxu1 %v18974_v11 }
 0x3ea   : > { %15486 = vmatprep.subr.mxu1 %v17647_v1 }
 0x3eb   : > { %16855 = vmatpush3.bf16.msra.mxu0 %v18877_v60 }
 0x3ec   : > { %16856 = vmatprep.subr.bf16.mxu0 %v17649_v43 }
 0x3ef   : > { %16858 = vmatpush3.bf16.msra.mxu0 %v18897_v27 }
 0x3f0   : > { %16859 = vmatprep.subr.bf16.mxu0 %v17649_v43 }
 0x3f3   : > { %16861 = vmatpush3.bf16.msra.mxu0 %v18917_v36 }
 0x3f4   : > { %16862 = vmatprep.subr.bf16.mxu0 %v17649_v43 }
 0x3f7   : > { %16864 = vmatpush3.bf16.msra.mxu0 %v18937_v46 }
 0x3f8   : > { %16865 = vmatprep.subr.bf16.mxu0 %v17649_v43 }
 0x3fb   : > { %16867 = vmatpush3.bf16.msra.mxu0 %v18957_v0 }
 0x3fc   : > { %16868 = vmatprep.subr.bf16.mxu0 %v17649_v43 }
 0x3ff   : > { %16870 = vmatpush3.bf16.msra.mxu0 %v18982_v16 }
 0x400   : > { %16871 = vmatprep.subr.bf16.mxu0 %v17649_v43 }
 0x403   : > { %16873 = vmatpush3.bf16.msra.mxu0 %v18994_v20 }
 0x404   : > { %16874 = vmatprep.subr.bf16.mxu0 %v17649_v43 }
 0x491   : > { %v7793_v21 = vpop.f32.mrb[30].mxu0 }
 0x492   : > { %v15370_v22 = vpop.f32.mrb[31].mxu0 }
 0x4b1   : > { %v7863_v23 = vpop.f32.mrb[32].mxu0 }
 0x4b2   : > { %v7864_v25 = vadd.f32 %v7863_v23, %v7793_v21  ;;  %v15405_v26 = vpop.f32.mrb[33].mxu0  ;;  %v8197_v21 = vld [vmem:[#allocation3 + $0x8] sm:$0x1f] }
 0x4b5   : > { %v7936_v28 = vpop.f32.mrb[34].mxu0 }
 0x4b6   : > { %v15410_v29 = vpop.f32.mrb[35].mxu0  ;;  %15444 = vmatmul.mubr.f32.vlgmr.msra.gmra.mrb[90].mxu1 %v7936_v28 }
 0x4b7   : > { %15487 = vmatpush3.msk.msra.mxu1 %vm7549_vm1, %v8196_v32  ;;  %15488 = vmatprep.mubr.msk.f32.mxu1 %vm17650_vm10, %v17647_v1 }
 0x4b8   : > { %15491 = vmatprep.subr.mxu1 %v17647_v1 }
 0x4b9   : > { %v8094_v35 = vpop.f32.mrb[36].mxu0 }
 0x4ba   : > { %15484 = vmatmul.mubr.f32.vlgmr.msra.gmra.mrb[38].mxu0 %v8094_v35  ;;  %15489 = vmatmul.mubr.msk.f32.vlgmr.msra.gmra.mrb[92].mxu1 %vm7546_vm0, %v17770_v9  ;;  %v15450_v38 = vpop.f32.mrb[37].mxu0  ;;  %v8834_v35 = vld [vmem:[#allocation3 + $0x8] sm:$0x1f] }
 0x4bb   : > { %15492 = vmatpush3.msk.msra.mxu1 %vm7549_vm1, %v8196_v32  ;;  %15493 = vmatprep.mubr.msk.f32.mxu1 %vm17650_vm10, %v17647_v1 }
 0x4bc   : > { %16898 = vmatprep.subr.bf16.mxu1 %v17649_v43  ;;  %16876 = vmatpush3.bf16.msra.mxu0 %v18649_v61 }
 0x4bd   : > { %16877 = vmatprep.subr.bf16.mxu0 %v17649_v43  ;;  %15528 = vmatprep.mubr.msk.f32.mxu0 %vm17650_vm10, %v17647_v1 }
 0x4be   : > { %15494 = vmatmul.mubr.msk.f32.vlgmr.msra.gmra.mrb[94].mxu1 %vm7546_vm0, %v17755_v6 }
 0x4bf   : > { %16900 = vmatpush3.bf16.msra.mxu1 %v18742_v30  ;;  %15563 = vmatprep.mubr.msk.f32.mxu1 %vm17650_vm10, %v17647_v1 }
 0x4c0   : > { %16901 = vmatprep.subr.bf16.mxu1 %v17649_v43  ;;  %16879 = vmatpush3.bf16.msra.mxu0 %v18667_v45 }
 0x4c1   : > { %16880 = vmatprep.subr.bf16.mxu0 %v17649_v43 }
 0x4c3   : > { %16903 = vmatpush3.bf16.msra.mxu1 %v18756_v37 }
 0x4c4   : > { %16904 = vmatprep.subr.bf16.mxu1 %v17649_v43  ;;  %16882 = vmatpush3.bf16.msra.mxu0 %v18681_v48 }
 0x4c5   : > { %16883 = vmatprep.subr.bf16.mxu0 %v17649_v43 }
 0x4c7   : > { %16906 = vmatpush3.bf16.msra.mxu1 %v18768_v40 }
 0x4c8   : > { %16907 = vmatprep.subr.bf16.mxu1 %v17649_v43  ;;  %16885 = vmatpush3.bf16.msra.mxu0 %v18691_v51 }
 0x4c9   : > { %16886 = vmatprep.subr.bf16.mxu0 %v17649_v43 }
 0x4cb   : > { %16909 = vmatpush3.bf16.msra.mxu1 %v18778_v42 }
 0x4cc   : > { %16910 = vmatprep.subr.bf16.mxu1 %v17649_v43  ;;  %16888 = vmatpush3.bf16.msra.mxu0 %v18701_v54 }
 0x4cd   : > { %16889 = vmatprep.subr.bf16.mxu0 %v17649_v43 }
 0x4cf   : > { %16912 = vmatpush3.bf16.msra.mxu1 %v18788_v47 }
 0x4d0   : > { %16913 = vmatprep.subr.bf16.mxu1 %v17649_v43  ;;  %16891 = vmatpush3.bf16.msra.mxu0 %v18711_v58 }
 0x4d1   : > { %16892 = vmatprep.subr.bf16.mxu0 %v17649_v43 }
 0x4d3   : > { %16915 = vmatpush3.bf16.msra.mxu1 %v18798_v52 }
 0x4d4   : > { %16916 = vmatprep.subr.bf16.mxu1 %v17649_v43  ;;  %16894 = vmatpush3.bf16.msra.mxu0 %v18722_v4 }
 0x4d5   : > { %16895 = vmatprep.subr.bf16.mxu0 %v17649_v43 }
 0x4d7   : > { %16918 = vmatpush3.bf16.msra.mxu1 %v18808_v57 }
 0x4d8   : > { %16919 = vmatprep.subr.bf16.mxu1 %v17649_v43  ;;  %16897 = vmatpush3.bf16.msra.mxu0 %v18732_v14 }
 0x4d9   : > { %15566 = vmatprep.subr.mxu0 %v17647_v1 }
 0x4db   : > { %16921 = vmatpush3.bf16.msra.mxu1 %v18818_v5 }
 0x4dc   : > { %16922 = vmatprep.subr.bf16.mxu1 %v17649_v43 }
 0x589   : > { %v8023_v39 = vpop.f32.mrb[90].mxu1 }
 0x58a   : > { %v8027_v41 = vadd.f32 %v8023_v39, %v7864_v25  ;;  %v15445_v44 = vpop.f32.mrb[91].mxu1 }
 0x58d   : > { %v8181_v50 = vpop.f32.mrb[38].mxu0  ;;  %v8267_v55 = vpop.f32.mrb[92].mxu1 }
 0x58e   : > { %v8185_v62 = vadd.f32 %v8181_v50, %v8027_v41  ;;  %v15490_v8 = vpop.f32.mrb[93].mxu1  ;;  %15564 = vmatmul.mubr.f32.vlgmr.msra.gmra.mrb[96].mxu1 %v8267_v55  ;;  %v15485_v10 = vpop.f32.mrb[39].mxu0  ;;  %v9550_v41 = vld [vmem:[%s20184_s3 + $0x18] sm:$0xff]  ;;  %v13666_v50 = vld [vmem:[%s20184_s3 + $0xa0] sm:$0xff]  ;;  %v13667_v55 = vld [vmem:[%s20184_s3 + $0xa8] sm:$0xff] }
 0x58f   : > { %16924 = vmatpush3.bf16.msra.mxu1 %v18847_v12  ;;  %15603 = vmatprep.mubr.msk.f32.mxu1 %vm17650_vm10, %v17647_v1  ;;  %v9551_v8 = vld [vmem:[%s20184_s3 + $0x20] sm:$0xff]  ;;  %v9552_v10 = vld [vmem:[%s20184_s3 + $0x28] sm:$0xff] }
 0x590   : > { %v8192_v13 = vadd.f32 %v19049_v49, %v8185_v62  ;;  %16925 = vmatprep.subr.bf16.mxu1 %v17649_v43 }
 0x591   : > { %v8353_v15 = vpop.f32.mrb[94].mxu1 }
 0x592   : > { %v8193_v63 = vmax.f32 %v8192_v13, 0.0  ;;  %v15495_v19 = vpop.f32.mrb[95].mxu1  ;;  %15529 = vmatmul.mubr.f32.vlgmr.msra.gmra.mrb[40].mxu0 %v8353_v15  ;;  %v19266_v13 = vpack.c.bf16 %v13667_v55, %v13666_v50  ;;  %v13668_v15 = vld [vmem:[%s20184_s3 + $0xb0] sm:$0xff] }
 0x593   : > { %15567 = vmatpush3.msk.msra.mxu0 %vm7549_vm1, %v8197_v21  ;;  %15568 = vmatprep.mubr.msk.f32.mxu0 %vm17650_vm10, %v17647_v1  ;;  %v19276_v19 = vpack.c.bf16 %v9552_v10, %v9551_v8  ;;  %v13684_v8 = vld [vmem:[%s20184_s3 + $0x120] sm:$0xff]  ;;  %v13685_v10 = vld [vmem:[%s20184_s3 + $0x128] sm:$0xff] }
 0x594   : > { %8195 = vst.msk [vmem:[#allocation4] sm:$0x3f] %vm8194_vm2, %v8193_v63  ;;  %15606 = vmatprep.subr.mxu0 %v17647_v1  ;;  %16927 = vmatpush3.bf16.msra.mxu1 %v18864_v18  ;;  %v13669_v63 = vld [vmem:[%s20184_s3 + $0xb8] sm:$0xff] }
 0x595   : > { %16928 = vmatprep.subr.bf16.mxu1 %v17649_v43 }
 0x596   : > { %15569 = vmatmul.mubr.msk.f32.vlgmr.msra.gmra.mrb[42].mxu0 %vm7546_vm0, %v17770_v9 }
 0x597   : > { %15607 = vmatpush3.msk.msra.mxu0 %vm7549_vm1, %v8197_v21  ;;  %15608 = vmatprep.mubr.msk.f32.mxu0 %vm17650_vm10, %v17647_v1  ;;  %v9553_v21 = vld [vmem:[%s20184_s3 + $0x30] sm:$0xff] }
 0x598   : > { %16946 = vmatprep.subr.bf16.mxu0 %v17649_v43  ;;  %16930 = vmatpush3.bf16.msra.mxu1 %v18887_v24 }
 0x599   : > { %16931 = vmatprep.subr.bf16.mxu1 %v17649_v43 }
 0x59a   : > { %15609 = vmatmul.mubr.msk.f32.vlgmr.msra.gmra.mrb[44].mxu0 %vm7546_vm0, %v17755_v6 }
 0x59b   : > { %16948 = vmatpush3.bf16.msra.mxu0 %v18858_v17  ;;  %15643 = vmatprep.mubr.msk.f32.mxu0 %vm17650_vm10, %v17647_v1 }
 0x59c   : > { %16949 = vmatprep.subr.bf16.mxu0 %v17649_v43  ;;  %16933 = vmatpush3.bf16.msra.mxu1 %v18907_v31 }
 0x59d   : > { %16934 = vmatprep.subr.bf16.mxu1 %v17649_v43 }
 0x59f   : > { %16951 = vmatpush3.bf16.msra.mxu0 %v18877_v60 }
 0x5a0   : > { %16952 = vmatprep.subr.bf16.mxu0 %v17649_v43  ;;  %16936 = vmatpush3.bf16.msra.mxu1 %v18927_v56 }
 0x5a1   : > { %16937 = vmatprep.subr.bf16.mxu1 %v17649_v43 }
 0x5a3   : > { %16954 = vmatpush3.bf16.msra.mxu0 %v18897_v27 }
 0x5a4   : > { %16955 = vmatprep.subr.bf16.mxu0 %v17649_v43  ;;  %16939 = vmatpush3.bf16.msra.mxu1 %v18947_v53 }
 0x5a5   : > { %16940 = vmatprep.subr.bf16.mxu1 %v17649_v43 }
 0x5a7   : > { %16957 = vmatpush3.bf16.msra.mxu0 %v18917_v36 }
 0x5a8   : > { %16958 = vmatprep.subr.bf16.mxu0 %v17649_v43  ;;  %16942 = vmatpush3.bf16.msra.mxu1 %v18961_v7 }
 0x5a9   : > { %16943 = vmatprep.subr.bf16.mxu1 %v17649_v43 }
 0x5ab   : > { %16960 = vmatpush3.bf16.msra.mxu0 %v18937_v46 }
 0x5ac   : > { %16961 = vmatprep.subr.bf16.mxu0 %v17649_v43  ;;  %16945 = vmatpush3.bf16.msra.mxu1 %v18974_v11 }
 0x5ad   : > { %15646 = vmatprep.subr.mxu1 %v17647_v1 }
 0x5af   : > { %16963 = vmatpush3.bf16.msra.mxu0 %v18957_v0 }
 0x5b0   : > { %16964 = vmatprep.subr.bf16.mxu0 %v17649_v43 }
 0x5b3   : > { %16966 = vmatpush3.bf16.msra.mxu0 %v18982_v16 }
 0x5b4   : > { %16967 = vmatprep.subr.bf16.mxu0 %v17649_v43 }
 0x5b7   : > { %16969 = vmatpush3.bf16.msra.mxu0 %v18994_v20 }
 0x5b8   : > { %16970 = vmatprep.subr.bf16.mxu0 %v17649_v43 }
 0x661   : > { %v8509_v22 = vpop.f32.mrb[96].mxu1 }
 0x662   : > { %v15565_v23 = vpop.f32.mrb[97].mxu1 }
 0x663   : > { %v19286_v23 = vpack.c.bf16 %v13669_v63, %v13668_v15 }
 0x665   : > { %v8439_v25 = vpop.f32.mrb[40].mxu0 }
 0x666   : > { %v8510_v26 = vadd.f32 %v8509_v22, %v8439_v25  ;;  %v15530_v28 = vpop.f32.mrb[41].mxu0  ;;  %v9554_v22 = vld [vmem:[%s20184_s3 + $0x38] sm:$0xff]  ;;  %v13670_v25 = vld [vmem:[%s20184_s3 + $0xc0] sm:$0xff] }
 0x667   : > { %v19296_v28 = vpack.c.bf16 %v9554_v22, %v9553_v21  ;;  %v9473_v21 = vld [vmem:[#allocation3 + $0x18] sm:$0x1f]  ;;  %v13698_v22 = vld [vmem:[%s20184_s3 + $0x180] sm:$0xff] }
 0x669   : > { %v8582_v29 = vpop.f32.mrb[42].mxu0 }
 0x66a   : > { %v15570_v32 = vpop.f32.mrb[43].mxu0  ;;  %15604 = vmatmul.mubr.f32.vlgmr.msra.gmra.mrb[98].mxu1 %v8582_v29  ;;  %v9555_v29 = vld [vmem:[%s20184_s3 + $0x40] sm:$0xff] }
 0x66b   : > { %15647 = vmatpush3.msk.msra.mxu1 %vm7549_vm1, %v8834_v35  ;;  %15648 = vmatprep.mubr.msk.f32.mxu1 %vm17650_vm10, %v17647_v1  ;;  %v9556_v32 = vld [vmem:[%s20184_s3 + $0x48] sm:$0xff] }
 0x66c   : > { %15651 = vmatprep.subr.mxu1 %v17647_v1 }
 0x66d   : > { %v8739_v38 = vpop.f32.mrb[44].mxu0 }
 0x66e   : > { %15644 = vmatmul.mubr.f32.vlgmr.msra.gmra.mrb[46].mxu0 %v8739_v38  ;;  %15649 = vmatmul.mubr.msk.f32.vlgmr.msra.gmra.mrb[100].mxu1 %vm7546_vm0, %v17770_v9  ;;  %v15610_v39 = vpop.f32.mrb[45].mxu0  ;;  %v13672_v38 = vld [vmem:[%s20184_s3 + $0xd0] sm:$0xff] }
 0x66f   : > { %15652 = vmatpush3.msk.msra.mxu1 %vm7549_vm1, %v8834_v35  ;;  %15653 = vmatprep.mubr.msk.f32.mxu1 %vm17650_vm10, %v17647_v1  ;;  %v13673_v39 = vld [vmem:[%s20184_s3 + $0xd8] sm:$0xff] }
 0x670   : > { %16994 = vmatprep.subr.bf16.mxu1 %v17649_v43  ;;  %16972 = vmatpush3.bf16.msra.mxu0 %v18649_v61 }
 0x671   : > { %16973 = vmatprep.subr.bf16.mxu0 %v17649_v43  ;;  %15688 = vmatprep.mubr.msk.f32.mxu0 %vm17650_vm10, %v17647_v1 }
 0x672   : > { %15654 = vmatmul.mubr.msk.f32.vlgmr.msra.gmra.mrb[102].mxu1 %vm7546_vm0, %v17755_v6 }
 0x673   : > { %16996 = vmatpush3.bf16.msra.mxu1 %v18742_v30  ;;  %15723 = vmatprep.mubr.msk.f32.mxu1 %vm17650_vm10, %v17647_v1 }
 0x674   : > { %16997 = vmatprep.subr.bf16.mxu1 %v17649_v43  ;;  %16975 = vmatpush3.bf16.msra.mxu0 %v18667_v45 }
 0x675   : > { %16976 = vmatprep.subr.bf16.mxu0 %v17649_v43 }
 0x677   : > { %16999 = vmatpush3.bf16.msra.mxu1 %v18756_v37 }
 0x678   : > { %17000 = vmatprep.subr.bf16.mxu1 %v17649_v43  ;;  %16978 = vmatpush3.bf16.msra.mxu0 %v18681_v48 }
 0x679   : > { %16979 = vmatprep.subr.bf16.mxu0 %v17649_v43 }
 0x67b   : > { %17002 = vmatpush3.bf16.msra.mxu1 %v18768_v40 }
 0x67c   : > { %17003 = vmatprep.subr.bf16.mxu1 %v17649_v43  ;;  %16981 = vmatpush3.bf16.msra.mxu0 %v18691_v51 }
 0x67d   : > { %16982 = vmatprep.subr.bf16.mxu0 %v17649_v43 }
 0x67f   : > { %17005 = vmatpush3.bf16.msra.mxu1 %v18778_v42 }
 0x680   : > { %17006 = vmatprep.subr.bf16.mxu1 %v17649_v43  ;;  %16984 = vmatpush3.bf16.msra.mxu0 %v18701_v54 }
 0x681   : > { %16985 = vmatprep.subr.bf16.mxu0 %v17649_v43 }
 0x683   : > { %17008 = vmatpush3.bf16.msra.mxu1 %v18788_v47  ;;  %v8835_v47 = vld [vmem:[#allocation3 + $0x10] sm:$0x1f] }
 0x684   : > { %17009 = vmatprep.subr.bf16.mxu1 %v17649_v43  ;;  %16987 = vmatpush3.bf16.msra.mxu0 %v18711_v58 }
 0x685   : > { %16988 = vmatprep.subr.bf16.mxu0 %v17649_v43 }
 0x687   : > { %17011 = vmatpush3.bf16.msra.mxu1 %v18798_v52 }
 0x688   : > { %17012 = vmatprep.subr.bf16.mxu1 %v17649_v43  ;;  %16990 = vmatpush3.bf16.msra.mxu0 %v18722_v4 }
 0x689   : > { %16991 = vmatprep.subr.bf16.mxu0 %v17649_v43 }
 0x68b   : > { %17014 = vmatpush3.bf16.msra.mxu1 %v18808_v57 }
 0x68c   : > { %17015 = vmatprep.subr.bf16.mxu1 %v17649_v43  ;;  %16993 = vmatpush3.bf16.msra.mxu0 %v18732_v14 }
 0x68d   : > { %15726 = vmatprep.subr.mxu0 %v17647_v1 }
 0x68f   : > { %17017 = vmatpush3.bf16.msra.mxu1 %v18818_v5 }
 0x690   : > { %17018 = vmatprep.subr.bf16.mxu1 %v17649_v43 }
 0x73d   : > { %v8668_v61 = vpop.f32.mrb[98].mxu1 }
 0x73e   : > { %v8672_v45 = vadd.f32 %v8668_v61, %v8510_v26  ;;  %v15605_v48 = vpop.f32.mrb[99].mxu1  ;;  %v13671_v26 = vld [vmem:[%s20184_s3 + $0xc8] sm:$0xff]  ;;  %v19316_v61 = vpack.c.bf16 %v9556_v32, %v9555_v29  ;;  %v13686_v29 = vld [vmem:[%s20184_s3 + $0x130] sm:$0xff]  ;;  %v13687_v32 = vld [vmem:[%s20184_s3 + $0x138] sm:$0xff] }
 0x73f   : > { %v19306_v35 = vpack.c.bf16 %v13671_v26, %v13670_v25  ;;  %v9558_v48 = vld [vmem:[%s20184_s3 + $0x58] sm:$0xff]  ;;  %v13699_v25 = vld [vmem:[%s20184_s3 + $0x188] sm:$0xff]  ;;  %v19417_v26 = vpack.c.bf16 %v13685_v10, %v13684_v8  ;;  %v13694_v8 = vld [vmem:[%s20184_s3 + $0x170] sm:$0xff] }
 0x740   : > { %v13695_v10 = vld [vmem:[%s20184_s3 + $0x178] sm:$0xff] }
 0x741   : > { %v8825_v51 = vpop.f32.mrb[46].mxu0  ;;  %v8905_v54 = vpop.f32.mrb[100].mxu1 }
 0x742   : > { %v8829_v58 = vadd.f32 %v8825_v51, %v8672_v45  ;;  %v15650_v4 = vpop.f32.mrb[101].mxu1  ;;  %15724 = vmatmul.mubr.f32.vlgmr.msra.gmra.mrb[104].mxu1 %v8905_v54  ;;  %v15645_v30 = vpop.f32.mrb[47].mxu0  ;;  %v9557_v45 = vld [vmem:[%s20184_s3 + $0x50] sm:$0xff]  ;;  %v19326_v51 = vpack.c.bf16 %v13673_v39, %v13672_v38  ;;  %v19431_v38 = vpack.c.bf16 %v13699_v25, %v13698_v22 }
 0x743   : > { %17020 = vmatpush3.bf16.msra.mxu1 %v18847_v12  ;;  %15763 = vmatprep.mubr.msk.f32.mxu1 %vm17650_vm10, %v17647_v1  ;;  %v19330_v54 = vpack.c.bf16 %v9558_v48, %v9557_v45  ;;  %v9560_v4 = vld [vmem:[%s20184_s3 + $0x68] sm:$0xff]  ;;  %v13700_v39 = vld [vmem:[%s20184_s3 + $0x190] sm:$0xff]  ;;  %v13701_v45 = vld [vmem:[%s20184_s3 + $0x198] sm:$0xff]  ;;  %v19441_v48 = vpack.c.bf16 %v13687_v32, %v13686_v29 }
 0x744   : > { %v8830_v14 = vadd.f32 %v19049_v49, %v8829_v58  ;;  %17021 = vmatprep.subr.bf16.mxu1 %v17649_v43  ;;  %v9559_v58 = vld [vmem:[%s20184_s3 + $0x60] sm:$0xff]  ;;  %v13712_v25 = vld [vmem:[%s20184_s3 + $0x1f0] sm:$0xff]  ;;  %v13713_v29 = vld [vmem:[%s20184_s3 + $0x1f8] sm:$0xff] }
 0x745   : > { %v8991_v37 = vpop.f32.mrb[102].mxu1  ;;  %v19342_v30 = vpack.c.bf16 %v9560_v4, %v9559_v58  ;;  %v13688_v58 = vld [vmem:[%s20184_s3 + $0x140] sm:$0xff]  ;;  %v13689_v4 = vld [vmem:[%s20184_s3 + $0x148] sm:$0xff]  ;;  %v19552_v32 = vpack.c.bf16 %v13713_v29, %v13712_v25 }
 0x746   : > { %v8831_v40 = vmax.f32 %v8830_v14, 0.0  ;;  %v15655_v42 = vpop.f32.mrb[103].mxu1  ;;  %15689 = vmatmul.mubr.f32.vlgmr.msra.gmra.mrb[48].mxu0 %v8991_v37  ;;  %v13674_v14 = vld [vmem:[%s20184_s3 + $0xe0] sm:$0xff]  ;;  %v13675_v37 = vld [vmem:[%s20184_s3 + $0xe8] sm:$0xff] }
 0x747   : > { %15727 = vmatpush3.msk.msra.mxu0 %vm7549_vm1, %v8835_v47  ;;  %15728 = vmatprep.mubr.msk.f32.mxu0 %vm17650_vm10, %v17647_v1  ;;  %v9561_v42 = vld [vmem:[%s20184_s3 + $0x70] sm:$0xff] }
 0x748   : > { %8833 = vst.msk [vmem:[#allocation4 + $0x8] sm:$0x3f] %vm8194_vm2, %v8831_v40  ;;  %15766 = vmatprep.subr.mxu0 %v17647_v1  ;;  %17023 = vmatpush3.bf16.msra.mxu1 %v18864_v18  ;;  %v19353_v40 = vpack.c.bf16 %v13675_v37, %v13674_v14  ;;  %v19453_v14 = vpack.c.bf16 %v13701_v45, %v13700_v39  ;;  %v13702_v37 = vld [vmem:[%s20184_s3 + $0x1a0] sm:$0xff] }
 0x749   : > { %17024 = vmatprep.subr.bf16.mxu1 %v17649_v43 }
 0x74a   : > { %15729 = vmatmul.mubr.msk.f32.vlgmr.msra.gmra.mrb[50].mxu0 %vm7546_vm0, %v17770_v9 }
 0x74b   : > { %15767 = vmatpush3.msk.msra.mxu0 %vm7549_vm1, %v8835_v47  ;;  %15768 = vmatprep.mubr.msk.f32.mxu0 %vm17650_vm10, %v17647_v1  ;;  %v9562_v47 = vld [vmem:[%s20184_s3 + $0x78] sm:$0xff] }
 0x74c   : > { %17042 = vmatprep.subr.bf16.mxu0 %v17649_v43  ;;  %17026 = vmatpush3.bf16.msra.mxu1 %v18887_v24  ;;  %v13663_v24 = vld [vmem:[%s20184_s3 + $0x88] sm:$0xff] }
 0x74d   : > { %17027 = vmatprep.subr.bf16.mxu1 %v17649_v43 }
 0x74e   : > { %15769 = vmatmul.mubr.msk.f32.vlgmr.msra.gmra.mrb[52].mxu0 %vm7546_vm0, %v17755_v6 }
 0x74f   : > { %17044 = vmatpush3.bf16.msra.mxu0 %v18858_v17  ;;  %15803 = vmatprep.mubr.msk.f32.mxu0 %vm17650_vm10, %v17647_v1 }
 0x750   : > { %17045 = vmatprep.subr.bf16.mxu0 %v17649_v43  ;;  %17029 = vmatpush3.bf16.msra.mxu1 %v18907_v31  ;;  %v9472_v31 = vld [vmem:[#allocation3 + $0x10] sm:$0x1f] }
 0x751   : > { %17030 = vmatprep.subr.bf16.mxu1 %v17649_v43 }
 0x753   : > { %17047 = vmatpush3.bf16.msra.mxu0 %v18877_v60  ;;  %v13662_v60 = vld [vmem:[%s20184_s3 + $0x80] sm:$0xff] }
 0x754   : > { %17048 = vmatprep.subr.bf16.mxu0 %v17649_v43  ;;  %17032 = vmatpush3.bf16.msra.mxu1 %v18927_v56  ;;  %v9548_v56 = vld [vmem:[%s20184_s3 + $0x8] sm:$0xff] }
 0x755   : > { %17033 = vmatprep.subr.bf16.mxu1 %v17649_v43 }
 0x757   : > { %17050 = vmatpush3.bf16.msra.mxu0 %v18897_v27 }
 0x758   : > { %17051 = vmatprep.subr.bf16.mxu0 %v17649_v43  ;;  %17035 = vmatpush3.bf16.msra.mxu1 %v18947_v53 }
 0x759   : > { %17036 = vmatprep.subr.bf16.mxu1 %v17649_v43 }
 0x75b   : > { %17053 = vmatpush3.bf16.msra.mxu0 %v18917_v36  ;;  %v9547_v36 = vld [vmem:[%s20184_s3] sm:$0xff] }
 0x75c   : > { %17054 = vmatprep.subr.bf16.mxu0 %v17649_v43  ;;  %17038 = vmatpush3.bf16.msra.mxu1 %v18961_v7  ;;  %v13665_v7 = vld [vmem:[%s20184_s3 + $0x98] sm:$0xff] }
 0x75d   : > { %17039 = vmatprep.subr.bf16.mxu1 %v17649_v43 }
 0x75f   : > { %17056 = vmatpush3.bf16.msra.mxu0 %v18937_v46  ;;  %v19217_v46 = vpack.c.bf16 %v13663_v24, %v13662_v60  ;;  %v13681_v60 = vld [vmem:[%s20184_s3 + $0x108] sm:$0xff] }
 0x760   : > { %17057 = vmatprep.subr.bf16.mxu0 %v17649_v43  ;;  %17041 = vmatpush3.bf16.msra.mxu1 %v18974_v11 }
 0x761   : > { %15806 = vmatprep.subr.mxu1 %v17647_v1 }
 0x763   : > { %17059 = vmatpush3.bf16.msra.mxu0 %v18957_v0  ;;  %v13664_v0 = vld [vmem:[%s20184_s3 + $0x90] sm:$0xff] }
 0x764   : > { %17060 = vmatprep.subr.bf16.mxu0 %v17649_v43  ;;  %v19240_v44 = vpack.c.bf16 %v13665_v7, %v13664_v0  ;;  %v13682_v0 = vld [vmem:[%s20184_s3 + $0x110] sm:$0xff]  ;;  %v13683_v7 = vld [vmem:[%s20184_s3 + $0x118] sm:$0xff] }
 0x765   : > { %v19397_v50 = vpack.c.bf16 %v13683_v7, %v13682_v0  ;;  %v13692_v7 = vld [vmem:[%s20184_s3 + $0x160] sm:$0xff] }
 0x767   : > { %17062 = vmatpush3.bf16.msra.mxu0 %v18982_v16  ;;  %v19230_v16 = vpack.c.bf16 %v9548_v56, %v9547_v36 }
 0x768   : > { %17063 = vmatprep.subr.bf16.mxu0 %v17649_v43 }
 0x76b   : > { %17065 = vmatpush3.bf16.msra.mxu0 %v18994_v20  ;;  %v9549_v20 = vld [vmem:[%s20184_s3 + $0x10] sm:$0xff] }
 0x76c   : > { %17066 = vmatprep.subr.bf16.mxu0 %v17649_v43  ;;  %v19254_v62 = vpack.c.bf16 %v9550_v41, %v9549_v20 }
 0x815   : > { %v9147_v52 = vpop.f32.mrb[104].mxu1 }
 0x816   : > { %v15725_v57 = vpop.f32.mrb[105].mxu1 }
 0x817   : > { %v13676_v57 = vld [vmem:[%s20184_s3 + $0xf0] sm:$0xff] }
 0x819   : > { %v9077_v5 = vpop.f32.mrb[48].mxu0 }
 0x81a   : > { %v19199_v12 = vadd.f32 %v9147_v52, %v9077_v5  ;;  %v15690_v17 = vpop.f32.mrb[49].mxu0  ;;  %v19361_v52 = vpack.c.bf16 %v9562_v47, %v9561_v42  ;;  %v13677_v5 = vld [vmem:[%s20184_s3 + $0xf8] sm:$0xff]  ;;  %v13703_v42 = vld [vmem:[%s20184_s3 + $0x1a8] sm:$0xff]  ;;  %v19465_v47 = vpack.c.bf16 %v13689_v4, %v13688_v58 }
 0x81b   : > { %v19372_v17 = vpack.c.bf16 %v13677_v5, %v13676_v57  ;;  %v13690_v57 = vld [vmem:[%s20184_s3 + $0x150] sm:$0xff]  ;;  %v13691_v5 = vld [vmem:[%s20184_s3 + $0x158] sm:$0xff] }
 0x81d   : > { %v9220_v18 = vpop.f32.mrb[50].mxu0 }
 0x81e   : > { %v15730_v27 = vpop.f32.mrb[51].mxu0  ;;  %15764 = vmatmul.mubr.f32.vlgmr.msra.gmra.mrb[106].mxu1 %v9220_v18  ;;  %v13680_v18 = vld [vmem:[%s20184_s3 + $0x100] sm:$0xff] }
 0x81f   : > { %15807 = vmatpush3.msk.msra.mxu1 %vm7549_vm1, %v9472_v31  ;;  %15808 = vmatprep.mubr.msk.f32.mxu1 %vm17650_vm10, %v17647_v1  ;;  %v19384_v36 = vpack.c.bf16 %v13681_v60, %v13680_v18  ;;  %v19475_v18 = vpack.c.bf16 %v13703_v42, %v13702_v37  ;;  %v13704_v60 = vld [vmem:[%s20184_s3 + $0x1b0] sm:$0xff] }
 0x820   : > { %15811 = vmatprep.subr.mxu1 %v17647_v1 }
 0x821   : > { %v9377_v53 = vpop.f32.mrb[52].mxu0 }
 0x822   : > { %15804 = vmatmul.mubr.f32.vlgmr.msra.gmra.mrb[54].mxu0 %v9377_v53  ;;  %15809 = vmatmul.mubr.msk.f32.vlgmr.msra.gmra.mrb[108].mxu1 %vm7546_vm0, %v17770_v9  ;;  %v15770_v11 = vpop.f32.mrb[53].mxu0 }
 0x823   : > { %15812 = vmatpush3.msk.msra.mxu1 %vm7549_vm1, %v9472_v31  ;;  %15813 = vmatprep.mubr.msk.f32.mxu1 %vm17650_vm10, %v17647_v1 }
 0x824   : > { %17090 = vmatprep.subr.bf16.mxu1 %v17649_v43  ;;  %17068 = vmatpush3.bf16.msra.mxu0 %v19217_v46 }
 0x825   : > { %17069 = vmatprep.subr.bf16.mxu0 %v17649_v43  ;;  %15848 = vmatprep.mubr.msk.f32.mxu0 %vm17650_vm10, %v17647_v1 }
 0x826   : > { %15814 = vmatmul.mubr.msk.f32.vlgmr.msra.gmra.mrb[110].mxu1 %vm7546_vm0, %v17755_v6 }
 0x827   : > { %17092 = vmatpush3.bf16.msra.mxu1 %v19230_v16  ;;  %15883 = vmatprep.mubr.msk.f32.mxu1 %vm17650_vm10, %v17647_v1 }
 0x828   : > { %17093 = vmatprep.subr.bf16.mxu1 %v17649_v43  ;;  %17071 = vmatpush3.bf16.msra.mxu0 %v19240_v44 }
 0x829   : > { %17072 = vmatprep.subr.bf16.mxu0 %v17649_v43 }
 0x82b   : > { %17095 = vmatpush3.bf16.msra.mxu1 %v19254_v62 }
 0x82c   : > { %17096 = vmatprep.subr.bf16.mxu1 %v17649_v43  ;;  %17074 = vmatpush3.bf16.msra.mxu0 %v19266_v13 }
 0x82d   : > { %17075 = vmatprep.subr.bf16.mxu0 %v17649_v43 }
 0x82f   : > { %17098 = vmatpush3.bf16.msra.mxu1 %v19276_v19 }
 0x830   : > { %17099 = vmatprep.subr.bf16.mxu1 %v17649_v43  ;;  %17077 = vmatpush3.bf16.msra.mxu0 %v19286_v23 }
 0x831   : > { %17078 = vmatprep.subr.bf16.mxu0 %v17649_v43 }
 0x833   : > { %17101 = vmatpush3.bf16.msra.mxu1 %v19296_v28 }
 0x834   : > { %17102 = vmatprep.subr.bf16.mxu1 %v17649_v43  ;;  %17080 = vmatpush3.bf16.msra.mxu0 %v19306_v35 }
 0x835   : > { %17081 = vmatprep.subr.bf16.mxu0 %v17649_v43 }
 0x837   : > { %17104 = vmatpush3.bf16.msra.mxu1 %v19316_v61 }
 0x838   : > { %17105 = vmatprep.subr.bf16.mxu1 %v17649_v43  ;;  %17083 = vmatpush3.bf16.msra.mxu0 %v19326_v51 }
 0x839   : > { %17084 = vmatprep.subr.bf16.mxu0 %v17649_v43 }
 0x83b   : > { %17107 = vmatpush3.bf16.msra.mxu1 %v19330_v54 }
 0x83c   : > { %17108 = vmatprep.subr.bf16.mxu1 %v17649_v43  ;;  %17086 = vmatpush3.bf16.msra.mxu0 %v19353_v40 }
 0x83d   : > { %17087 = vmatprep.subr.bf16.mxu0 %v17649_v43 }
 0x83f   : > { %17110 = vmatpush3.bf16.msra.mxu1 %v19342_v30 }
 0x840   : > { %17111 = vmatprep.subr.bf16.mxu1 %v17649_v43  ;;  %17089 = vmatpush3.bf16.msra.mxu0 %v19372_v17 }
 0x841   : > { %15886 = vmatprep.subr.mxu0 %v17647_v1 }
 0x843   : > { %17113 = vmatpush3.bf16.msra.mxu1 %v19361_v52 }
 0x844   : > { %17114 = vmatprep.subr.bf16.mxu1 %v17649_v43 }
 0x8f1   : > { %v9306_v24 = vpop.f32.mrb[106].mxu1 }
 0x8f2   : > { %v9310_v27 = vadd.f32 %v9306_v24, %v19199_v12  ;;  %v15765_v31 = vpop.f32.mrb[107].mxu1  ;;  %v13705_v24 = vld [vmem:[%s20184_s3 + $0x1b8] sm:$0xff] }
 0x8f3   : > { %v19489_v31 = vpack.c.bf16 %v13705_v24, %v13704_v60 }
 0x8f5   : > { %v9463_v56 = vpop.f32.mrb[54].mxu0  ;;  %v9543_v53 = vpop.f32.mrb[108].mxu1 }
 0x8f6   : > { %v9467_v11 = vadd.f32 %v9463_v56, %v9310_v27  ;;  %v15810_v20 = vpop.f32.mrb[109].mxu1  ;;  %15884 = vmatmul.mubr.f32.vlgmr.msra.gmra.mrb[112].mxu1 %v9543_v53  ;;  %v15805_v41 = vpop.f32.mrb[55].mxu0  ;;  %v19485_v27 = vpack.c.bf16 %v13691_v5, %v13690_v57  ;;  %v13706_v56 = vld [vmem:[%s20184_s3 + $0x1c0] sm:$0xff]  ;;  %v13707_v53 = vld [vmem:[%s20184_s3 + $0x1c8] sm:$0xff]  ;;  %v10110_v5 = vld [vmem:[#allocation3 + $0x18] sm:$0x1f] }
 0x8f7   : > { %17116 = vmatpush3.bf16.msra.mxu1 %v19384_v36  ;;  %15923 = vmatprep.mubr.msk.f32.mxu1 %vm17650_vm10, %v17647_v1  ;;  %v19501_v0 = vpack.c.bf16 %v13707_v53, %v13706_v56  ;;  %v13708_v41 = vld [vmem:[%s20184_s3 + $0x1d0] sm:$0xff] }
 0x8f8   : > { %v9468_v12 = vadd.f32 %v19049_v49, %v9467_v11  ;;  %17117 = vmatprep.subr.bf16.mxu1 %v17649_v43  ;;  %v13693_v11 = vld [vmem:[%s20184_s3 + $0x168] sm:$0xff] }
 0x8f9   : > { %v9629_v55 = vpop.f32.mrb[110].mxu1  ;;  %v19512_v20 = vpack.c.bf16 %v13693_v11, %v13692_v7 }
 0x8fa   : > { %v9469_v15 = vmax.f32 %v9468_v12, 0.0  ;;  %v15815_v63 = vpop.f32.mrb[111].mxu1  ;;  %15849 = vmatmul.mubr.f32.vlgmr.msra.gmra.mrb[56].mxu0 %v9629_v55  ;;  %v13709_v12 = vld [vmem:[%s20184_s3 + $0x1d8] sm:$0xff] }
 0x8fb   : > { %15887 = vmatpush3.msk.msra.mxu0 %vm7549_vm1, %v9473_v21  ;;  %15888 = vmatprep.mubr.msk.f32.mxu0 %vm17650_vm10, %v17647_v1  ;;  %v19520_v55 = vpack.c.bf16 %v13709_v12, %v13708_v41  ;;  %v13710_v63 = vld [vmem:[%s20184_s3 + $0x1e0] sm:$0xff] }
 0x8fc   : > { %9471 = vst.msk [vmem:[#allocation4 + $0x10] sm:$0x3f] %vm8194_vm2, %v9469_v15  ;;  %15926 = vmatprep.subr.mxu0 %v17647_v1  ;;  %17119 = vmatpush3.bf16.msra.mxu1 %v19397_v50  ;;  %v19531_v15 = vpack.c.bf16 %v13695_v10, %v13694_v8 }
 0x8fd   : > { %17120 = vmatprep.subr.bf16.mxu1 %v17649_v43 }
 0x8fe   : > { %15889 = vmatmul.mubr.msk.f32.vlgmr.msra.gmra.mrb[58].mxu0 %vm7546_vm0, %v17770_v9 }
 0x8ff   : > { %15927 = vmatpush3.msk.msra.mxu0 %vm7549_vm1, %v9473_v21  ;;  %15928 = vmatprep.mubr.msk.f32.mxu0 %vm17650_vm10, %v17647_v1  ;;  %v13711_v21 = vld [vmem:[%s20184_s3 + $0x1e8] sm:$0xff] }
 0x900   : > { %17138 = vmatprep.subr.bf16.mxu0 %v17649_v43  ;;  %17122 = vmatpush3.bf16.msra.mxu1 %v19417_v26  ;;  %v19540_v22 = vpack.c.bf16 %v13711_v21, %v13710_v63 }
 0x901   : > { %17123 = vmatprep.subr.bf16.mxu1 %v17649_v43 }
 0x902   : > { %15929 = vmatmul.mubr.msk.f32.vlgmr.msra.gmra.mrb[60].mxu0 %vm7546_vm0, %v17755_v6 }
 0x903   : > { %17140 = vmatpush3.bf16.msra.mxu0 %v19431_v38  ;;  %15963 = vmatprep.mubr.msk.f32.mxu0 %vm17650_vm10, %v17647_v1 }
 0x904   : > { %17141 = vmatprep.subr.bf16.mxu0 %v17649_v43  ;;  %17125 = vmatpush3.bf16.msra.mxu1 %v19441_v48 }
 0x905   : > { %17126 = vmatprep.subr.bf16.mxu1 %v17649_v43 }
 0x907   : > { %17143 = vmatpush3.bf16.msra.mxu0 %v19453_v14 }
 0x908   : > { %17144 = vmatprep.subr.bf16.mxu0 %v17649_v43  ;;  %17128 = vmatpush3.bf16.msra.mxu1 %v19465_v47 }
 0x909   : > { %17129 = vmatprep.subr.bf16.mxu1 %v17649_v43 }
 0x90b   : > { %17146 = vmatpush3.bf16.msra.mxu0 %v19475_v18 }
 0x90c   : > { %17147 = vmatprep.subr.bf16.mxu0 %v17649_v43  ;;  %17131 = vmatpush3.bf16.msra.mxu1 %v19485_v27 }
 0x90d   : > { %17132 = vmatprep.subr.bf16.mxu1 %v17649_v43 }
 0x90f   : > { %17149 = vmatpush3.bf16.msra.mxu0 %v19489_v31 }
 0x910   : > { %17150 = vmatprep.subr.bf16.mxu0 %v17649_v43  ;;  %17134 = vmatpush3.bf16.msra.mxu1 %v19512_v20 }
 0x911   : > { %17135 = vmatprep.subr.bf16.mxu1 %v17649_v43 }
 0x913   : > { %17152 = vmatpush3.bf16.msra.mxu0 %v19501_v0 }
 0x914   : > { %17153 = vmatprep.subr.bf16.mxu0 %v17649_v43  ;;  %17137 = vmatpush3.bf16.msra.mxu1 %v19531_v15 }
 0x915   : > { %15966 = vmatprep.subr.mxu1 %v17647_v1 }
 0x917   : > { %17155 = vmatpush3.bf16.msra.mxu0 %v19520_v55 }
 0x918   : > { %17156 = vmatprep.subr.bf16.mxu0 %v17649_v43 }
 0x91b   : > { %17158 = vmatpush3.bf16.msra.mxu0 %v19540_v22 }
 0x91c   : > { %17159 = vmatprep.subr.bf16.mxu0 %v17649_v43 }
 0x91f   : > { %17161 = vmatpush3.bf16.msra.mxu0 %v19552_v32 }
 0x920   : > { %17162 = vmatprep.subr.bf16.mxu0 %v17649_v43 }
 0x9c9   : > { %v9785_v39 = vpop.f32.mrb[112].mxu1 }
 0x9ca   : > { %v15885_v45 = vpop.f32.mrb[113].mxu1 }
 0x9cd   : > { %v9715_v58 = vpop.f32.mrb[56].mxu0 }
 0x9ce   : > { %v9786_v4 = vadd.f32 %v9785_v39, %v9715_v58  ;;  %v15850_v37 = vpop.f32.mrb[57].mxu0  ;;  %v10111_v39 = vld [vmem:[#allocation3 + $0x20] sm:$0x1f] }
 0x9d1   : > { %v9858_v42 = vpop.f32.mrb[58].mxu0 }
 0x9d2   : > { %v15890_v57 = vpop.f32.mrb[59].mxu0  ;;  %15924 = vmatmul.mubr.f32.vlgmr.msra.gmra.mrb[114].mxu1 %v9858_v42 }
 0x9d3   : > { %15967 = vmatpush3.msk.msra.mxu1 %vm7549_vm1, %v10110_v5  ;;  %15968 = vmatprep.mubr.msk.f32.mxu1 %vm17650_vm10, %v17647_v1 }
 0x9d4   : > { %15971 = vmatprep.subr.mxu1 %v17647_v1 }
 0x9d5   : > { %v10015_v60 = vpop.f32.mrb[60].mxu0 }
 0x9d6   : > { %15964 = vmatmul.mubr.f32.vlgmr.msra.gmra.mrb[62].mxu0 %v10015_v60  ;;  %15969 = vmatmul.mubr.msk.f32.vlgmr.msra.gmra.mrb[116].mxu1 %vm7546_vm0, %v17770_v9  ;;  %v15930_v24 = vpop.f32.mrb[61].mxu0 }
 0x9d7   : > { %15972 = vmatpush3.msk.msra.mxu1 %vm7549_vm1, %v10110_v5  ;;  %15973 = vmatprep.mubr.msk.f32.mxu1 %vm17650_vm10, %v17647_v1  ;;  %v10748_v5 = vld [vmem:[#allocation3 + $0x20] sm:$0x1f] }
 0x9d8   : > { %17186 = vmatprep.subr.bf16.mxu1 %v17649_v43  ;;  %17164 = vmatpush3.bf16.msra.mxu0 %v19217_v46 }
 0x9d9   : > { %17165 = vmatprep.subr.bf16.mxu0 %v17649_v43  ;;  %16008 = vmatprep.mubr.msk.f32.mxu0 %vm17650_vm10, %v17647_v1 }
 0x9da   : > { %15974 = vmatmul.mubr.msk.f32.vlgmr.msra.gmra.mrb[118].mxu1 %vm7546_vm0, %v17755_v6 }
 0x9db   : > { %17188 = vmatpush3.bf16.msra.mxu1 %v19230_v16  ;;  %16043 = vmatprep.mubr.msk.f32.mxu1 %vm17650_vm10, %v17647_v1 }
 0x9dc   : > { %17189 = vmatprep.subr.bf16.mxu1 %v17649_v43  ;;  %17167 = vmatpush3.bf16.msra.mxu0 %v19240_v44 }
 0x9dd   : > { %17168 = vmatprep.subr.bf16.mxu0 %v17649_v43 }
 0x9df   : > { %17191 = vmatpush3.bf16.msra.mxu1 %v19254_v62 }
 0x9e0   : > { %17192 = vmatprep.subr.bf16.mxu1 %v17649_v43  ;;  %17170 = vmatpush3.bf16.msra.mxu0 %v19266_v13 }
 0x9e1   : > { %17171 = vmatprep.subr.bf16.mxu0 %v17649_v43 }
 0x9e3   : > { %17194 = vmatpush3.bf16.msra.mxu1 %v19276_v19 }
 0x9e4   : > { %17195 = vmatprep.subr.bf16.mxu1 %v17649_v43  ;;  %17173 = vmatpush3.bf16.msra.mxu0 %v19286_v23 }
 0x9e5   : > { %17174 = vmatprep.subr.bf16.mxu0 %v17649_v43 }
 0x9e7   : > { %17197 = vmatpush3.bf16.msra.mxu1 %v19296_v28 }
 0x9e8   : > { %17198 = vmatprep.subr.bf16.mxu1 %v17649_v43  ;;  %17176 = vmatpush3.bf16.msra.mxu0 %v19306_v35 }
 0x9e9   : > { %17177 = vmatprep.subr.bf16.mxu0 %v17649_v43 }
 0x9eb   : > { %17200 = vmatpush3.bf16.msra.mxu1 %v19316_v61 }
 0x9ec   : > { %17201 = vmatprep.subr.bf16.mxu1 %v17649_v43  ;;  %17179 = vmatpush3.bf16.msra.mxu0 %v19326_v51 }
 0x9ed   : > { %17180 = vmatprep.subr.bf16.mxu0 %v17649_v43 }
 0x9ef   : > { %17203 = vmatpush3.bf16.msra.mxu1 %v19330_v54 }
 0x9f0   : > { %17204 = vmatprep.subr.bf16.mxu1 %v17649_v43  ;;  %17182 = vmatpush3.bf16.msra.mxu0 %v19353_v40 }
 0x9f1   : > { %17183 = vmatprep.subr.bf16.mxu0 %v17649_v43 }
 0x9f3   : > { %17206 = vmatpush3.bf16.msra.mxu1 %v19342_v30 }
 0x9f4   : > { %17207 = vmatprep.subr.bf16.mxu1 %v17649_v43  ;;  %17185 = vmatpush3.bf16.msra.mxu0 %v19372_v17 }
 0x9f5   : > { %16046 = vmatprep.subr.mxu0 %v17647_v1 }
 0x9f7   : > { %17209 = vmatpush3.bf16.msra.mxu1 %v19361_v52 }
 0x9f8   : > { %17210 = vmatprep.subr.bf16.mxu1 %v17649_v43 }
 0xaa5   : > { %v9944_v56 = vpop.f32.mrb[114].mxu1 }
 0xaa6   : > { %v9948_v53 = vadd.f32 %v9944_v56, %v9786_v4  ;;  %v15925_v7 = vpop.f32.mrb[115].mxu1 }
 0xaa7   : > { %v11478_v7 = vld [vmem:[%s20186_s5 + $0x18] sm:$0xff] }
 0xaa9   : > { %v10101_v11 = vpop.f32.mrb[62].mxu0  ;;  %v10181_v41 = vpop.f32.mrb[116].mxu1 }
 0xaaa   : > { %v10105_v12 = vadd.f32 %v10101_v11, %v9948_v53  ;;  %v15970_v8 = vpop.f32.mrb[117].mxu1  ;;  %16044 = vmatmul.mubr.f32.vlgmr.msra.gmra.mrb[120].mxu1 %v10181_v41  ;;  %v15965_v10 = vpop.f32.mrb[63].mxu0  ;;  %v11477_v53 = vld [vmem:[%s20186_s5 + $0x10] sm:$0xff] }
 0xaab   : > { %17212 = vmatpush3.bf16.msra.mxu1 %v19384_v36  ;;  %16083 = vmatprep.mubr.msk.f32.mxu1 %vm17650_vm10, %v17647_v1  ;;  %v17358_v41 = vpack.c.bf16 %v11478_v7, %v11477_v53  ;;  %v11480_v8 = vld [vmem:[%s20186_s5 + $0x28] sm:$0xff]  ;;  %v13864_v53 = vld [vmem:[%s20186_s5 + $0xe0] sm:$0xff] }
 0xaac   : > { %v10106_v63 = vadd.f32 %v19049_v49, %v10105_v12  ;;  %17213 = vmatprep.subr.bf16.mxu1 %v17649_v43  ;;  %v11479_v12 = vld [vmem:[%s20186_s5 + $0x20] sm:$0xff]  ;;  %v13865_v7 = vld [vmem:[%s20186_s5 + $0xe8] sm:$0xff] }
 0xaad   : > { %v10267_v21 = vpop.f32.mrb[118].mxu1  ;;  %v17361_v10 = vpack.c.bf16 %v11480_v8, %v11479_v12  ;;  %v17397_v12 = vpack.c.bf16 %v13865_v7, %v13864_v53  ;;  %v13866_v8 = vld [vmem:[%s20186_s5 + $0xf0] sm:$0xff] }
 0xaae   : > { %v10107_v25 = vmax.f32 %v10106_v63, 0.0  ;;  %v15975_v29 = vpop.f32.mrb[119].mxu1  ;;  %16009 = vmatmul.mubr.f32.vlgmr.msra.gmra.mrb[64].mxu0 %v10267_v21  ;;  %v11481_v63 = vld [vmem:[%s20186_s5 + $0x30] sm:$0xff]  ;;  %v11482_v21 = vld [vmem:[%s20186_s5 + $0x38] sm:$0xff] }
 0xaaf   : > { %16047 = vmatpush3.msk.msra.mxu0 %vm7549_vm1, %v10111_v39  ;;  %16048 = vmatprep.mubr.msk.f32.mxu0 %vm17650_vm10, %v17647_v1  ;;  %v13833_v29 = vld [vmem:[%s20186_s5 + $0x40] sm:$0xff] }
 0xab0   : > { %10109 = vst.msk [vmem:[#allocation4 + $0x18] sm:$0x3f] %vm8194_vm2, %v10107_v25  ;;  %16086 = vmatprep.subr.mxu0 %v17647_v1  ;;  %17215 = vmatpush3.bf16.msra.mxu1 %v19397_v50  ;;  %v17364_v25 = vpack.c.bf16 %v11482_v21, %v11481_v63  ;;  %v13872_v21 = vld [vmem:[%s20186_s5 + $0x108] sm:$0xff] }
 0xab1   : > { %17216 = vmatprep.subr.bf16.mxu1 %v17649_v43 }
 0xab2   : > { %16049 = vmatmul.mubr.msk.f32.vlgmr.msra.gmra.mrb[66].mxu0 %vm7546_vm0, %v17770_v9 }
 0xab3   : > { %16087 = vmatpush3.msk.msra.mxu0 %vm7549_vm1, %v10111_v39  ;;  %16088 = vmatprep.mubr.msk.f32.mxu0 %vm17650_vm10, %v17647_v1  ;;  %v13834_v39 = vld [vmem:[%s20186_s5 + $0x48] sm:$0xff] }
 0xab4   : > { %17234 = vmatprep.subr.bf16.mxu0 %v17649_v43  ;;  %17218 = vmatpush3.bf16.msra.mxu1 %v19417_v26 }
 0xab5   : > { %17219 = vmatprep.subr.bf16.mxu1 %v17649_v43 }
 0xab6   : > { %16089 = vmatmul.mubr.msk.f32.vlgmr.msra.gmra.mrb[68].mxu0 %vm7546_vm0, %v17755_v6 }
 0xab7   : > { %17236 = vmatpush3.bf16.msra.mxu0 %v19431_v38  ;;  %16123 = vmatprep.mubr.msk.f32.mxu0 %vm17650_vm10, %v17647_v1 }
 0xab8   : > { %17237 = vmatprep.subr.bf16.mxu0 %v17649_v43  ;;  %17221 = vmatpush3.bf16.msra.mxu1 %v19441_v48 }
 0xab9   : > { %17222 = vmatprep.subr.bf16.mxu1 %v17649_v43 }
 0xabb   : > { %17239 = vmatpush3.bf16.msra.mxu0 %v19453_v14 }
 0xabc   : > { %17240 = vmatprep.subr.bf16.mxu0 %v17649_v43  ;;  %17224 = vmatpush3.bf16.msra.mxu1 %v19465_v47 }
 0xabd   : > { %17225 = vmatprep.subr.bf16.mxu1 %v17649_v43 }
 0xabf   : > { %17242 = vmatpush3.bf16.msra.mxu0 %v19475_v18 }
 0xac0   : > { %17243 = vmatprep.subr.bf16.mxu0 %v17649_v43  ;;  %17227 = vmatpush3.bf16.msra.mxu1 %v19485_v27 }
 0xac1   : > { %17228 = vmatprep.subr.bf16.mxu1 %v17649_v43 }
 0xac3   : > { %17245 = vmatpush3.bf16.msra.mxu0 %v19489_v31 }
 0xac4   : > { %17246 = vmatprep.subr.bf16.mxu0 %v17649_v43  ;;  %17230 = vmatpush3.bf16.msra.mxu1 %v19512_v20 }
 0xac5   : > { %17231 = vmatprep.subr.bf16.mxu1 %v17649_v43 }
 0xac7   : > { %17248 = vmatpush3.bf16.msra.mxu0 %v19501_v0 }
 0xac8   : > { %17249 = vmatprep.subr.bf16.mxu0 %v17649_v43  ;;  %17233 = vmatpush3.bf16.msra.mxu1 %v19531_v15 }
 0xac9   : > { %16126 = vmatprep.subr.mxu1 %v17647_v1 }
 0xacb   : > { %17251 = vmatpush3.bf16.msra.mxu0 %v19520_v55 }
 0xacc   : > { %17252 = vmatprep.subr.bf16.mxu0 %v17649_v43 }
 0xacf   : > { %17254 = vmatpush3.bf16.msra.mxu0 %v19540_v22 }
 0xad0   : > { %17255 = vmatprep.subr.bf16.mxu0 %v17649_v43 }
 0xad3   : > { %17257 = vmatpush3.bf16.msra.mxu0 %v19552_v32 }
 0xad4   : > { %17258 = vmatprep.subr.bf16.mxu0 %v17649_v43 }
 0xb7d   : > { %v10423_v49 = vpop.f32.mrb[120].mxu1 }
 0xb7e   : > { %v16045_v45 = vpop.f32.mrb[121].mxu1 }
 0xb7f   : > { %v17367_v45 = vpack.c.bf16 %v13834_v39, %v13833_v29  ;;  %v13873_v29 = vld [vmem:[%s20186_s5 + $0x110] sm:$0xff] }
 0xb81   : > { %v10353_v58 = vpop.f32.mrb[64].mxu0 }
 0xb82   : > { %v10424_v4 = vadd.f32 %v10423_v49, %v10353_v58  ;;  %v16010_v37 = vpop.f32.mrb[65].mxu0  ;;  %v13835_v49 = vld [vmem:[%s20186_s5 + $0x50] sm:$0xff]  ;;  %v13836_v58 = vld [vmem:[%s20186_s5 + $0x58] sm:$0xff] }
 0xb83   : > { %v13837_v37 = vld [vmem:[%s20186_s5 + $0x60] sm:$0xff] }
 0xb85   : > { %v10496_v42 = vpop.f32.mrb[66].mxu0 }
 0xb86   : > { %v16050_v57 = vpop.f32.mrb[67].mxu0  ;;  %16084 = vmatmul.mubr.f32.vlgmr.msra.gmra.mrb[122].mxu1 %v10496_v42  ;;  %v13838_v42 = vld [vmem:[%s20186_s5 + $0x68] sm:$0xff] }
 0xb87   : > { %16127 = vmatpush3.msk.msra.mxu1 %vm7549_vm1, %v10748_v5  ;;  %16128 = vmatprep.mubr.msk.f32.mxu1 %vm17650_vm10, %v17647_v1  ;;  %v17373_v57 = vpack.c.bf16 %v13838_v42, %v13837_v37 }
 0xb88   : > { %16131 = vmatprep.subr.mxu1 %v17647_v1 }
 0xb89   : > { %v10653_v60 = vpop.f32.mrb[68].mxu0 }
 0xb8a   : > { %16124 = vmatmul.mubr.f32.vlgmr.msra.gmra.mrb[70].mxu0 %v10653_v60  ;;  %16129 = vmatmul.mubr.msk.f32.vlgmr.msra.gmra.mrb[124].mxu1 %vm7546_vm0, %v17770_v9  ;;  %v16090_v24 = vpop.f32.mrb[69].mxu0 }
 0xb8b   : > { %16132 = vmatpush3.msk.msra.mxu1 %vm7549_vm1, %v10748_v5  ;;  %16133 = vmatprep.mubr.msk.f32.mxu1 %vm17650_vm10, %v17647_v1  ;;  %v19830_v24 = vsel %vm11558_vm7, 1.0, %v17647_v1 }
 0xb8c   : > { %17282 = vmatprep.subr.bf16.mxu1 %v17649_v43  ;;  %17260 = vmatpush3.bf16.msra.mxu0 %v19217_v46 }
 0xb8d   : > { %17261 = vmatprep.subr.bf16.mxu0 %v17649_v43  ;;  %16168 = vmatprep.mubr.msk.f32.mxu0 %vm17650_vm10, %v17647_v1 }
 0xb8e   : > { %16134 = vmatmul.mubr.msk.f32.vlgmr.msra.gmra.mrb[126].mxu1 %vm7546_vm0, %v17755_v6 }
 0xb8f   : > { %17284 = vmatpush3.bf16.msra.mxu1 %v19230_v16  ;;  %16203 = vmatprep.mubr.msk.f32.mxu1 %vm17650_vm10, %v17647_v1 }
 0xb90   : > { %17285 = vmatprep.subr.bf16.mxu1 %v17649_v43  ;;  %17263 = vmatpush3.bf16.msra.mxu0 %v19240_v44 }
 0xb91   : > { %17264 = vmatprep.subr.bf16.mxu0 %v17649_v43 }
 0xb93   : > { %17287 = vmatpush3.bf16.msra.mxu1 %v19254_v62 }
 0xb94   : > { %17288 = vmatprep.subr.bf16.mxu1 %v17649_v43  ;;  %17266 = vmatpush3.bf16.msra.mxu0 %v19266_v13 }
 0xb95   : > { %17267 = vmatprep.subr.bf16.mxu0 %v17649_v43 }
 0xb97   : > { %17290 = vmatpush3.bf16.msra.mxu1 %v19276_v19 }
 0xb98   : > { %17291 = vmatprep.subr.bf16.mxu1 %v17649_v43  ;;  %17269 = vmatpush3.bf16.msra.mxu0 %v19286_v23  ;;  %v19708_v23 = vld [vmem:[%s20185_s4] ss:$0 sm:$0xff] }
 0xb99   : > { %17270 = vmatprep.subr.bf16.mxu0 %v17649_v43 }
 0xb9b   : > { %17293 = vmatpush3.bf16.msra.mxu1 %v19296_v28 }
 0xb9c   : > { %17294 = vmatprep.subr.bf16.mxu1 %v17649_v43  ;;  %17272 = vmatpush3.bf16.msra.mxu0 %v19306_v35 }
 0xb9d   : > { %17273 = vmatprep.subr.bf16.mxu0 %v17649_v43 }
 0xb9f   : > { %17296 = vmatpush3.bf16.msra.mxu1 %v19316_v61 }
 0xba0   : > { %17297 = vmatprep.subr.bf16.mxu1 %v17649_v43  ;;  %17275 = vmatpush3.bf16.msra.mxu0 %v19326_v51 }
 0xba1   : > { %17276 = vmatprep.subr.bf16.mxu0 %v17649_v43 }
 0xba3   : > { %17299 = vmatpush3.bf16.msra.mxu1 %v19330_v54  ;;  %v11244_v54 = vld [vmem:[#allocation4 + $0x8] sm:$0x3f] }
 0xba4   : > { %17300 = vmatprep.subr.bf16.mxu1 %v17649_v43  ;;  %17278 = vmatpush3.bf16.msra.mxu0 %v19353_v40 }
 0xba5   : > { %17279 = vmatprep.subr.bf16.mxu0 %v17649_v43 }
 0xba7   : > { %17302 = vmatpush3.bf16.msra.mxu1 %v19342_v30  ;;  %v11243_v30 = vld [vmem:[#allocation4] sm:$0x3f] }
 0xba8   : > { %17303 = vmatprep.subr.bf16.mxu1 %v17649_v43  ;;  %17281 = vmatpush3.bf16.msra.mxu0 %v19372_v17  ;;  %v11245_v40 = vmax.f32 %v11243_v30, %v11244_v54 }
 0xba9   : > { %17306 = vmatprep.subr.bf16.mxu0 %v17649_v43 }
 0xbab   : > { %17305 = vmatpush3.bf16.msra.mxu1 %v19361_v52 }
 0xbac   : > { %17330 = vmatprep.subr.bf16.mxu1 %v17649_v43 }
 0xc59   : > { %v10582_v6 = vpop.f32.mrb[122].mxu1 }
 0xc5a   : > { %v10586_v9 = vadd.f32 %v10582_v6, %v10424_v4  ;;  %v16085_v46 = vpop.f32.mrb[123].mxu1  ;;  %v17370_v4 = vpack.c.bf16 %v13836_v58, %v13835_v49  ;;  %v11877_v6 = vld [vmem:[#allocation4 + $0x18] sm:$0x3f] }
 0xc5b   : > { %v11876_v46 = vld [vmem:[#allocation4 + $0x10] sm:$0x3f]  ;;  %v13875_v58 = vld [vmem:[%s20186_s5 + $0x120] sm:$0xff] }
 0xc5d   : > { %v10739_v16 = vpop.f32.mrb[70].mxu0  ;;  %v10818_v44 = vpop.f32.mrb[124].mxu1 }
 0xc5e   : > { %v10743_v62 = vadd.f32 %v10739_v16, %v10586_v9  ;;  %v16130_v13 = vpop.f32.mrb[125].mxu1  ;;  %16204 = vmatmul.mubr.f32.vlgmr.msra.gmra.mrb[128].mxu1 %v10818_v44  ;;  %v16125_v19 = vpop.f32.mrb[71].mxu0  ;;  %v19840_v9 = vsel %vm11717_vm11, 1.0, %v17647_v1  ;;  %v11878_v16 = vmax.f32 %v11876_v46, %v11877_v6  ;;  %v13840_v44 = vld [vmem:[%s20186_s5 + $0x78] sm:$0xff] }
 0xc5f   : > { %17332 = vmatpush3.bf16.msra.mxu1 %v19431_v38  ;;  %16273 = vmatprep.mubr.msk.f32.mxu1 %vm17650_vm10, %v17647_v1  ;;  %v13845_v13 = vld [vmem:[%s20186_s5 + $0x80] sm:$0xff]  ;;  %v13846_v19 = vld [vmem:[%s20186_s5 + $0x88] sm:$0xff] }
 0xc60   : > { %v10744_v28 = vadd.f32 %v19708_v23, %v10743_v62  ;;  %17333 = vmatprep.subr.bf16.mxu1 %v17649_v43  ;;  %v17376_v62 = vpack.c.bf16 %v13840_v44, %v13839_v3  ;;  %v13882_v3 = vld [vmem:[%s20186_s5 + $0x140] sm:$0xff]  ;;  %v13883_v44 = vld [vmem:[%s20186_s5 + $0x148] sm:$0xff] }
 0xc61   : > { %v10904_v35 = vpop.f32.mrb[126].mxu1 }
 0xc62   : > { %v10745_v61 = vmax.f32 %v10744_v28, 0.0  ;;  %v16135_v51 = vpop.f32.mrb[127].mxu1  ;;  %16169 = vmatmul.mubr.f32.vlgmr.msra.gmra.mrb[72].mxu0 %v10904_v35  ;;  %v17379_v35 = vpack.c.bf16 %v13846_v19, %v13845_v13  ;;  %v17415_v19 = vpack.c.bf16 %v13883_v44, %v13882_v3 }
 0xc63   : > { %17308 = vmatpush3.bf16.msra.mxu0 %v19384_v36  ;;  %17335 = vmatpush3.bf16.msra.mxu1 %v19453_v14  ;;  %v13848_v51 = vld [vmem:[%s20186_s5 + $0x98] sm:$0xff] }
 0xc64   : > { %10747 = vst.msk [vmem:[#allocation4 + $0x20] sm:$0x3f] %vm8194_vm2, %v10745_v61  ;;  %17309 = vmatprep.subr.bf16.mxu0 %v17649_v43  ;;  %17336 = vmatprep.subr.bf16.mxu1 %v17649_v43  ;;  %v13847_v61 = vld [vmem:[%s20186_s5 + $0x90] sm:$0xff] }
 0xc65   : > { %16238 = vmatprep.mubr.msk.f32.mxu0 %vm17650_vm10, %v17647_v1 }
 0xc67   : > { %17311 = vmatpush3.bf16.msra.mxu0 %v19397_v50  ;;  %17338 = vmatpush3.bf16.msra.mxu1 %v19475_v18 }
 0xc68   : > { %17312 = vmatprep.subr.bf16.mxu0 %v17649_v43  ;;  %17339 = vmatprep.subr.bf16.mxu1 %v17649_v43 }
 0xc6b   : > { %17314 = vmatpush3.bf16.msra.mxu0 %v19417_v26  ;;  %17341 = vmatpush3.bf16.msra.mxu1 %v19489_v31  ;;  %v11476_v31 = vld [vmem:[%s20186_s5 + $0x8] sm:$0xff] }
 0xc6c   : > { %17315 = vmatprep.subr.bf16.mxu0 %v17649_v43  ;;  %17342 = vmatprep.subr.bf16.mxu1 %v17649_v43 }
 0xc6f   : > { %17317 = vmatpush3.bf16.msra.mxu0 %v19441_v48  ;;  %17344 = vmatpush3.bf16.msra.mxu1 %v19501_v0 }
 0xc70   : > { %17318 = vmatprep.subr.bf16.mxu0 %v17649_v43  ;;  %17345 = vmatprep.subr.bf16.mxu1 %v17649_v43 }
 0xc73   : > { %17320 = vmatpush3.bf16.msra.mxu0 %v19465_v47  ;;  %17347 = vmatpush3.bf16.msra.mxu1 %v19520_v55 }
 0xc74   : > { %17321 = vmatprep.subr.bf16.mxu0 %v17649_v43  ;;  %17348 = vmatprep.subr.bf16.mxu1 %v17649_v43 }
 0xc77   : > { %17323 = vmatpush3.bf16.msra.mxu0 %v19485_v27  ;;  %17350 = vmatpush3.bf16.msra.mxu1 %v19540_v22  ;;  %v11475_v27 = vld [vmem:[%s20186_s5] sm:$0xff] }
 0xc78   : > { %17324 = vmatprep.subr.bf16.mxu0 %v17649_v43  ;;  %17351 = vmatprep.subr.bf16.mxu1 %v17649_v43  ;;  %v17355_v56 = vpack.c.bf16 %v11476_v31, %v11475_v27  ;;  %v13861_v27 = vld [vmem:[%s20186_s5 + $0xc8] sm:$0xff] }
 0xc7b   : > { %17326 = vmatpush3.bf16.msra.mxu0 %v19512_v20  ;;  %17353 = vmatpush3.bf16.msra.mxu1 %v19552_v32  ;;  %v19772_v32 = vsel %vm11396_vm5, 1.0, %v17647_v1 }
 0xc7c   : > { %17327 = vmatprep.subr.bf16.mxu0 %v17649_v43  ;;  %16281 = vmatprep.subr.mxu1 %v17647_v1 }
 0xc7e   : > { %16274 = vmatmul.mubr.f32.vlgmr.msra.gmra.mrb[130].mxu1 %v18750_v33 }
 0xc7f   : > { %17329 = vmatpush3.bf16.msra.mxu0 %v19531_v15  ;;  %16282 = vmatpush3.msk.msra.mxu1 %vm11249_vm3, %v11245_v40 }
 0xc80   : > { %16276 = vmatprep.subr.mxu0 %v17647_v1  ;;  %16283 = vmatprep.mubr.msk.f32.mxu1 %vm17650_vm10, %v17647_v1 }
 0xc81   : > { %17366 = vmatprep.subr.bf16.mxu1 %v17649_v43 }
 0xc82   : > { %16239 = vmatmul.mubr.f32.vlgmr.msra.gmra.mrb[74].mxu0 %v18752_v34  ;;  %16284 = vmatmul.mubr.msk.f32.vlgmr.msra.gmra.mrb[132].mxu1 %vm11246_vm4, %v18565_v59 }
 0xc83   : > { %16277 = vmatpush3.msk.msra.mxu0 %vm11249_vm3, %v11245_v40  ;;  %16278 = vmatprep.mubr.msk.f32.mxu0 %vm17650_vm10, %v17647_v1  ;;  %v17382_v40 = vpack.c.bf16 %v13848_v51, %v13847_v61 }
 0xc84   : > { %16286 = vmatprep.subr.mxu0 %v17647_v1  ;;  %16331 = vmatprep.mubr.msk.f32.mxu1 %vm17650_vm10, %v17647_v1 }
 0xc85   : > { %17368 = vmatpush3.bf16.msra.mxu1 %v17367_v45 }
 0xc86   : > { %16279 = vmatmul.mubr.msk.f32.vlgmr.msra.gmra.mrb[76].mxu0 %vm11246_vm4, %v18554_v2  ;;  %17369 = vmatprep.subr.bf16.mxu1 %v17649_v43 }
 0xc87   : > { %16288 = vmatprep.mubr.msk.f32.mxu0 %vm17650_vm10, %v17647_v1 }
 0xc89   : > { %17371 = vmatpush3.bf16.msra.mxu1 %v17370_v4  ;;  %v13876_v4 = vld [vmem:[%s20186_s5 + $0x128] sm:$0xff] }
 0xc8a   : > { %17372 = vmatprep.subr.bf16.mxu1 %v17649_v43 }
 0xc8d   : > { %17374 = vmatpush3.bf16.msra.mxu1 %v17373_v57  ;;  %v17409_v57 = vpack.c.bf16 %v13876_v4, %v13875_v58  ;;  %v13922_v58 = vld [vmem:[%s20186_s5 + $0x218] sm:$0xff] }
 0xc8e   : > { %17375 = vmatprep.subr.bf16.mxu1 %v17649_v43 }
 0xc91   : > { %17377 = vmatpush3.bf16.msra.mxu1 %v17376_v62 }
 0xc92   : > { %17378 = vmatprep.subr.bf16.mxu1 %v17649_v43 }
 0xd31   : > { %v11060_v33 = vpop.f32.mrb[128].mxu1 }
 0xd32   : > { %v16205_v34 = vpop.f32.mrb[129].mxu1 }
 0xd33   : > { %v13850_v34 = vld [vmem:[%s20186_s5 + $0xa8] sm:$0xff] }
 0xd35   : > { %v10990_v52 = vpop.f32.mrb[72].mxu0 }
 0xd36   : > { %v11061_v17 = vadd.f32 %v11060_v33, %v10990_v52  ;;  %v16170_v36 = vpop.f32.mrb[73].mxu0  ;;  %v13849_v33 = vld [vmem:[%s20186_s5 + $0xa0] sm:$0xff] }
 0xd37   : > { %v17385_v36 = vpack.c.bf16 %v13850_v34, %v13849_v33  ;;  %v13887_v33 = vld [vmem:[%s20186_s5 + $0x168] sm:$0xff] }
 0xd51   : > { %v11233_v50 = vpop.f32.mrb[130].mxu1 }
 0xd52   : > { %v16275_v26 = vpop.f32.mrb[131].mxu1 }
 0xd53   : > { %v13852_v26 = vld [vmem:[%s20186_s5 + $0xb8] sm:$0xff] }
 0xd55   : > { %v11146_v38 = vpop.f32.mrb[74].mxu0  ;;  %v11391_v48 = vpop.f32.mrb[132].mxu1 }
 0xd56   : > { %v11150_v14 = vadd.f32 %v11146_v38, %v11061_v17  ;;  %v16240_v47 = vpop.f32.mrb[75].mxu0  ;;  %v16285_v18 = vpop.f32.mrb[133].mxu1 }
 0xd57   : > { %v13860_v18 = vld [vmem:[%s20186_s5 + $0xc0] sm:$0xff] }
 0xd58   : > { %v11237_v0 = vadd.f32 %v11233_v50, %v11150_v14  ;;  %v13851_v50 = vld [vmem:[%s20186_s5 + $0xb0] sm:$0xff] }
 0xd59   : > { %v11319_v20 = vpop.f32.mrb[76].mxu0  ;;  %v17388_v14 = vpack.c.bf16 %v13852_v26, %v13851_v50  ;;  %v13898_v50 = vld [vmem:[%s20186_s5 + $0x188] sm:$0xff]  ;;  %v13899_v26 = vld [vmem:[%s20186_s5 + $0x190] sm:$0xff] }
 0xd5a   : > { %v11238_v55 = vadd.f32 %v19708_v23, %v11237_v0  ;;  %v11395_v15 = vmax.f32 %v11319_v20, %v11391_v48  ;;  %v16280_v22 = vpop.f32.mrb[77].mxu0  ;;  %v17391_v20 = vpack.c.bf16 %v13861_v27, %v13860_v18  ;;  %v13903_v18 = vld [vmem:[%s20186_s5 + $0x1b0] sm:$0xff]  ;;  %v13904_v27 = vld [vmem:[%s20186_s5 + $0x1b8] sm:$0xff] }
 0xd5c   : > { %v11239_v11 = vmax.f32 %v11238_v55, 0.0  ;;  %16287 = vmatpush3.msk.msra.mxu0 %vm475_vm8, %v11395_v15  ;;  %v13862_v55 = vld [vmem:[%s20186_s5 + $0xd0] sm:$0xff] }
 0xd5d   : > { %16289 = vmatmul.mubr.msk.f32.vlgmr.msra.gmra.mrb[78].mxu0 %vm468_vm9, %v19772_v32  ;;  %17354 = vmatprep.subr.bf16.mxu0 %v17649_v43 }
 0xd5e   : > { %11241 = vst.msk [vmem:[#allocation4 + $0x28] sm:$0x3f] %vm8194_vm2, %v11239_v11  ;;  %17356 = vmatpush3.bf16.msra.mxu0 %v17355_v56  ;;  %16307 = vmatprep.mubr.msk.f32.mxu0 %vm17650_vm10, %v17647_v1  ;;  %v12485_v11 = vld [vmem:[#allocation4 + $0x20] sm:$0x3f] }
 0xd5f   : > { %17357 = vmatprep.subr.bf16.mxu0 %v17649_v43 }
 0xd62   : > { %17359 = vmatpush3.bf16.msra.mxu0 %v17358_v41 }
 0xd63   : > { %17360 = vmatprep.subr.bf16.mxu0 %v17649_v43 }
 0xd65   : > { %v12486_v56 = vld [vmem:[#allocation4 + $0x28] sm:$0x3f] }
 0xd66   : > { %17362 = vmatpush3.bf16.msra.mxu0 %v17361_v10  ;;  %v12487_v41 = vmax.f32 %v12485_v11, %v12486_v56  ;;  %v13867_v10 = vld [vmem:[%s20186_s5 + $0xf8] sm:$0xff]  ;;  %v13912_v11 = vld [vmem:[%s20186_s5 + $0x1e0] sm:$0xff] }
 0xd67   : > { %17363 = vmatprep.subr.bf16.mxu0 %v17649_v43  ;;  %v17400_v63 = vpack.c.bf16 %v13867_v10, %v13866_v8 }
 0xd6a   : > { %17365 = vmatpush3.bf16.msra.mxu0 %v17364_v25 }
 0xd6b   : > { %16310 = vmatprep.subr.mxu0 %v17647_v1 }
 0xe30   : > { %v11471_v5 = vpop.f32.mrb[78].mxu0 }
 0xe31   : > { %v16290_v60 = vpop.f32.mrb[79].mxu0  ;;  %16308 = vmatmul.mubr.msk.f32.vlgmr.msra.gmra.mrb[80].mxu0 %vm11483_vm6, %v11471_v5  ;;  %v13877_v5 = vld [vmem:[%s20186_s5 + $0x130] sm:$0xff] }
 0xe32   : > { %16311 = vmatpush3.msk.msra.mxu0 %vm475_vm8, %v11395_v15  ;;  %16312 = vmatprep.mubr.msk.f32.mxu0 %vm17650_vm10, %v17647_v1  ;;  %v13878_v60 = vld [vmem:[%s20186_s5 + $0x138] sm:$0xff] }
 0xe33   : > { %16334 = vmatprep.subr.mxu0 %v17647_v1 }
 0xe35   : > { %16313 = vmatmul.mubr.msk.f32.vlgmr.msra.gmra.mrb[82].mxu0 %vm468_vm9, %v19830_v24 }
 0xe36   : > { %16335 = vmatpush3.msk.msra.mxu0 %vm475_vm8, %v11395_v15  ;;  %16336 = vmatprep.mubr.msk.f32.mxu0 %vm17650_vm10, %v17647_v1  ;;  %v13863_v15 = vld [vmem:[%s20186_s5 + $0xd8] sm:$0xff] }
 0xe37   : > { %16358 = vmatprep.subr.mxu0 %v17647_v1  ;;  %v17394_v22 = vpack.c.bf16 %v13863_v15, %v13862_v55  ;;  %v13910_v15 = vld [vmem:[%s20186_s5 + $0x1d0] sm:$0xff] }
 0xe39   : > { %16337 = vmatmul.mubr.msk.f32.vlgmr.msra.gmra.mrb[84].mxu0 %vm468_vm9, %v19840_v9 }
 0xe3a   : > { %16359 = vmatpush3.msk.msra.mxu0 %vm11249_vm3, %v11878_v16  ;;  %16360 = vmatprep.mubr.msk.f32.mxu0 %vm17650_vm10, %v17647_v1 }
 0xe3b   : > { %16363 = vmatprep.subr.mxu0 %v17647_v1 }
 0xe3d   : > { %16361 = vmatmul.mubr.msk.f32.vlgmr.msra.gmra.mrb[86].mxu0 %vm11246_vm4, %v18554_v2 }
 0xe3e   : > { %16364 = vmatpush3.msk.msra.mxu0 %vm11249_vm3, %v11878_v16  ;;  %16365 = vmatprep.mubr.msk.f32.mxu0 %vm17650_vm10, %v17647_v1  ;;  %v17412_v16 = vpack.c.bf16 %v13878_v60, %v13877_v5  ;;  %v13925_v5 = vld [vmem:[%s20186_s5 + $0x230] sm:$0xff] }
 0xe3f   : > { %16368 = vmatprep.subr.mxu0 %v17647_v1 }
 0xe41   : > { %16366 = vmatmul.mubr.msk.f32.vlgmr.msra.gmra.mrb[88].mxu0 %vm11246_vm4, %v18565_v59 }
 0xe42   : > { %16370 = vmatprep.mubr.msk.f32.mxu0 %vm17650_vm10, %v17647_v1 }
 0xf04   : > { %v19872_v23 = vpop.f32.mrb[80].mxu0 }
 0xf05   : > { %v16309_v28 = vpop.f32.mrb[81].mxu0 }
 0xf06   : > { %v13884_v28 = vld [vmem:[%s20186_s5 + $0x150] sm:$0xff] }
 0xf08   : > { %v11630_v54 = vpop.f32.mrb[82].mxu0 }
 0xf09   : > { %v16314_v30 = vpop.f32.mrb[83].mxu0  ;;  %16332 = vmatmul.mubr.msk.f32.vlgmr.msra.gmra.mrb[134].mxu1 %vm11483_vm6, %v11630_v54 }
 0xf0a   : > { %17380 = vmatpush3.bf16.msra.mxu1 %v17379_v35  ;;  %16355 = vmatprep.mubr.msk.f32.mxu1 %vm17650_vm10, %v17647_v1  ;;  %v13885_v35 = vld [vmem:[%s20186_s5 + $0x158] sm:$0xff] }
 0xf0b   : > { %17381 = vmatprep.subr.bf16.mxu1 %v17649_v43  ;;  %v17418_v30 = vpack.c.bf16 %v13885_v35, %v13884_v28 }
 0xf0c   : > { %v11789_v52 = vpop.f32.mrb[84].mxu0 }
 0xf0d   : > { %v16338_v17 = vpop.f32.mrb[85].mxu0 }
 0xf0e   : > { %17383 = vmatpush3.bf16.msra.mxu1 %v17382_v40  ;;  %v13886_v40 = vld [vmem:[%s20186_s5 + $0x160] sm:$0xff] }
 0xf0f   : > { %17384 = vmatprep.subr.bf16.mxu1 %v17649_v43  ;;  %v17421_v34 = vpack.c.bf16 %v13887_v33, %v13886_v40 }
 0xf10   : > { %v11948_v38 = vpop.f32.mrb[86].mxu0 }
 0xf11   : > { %v16362_v48 = vpop.f32.mrb[87].mxu0 }
 0xf12   : > { %17386 = vmatpush3.bf16.msra.mxu1 %v17385_v36  ;;  %v13897_v36 = vld [vmem:[%s20186_s5 + $0x180] sm:$0xff] }
 0xf13   : > { %17387 = vmatprep.subr.bf16.mxu1 %v17649_v43 }
 0xf14   : > { %v12018_v47 = vpop.f32.mrb[88].mxu0 }
 0xf15   : > { %v12022_v31 = vmax.f32 %v11948_v38, %v12018_v47  ;;  %v16367_v0 = vpop.f32.mrb[89].mxu0  ;;  %v13900_v38 = vld [vmem:[%s20186_s5 + $0x198] sm:$0xff] }
 0xf16   : > { %17389 = vmatpush3.bf16.msra.mxu1 %v17388_v14  ;;  %v17430_v48 = vpack.c.bf16 %v13900_v38, %v13899_v26  ;;  %v13902_v14 = vld [vmem:[%s20186_s5 + $0x1a8] sm:$0xff]  ;;  %v13908_v0 = vld [vmem:[%s20186_s5 + $0x1c0] sm:$0xff] }
 0xf17   : > { %16369 = vmatpush3.msk.msra.mxu0 %vm475_vm8, %v12022_v31  ;;  %17390 = vmatprep.subr.bf16.mxu1 %v17649_v43 }
 0xf18   : > { %16371 = vmatmul.mubr.msk.f32.vlgmr.msra.gmra.mrb[90].mxu0 %vm468_vm9, %v19772_v32  ;;  %16392 = vmatprep.subr.mxu0 %v17647_v1 }
 0xf19   : > { %16356 = vmatmul.mubr.msk.f32.vlgmr.msra.gmra.mrb[134].mxu1 %vm11483_vm6, %v11789_v52  ;;  %16393 = vmatpush3.msk.msra.mxu0 %vm475_vm8, %v12022_v31  ;;  %v13888_v52 = vld [vmem:[%s20186_s5 + $0x170] sm:$0xff] }
 0xf1a   : > { %16394 = vmatprep.mubr.msk.f32.mxu0 %vm17650_vm10, %v17647_v1  ;;  %16416 = vmatprep.subr.mxu0 %v17647_v1 }
 0xf1b   : > { %17392 = vmatpush3.bf16.msra.mxu1 %v17391_v20  ;;  %16389 = vmatprep.mubr.msk.f32.mxu1 %vm17650_vm10, %v17647_v1  ;;  %v13909_v20 = vld [vmem:[%s20186_s5 + $0x1c8] sm:$0xff] }
 0xf1c   : > { %16395 = vmatmul.mubr.msk.f32.vlgmr.msra.gmra.mrb[92].mxu0 %vm468_vm9, %v19830_v24  ;;  %17393 = vmatprep.subr.bf16.mxu1 %v17649_v43  ;;  %v17439_v55 = vpack.c.bf16 %v13909_v20, %v13908_v0 }
 0xf1d   : > { %16417 = vmatpush3.msk.msra.mxu0 %vm475_vm8, %v12022_v31  ;;  %16418 = vmatprep.mubr.msk.f32.mxu0 %vm17650_vm10, %v17647_v1  ;;  %v17436_v31 = vpack.c.bf16 %v13904_v27, %v13903_v18 }
 0xf1e   : > { %16440 = vmatprep.subr.mxu0 %v17647_v1 }
 0xf1f   : > { %17395 = vmatpush3.bf16.msra.mxu1 %v17394_v22  ;;  %v13911_v22 = vld [vmem:[%s20186_s5 + $0x1d8] sm:$0xff] }
 0xf20   : > { %16419 = vmatmul.mubr.msk.f32.vlgmr.msra.gmra.mrb[94].mxu0 %vm468_vm9, %v19840_v9  ;;  %17396 = vmatprep.subr.bf16.mxu1 %v17649_v43  ;;  %v17442_v7 = vpack.c.bf16 %v13911_v22, %v13910_v15 }
 0xf21   : > { %16441 = vmatpush3.msk.msra.mxu0 %vm11249_vm3, %v12487_v41  ;;  %16442 = vmatprep.mubr.msk.f32.mxu0 %vm17650_vm10, %v17647_v1 }
 0xf22   : > { %16445 = vmatprep.subr.mxu0 %v17647_v1 }
 0xf23   : > { %17398 = vmatpush3.bf16.msra.mxu1 %v17397_v12 }
 0xf24   : > { %16443 = vmatmul.mubr.msk.f32.vlgmr.msra.gmra.mrb[96].mxu0 %vm11246_vm4, %v18554_v2  ;;  %17399 = vmatprep.subr.bf16.mxu1 %v17649_v43  ;;  %v13871_v2 = vld [vmem:[%s20186_s5 + $0x100] sm:$0xff] }
 0xf25   : > { %16446 = vmatpush3.msk.msra.mxu0 %vm11249_vm3, %v12487_v41  ;;  %16447 = vmatprep.mubr.msk.f32.mxu0 %vm17650_vm10, %v17647_v1  ;;  %v17403_v25 = vpack.c.bf16 %v13872_v21, %v13871_v2  ;;  %v13913_v41 = vld [vmem:[%s20186_s5 + $0x1e8] sm:$0xff]  ;;  %v13915_v2 = vld [vmem:[%s20186_s5 + $0x1f8] sm:$0xff] }
 0xf26   : > { %16450 = vmatprep.subr.mxu0 %v17647_v1  ;;  %v17445_v10 = vpack.c.bf16 %v13913_v41, %v13912_v11 }
 0xf27   : > { %17401 = vmatpush3.bf16.msra.mxu1 %v17400_v63  ;;  %v13914_v63 = vld [vmem:[%s20186_s5 + $0x1f0] sm:$0xff] }
 0xf28   : > { %16448 = vmatmul.mubr.msk.f32.vlgmr.msra.gmra.mrb[98].mxu0 %vm11246_vm4, %v18565_v59  ;;  %17402 = vmatprep.subr.bf16.mxu1 %v17649_v43  ;;  %v13874_v59 = vld [vmem:[%s20186_s5 + $0x118] sm:$0xff] }
 0xf29   : > { %16452 = vmatprep.mubr.msk.f32.mxu0 %vm17650_vm10, %v17647_v1  ;;  %v17406_v45 = vpack.c.bf16 %v13874_v59, %v13873_v29  ;;  %v17448_v29 = vpack.c.bf16 %v13915_v2, %v13914_v63  ;;  %v13919_v59 = vld [vmem:[%s20186_s5 + $0x200] sm:$0xff] }
 0xfeb   : > { %v12092_v39 = vpop.f32.mrb[90].mxu0 }
 0xfec   : > { %v16372_v49 = vpop.f32.mrb[91].mxu0  ;;  %16390 = vmatmul.mubr.msk.f32.vlgmr.msra.gmra.mrb[134].mxu1 %vm11483_vm6, %v12092_v39  ;;  %v13920_v39 = vld [vmem:[%s20186_s5 + $0x208] sm:$0xff] }
 0xfed   : > { %17404 = vmatpush3.bf16.msra.mxu1 %v17403_v25  ;;  %16413 = vmatprep.mubr.msk.f32.mxu1 %vm17650_vm10, %v17647_v1  ;;  %v17451_v49 = vpack.c.bf16 %v13920_v39, %v13919_v59 }
 0xfee   : > { %17405 = vmatprep.subr.bf16.mxu1 %v17649_v43 }
 0xfef   : > { %v12245_v37 = vpop.f32.mrb[92].mxu0 }
 0xff0   : > { %v16396_v42 = vpop.f32.mrb[93].mxu0 }
 0xff1   : > { %17407 = vmatpush3.bf16.msra.mxu1 %v17406_v45  ;;  %v13921_v45 = vld [vmem:[%s20186_s5 + $0x210] sm:$0xff]  ;;  %v13924_v42 = vld [vmem:[%s20186_s5 + $0x228] sm:$0xff] }
 0xff2   : > { %17408 = vmatprep.subr.bf16.mxu1 %v17649_v43  ;;  %v17454_v4 = vpack.c.bf16 %v13922_v58, %v13921_v45 }
 0xff3   : > { %v12398_v6 = vpop.f32.mrb[94].mxu0 }
 0xff4   : > { %v16420_v46 = vpop.f32.mrb[95].mxu0 }
 0xff5   : > { %17410 = vmatpush3.bf16.msra.mxu1 %v17409_v57 }
 0xff6   : > { %17411 = vmatprep.subr.bf16.mxu1 %v17649_v43 }
 0xff7   : > { %v12557_v62 = vpop.f32.mrb[96].mxu0 }
 0xff8   : > { %v16444_v13 = vpop.f32.mrb[97].mxu0 }
 0xff9   : > { %17413 = vmatpush3.bf16.msra.mxu1 %v17412_v16 }
 0xffa   : > { %17414 = vmatprep.subr.bf16.mxu1 %v17649_v43 }
 0xffb   : > { %v12627_v61 = vpop.f32.mrb[98].mxu0 }
 0xffc   : > { %16414 = vmatmul.mubr.msk.f32.vlgmr.msra.gmra.mrb[134].mxu1 %vm11483_vm6, %v12245_v37  ;;  %v12631_v51 = vmax.f32 %v12557_v62, %v12627_v61  ;;  %v16449_v54 = vpop.f32.mrb[99].mxu0  ;;  %v13923_v37 = vld [vmem:[%s20186_s5 + $0x220] sm:$0xff] }
 0xffd   : > { %17416 = vmatpush3.bf16.msra.mxu1 %v17415_v19  ;;  %16437 = vmatprep.mubr.msk.f32.mxu1 %vm17650_vm10, %v17647_v1  ;;  %v17457_v57 = vpack.c.bf16 %v13924_v42, %v13923_v37 }
 0xffe   : > { %16451 = vmatpush3.msk.msra.mxu0 %vm475_vm8, %v12631_v51  ;;  %17417 = vmatprep.subr.bf16.mxu1 %v17649_v43 }
 0xfff   : > { %16453 = vmatmul.mubr.msk.f32.vlgmr.msra.gmra.mrb[100].mxu0 %vm468_vm9, %v19772_v32  ;;  %16474 = vmatprep.subr.mxu0 %v17647_v1  ;;  %v13889_v32 = vld [vmem:[%s20186_s5 + $0x178] sm:$0xff] }
0x1000   : > { %16475 = vmatpush3.msk.msra.mxu0 %vm475_vm8, %v12631_v51  ;;  %16476 = vmatprep.mubr.msk.f32.mxu0 %vm17650_vm10, %v17647_v1  ;;  %v17424_v17 = vpack.c.bf16 %v13889_v32, %v13888_v52 }
0x1001   : > { %17419 = vmatpush3.bf16.msra.mxu1 %v17418_v30  ;;  %16498 = vmatprep.subr.mxu0 %v17647_v1 }
0x1002   : > { %17420 = vmatprep.subr.bf16.mxu1 %v17649_v43 }
0x1003   : > { %16477 = vmatmul.mubr.msk.f32.vlgmr.msra.gmra.mrb[102].mxu0 %vm468_vm9, %v19830_v24  ;;  %v17427_v24 = vpack.c.bf16 %v13898_v50, %v13897_v36 }
0x1004   : > { %16499 = vmatpush3.msk.msra.mxu0 %vm475_vm8, %v12631_v51  ;;  %16500 = vmatprep.mubr.msk.f32.mxu0 %vm17650_vm10, %v17647_v1 }
0x1005   : > { %17422 = vmatpush3.bf16.msra.mxu1 %v17421_v34 }
0x1006   : > { %17423 = vmatprep.subr.bf16.mxu1 %v17649_v43 }
0x1007   : > { %16501 = vmatmul.mubr.msk.f32.vlgmr.msra.gmra.mrb[104].mxu0 %vm468_vm9, %v19840_v9  ;;  %v13901_v9 = vld [vmem:[%s20186_s5 + $0x1a0] sm:$0xff] }
0x1008   : > { %v17433_v47 = vpack.c.bf16 %v13902_v14, %v13901_v9 }
0x1009   : > { %17425 = vmatpush3.bf16.msra.mxu1 %v17424_v17 }
0x100a   : > { %17426 = vmatprep.subr.bf16.mxu1 %v17649_v43 }
0x100c   : > { %16438 = vmatmul.mubr.msk.f32.vlgmr.msra.gmra.mrb[134].mxu1 %vm11483_vm6, %v12398_v6  ;;  %v11242_v6 = vld [vmem:[%s20187_s6] sm:$0x1] }
0x100d   : > { %17428 = vmatpush3.bf16.msra.mxu1 %v17427_v24  ;;  %16471 = vmatprep.mubr.msk.f32.mxu1 %vm17650_vm10, %v17647_v1  ;;  %v11557_v46 = vadd.f32 %v19872_v23, %v11242_v6 }
0x100e   : > { %17429 = vmatprep.subr.bf16.mxu1 %v17649_v43 }
0x1011   : > { %17431 = vmatpush3.bf16.msra.mxu1 %v17430_v48 }
0x1012   : > { %17432 = vmatprep.subr.bf16.mxu1 %v17649_v43 }
0x1015   : > { %17434 = vmatpush3.bf16.msra.mxu1 %v17433_v47 }
0x1016   : > { %17435 = vmatprep.subr.bf16.mxu1 %v17649_v43 }
0x1019   : > { %17437 = vmatpush3.bf16.msra.mxu1 %v17436_v31 }
0x101a   : > { %17438 = vmatprep.subr.bf16.mxu1 %v17649_v43 }
0x10d2   : > { %v12701_v56 = vpop.f32.mrb[100].mxu0 }
0x10d3   : > { %16472 = vmatmul.mubr.msk.f32.vlgmr.msra.gmra.mrb[134].mxu1 %vm11483_vm6, %v12701_v56  ;;  %v16454_v53 = vpop.f32.mrb[101].mxu0 }
0x10d4   : > { %17440 = vmatpush3.bf16.msra.mxu1 %v17439_v55  ;;  %16495 = vmatprep.mubr.msk.f32.mxu1 %vm17650_vm10, %v17647_v1 }
0x10d5   : > { %17441 = vmatprep.subr.bf16.mxu1 %v17649_v43 }
0x10d6   : > { %v12854_v12 = vpop.f32.mrb[102].mxu0 }
0x10d7   : > { %v16478_v8 = vpop.f32.mrb[103].mxu0 }
0x10d8   : > { %17443 = vmatpush3.bf16.msra.mxu1 %v17442_v7 }
0x10d9   : > { %17444 = vmatprep.subr.bf16.mxu1 %v17649_v43 }
0x10da   : > { %v13007_v21 = vpop.f32.mrb[104].mxu0 }
0x10db   : > { %v16502_v25 = vpop.f32.mrb[105].mxu0 }
0x10dc   : > { %17446 = vmatpush3.bf16.msra.mxu1 %v17445_v10 }
0x10dd   : > { %17447 = vmatprep.subr.bf16.mxu1 %v17649_v43 }
0x10e0   : > { %17449 = vmatpush3.bf16.msra.mxu1 %v17448_v29 }
0x10e1   : > { %17450 = vmatprep.subr.bf16.mxu1 %v17649_v43 }
0x10e3   : > { %16496 = vmatmul.mubr.msk.f32.vlgmr.msra.gmra.mrb[134].mxu1 %vm11483_vm6, %v12854_v12 }
0x10e4   : > { %17452 = vmatpush3.bf16.msra.mxu1 %v17451_v49  ;;  %16519 = vmatprep.mubr.msk.f32.mxu1 %vm17650_vm10, %v17647_v1  ;;  %v13926_v1 = vld [vmem:[%s20186_s5 + $0x238] sm:$0xff] }
0x10e5   : > { %17453 = vmatprep.subr.bf16.mxu1 %v17649_v43  ;;  %v17460_v60 = vpack.c.bf16 %v13926_v1, %v13925_v5 }
0x10e8   : > { %17455 = vmatpush3.bf16.msra.mxu1 %v17454_v4 }
0x10e9   : > { %17456 = vmatprep.subr.bf16.mxu1 %v17649_v43 }
0x10ec   : > { %17458 = vmatpush3.bf16.msra.mxu1 %v17457_v57 }
0x10ed   : > { %17459 = vmatprep.subr.bf16.mxu1 %v17649_v43 }
0x10f0   : > { %17461 = vmatpush3.bf16.msra.mxu1 %v17460_v60 }
0x10f3   : > { %16520 = vmatmul.mubr.msk.f32.vlgmr.msra.gmra.mrb[134].mxu1 %vm11483_vm6, %v13007_v21 }
0x11c6   : > { %v13089_v16 = vpop.f32.mrb[134].mxu1 }
0x11c7   : > { %v17463_v3 = vadd.f32 %v13089_v16, %v11557_v46  ;;  %v16521_v44 = vpop.f32.mrb[135].mxu1 }
0x11c9   : > { %13094 = vst [vmem:[%s270_s18] sm:$0x1] %v17463_v3 }
0x11ca   : > { %17596 = shalt.err (!%p17593_p3)
}
0x11cb   : > { %s17597_s13 = scalar_lea.hbm %s20139_s22, 16  ;;  %s17601_s16 = scalar_lea.hbm %s20188_s7, 32 }
0x11cc   : > { %p17598_p4 = scmp.ne.s32.totalorder %s20139_s22, %s17597_s13  ;;  %p17602_p9 = scmp.lt.u32.totalorder %s20139_s22, %s20188_s7 }
0x11cd   : > { %p17603_p10 = scmp.lt.u32.totalorder %s17601_s16, %s17597_s13  ;;  %p17605_p12 = scmp.lt.u32.totalorder %s17597_s13, %s20139_s22 }
0x11ce   : > { %p17599_p7 = pnand %p17598_p4, %p17730_p5 }
0x11cf   : > { %p17604_p11 = por %p17603_p10, %p17602_p9 }
0x11d0   : > { %p17600_p8 = pneg %p17599_p7 }
0x11d1   : > { %p17606_p13 = por %p17605_p12, %p17604_p11 }
0x11d3   : > { %p17607_p0 = pnand %p17606_p13, %p17600_p8 }
0x11d5   : > { %17610 = shalt.err (!%p17607_p0)
}
0x11d6   : > { %17539 = dma.vmem_to_hbm [thread:$0]  (%p17730_p5), %s20141_s19, 16, %s20139_s22, %s13096_s23  }
0x11d7 PF: > { %p17545_p1 = scmp.ge.s32.totalorder %s17645_s27, 2  ;;  %s13120_s20 = sand.u32 1, %s17633_s24  }
0x11d8   : > { %s13121_s21 = scalar_lea.sflag [#allocation6], %s13120_s20 }
0x11d9   : > { %p17542_p2 = pnand %p17545_p1, %p17734_p6 }
0x11db   : > { %17628 = dma.done.wait (!%p17542_p2), %s13121_s21, 16  }
0x11dc   : > { %17630 = vsyncadd (!%p17542_p2), %s13121_s21, 4294967280  ;;  %p17_p3 = scmp.ge.s32.totalorder %s17717_s30, 4   ;;  %s20195_s24 = smov %s17637_s25 }
0x11dd   : > { %s20196_s25 = smov %s17641_s26  ;;  %s20197_s26 = smov %s17728_s10 }
0x11de   : > { %s20198_s27 = smov %s17717_s30  ;;  %19 = sbr.rel (!%p17_p3) target bundleno = 3 (0x3), region = 123 }
0x11e5   :  { %13125 = vsyncpa [#allocation6], 1 }
0x11e6   :  { %13127 = vsyncpa [#allocation6 + $0x1], 1 }

</bundles_post_ra>
